<compile_context>
chip_gen: v5e
topology: v5e:2x2
jax: 0.10.0
libtpu: 0.0.40
codegen_flags: <defaults>
</compile_context>

<pallas_src>
import functools

import jax
import jax.numpy as jnp
from jax import lax
from jax.experimental import pallas as pl
from jax.experimental.pallas import tpu as pltpu


def _relu_conv3x3_kernel(x_ref, w_ref, o_ref, col_ref, *, Wp, nlane, Cin):
    """Im2col + single fused matmul; channels on sublanes, pixels on lanes.

    x_ref  : (Cin, Npad)      bf16  ReLU'd, zero-padded input (row, col) flat
    w_ref  : (Cout, 9*Cin)    bf16  taps packed as K = tap*Cin + cin
    o_ref  : (Cout, nlane)    f32   lane-dense output (tail lanes are junk)
    col_ref: (9*Cin, nlane)   bf16  im2col scratch
    """
    # Build the im2col slab: each tap row-block is a lane-shifted copy of the
    # padded slab.  Stores go straight to the scratch ref, so only one
    # shifted tile is live at a time (no accumulator / RHS vreg pressure).
    for kh in range(3):
        for kw in range(3):
            tap = kh * 3 + kw
            shift = kh * Wp + kw
            col_ref[tap * Cin:(tap + 1) * Cin, :] = x_ref[:, shift:shift + nlane]

    # One K = 9*Cin contraction, f32 accumulate inside the MXU result path.
    o_ref[...] = jnp.dot(w_ref[...], col_ref[...],
                         preferred_element_type=jnp.float32)


def pack_conv_weights(w_oihw):
    """OIHW -> (Cout, 9*Cin) bf16, K ordered as (kh, kw, cin) = tap*Cin + cin.

    Call once at model-load time; the packed tensor is what the per-call
    wrapper consumes (no per-call transpose / cast op).
    """
    Cout, Cin, KH, KW = w_oihw.shape
    w = jnp.transpose(w_oihw, (0, 2, 3, 1)).reshape(Cout, KH * KW * Cin)
    return w.astype(jnp.bfloat16)


@jax.jit
def relu_conv2d_3x3(x_nchw, w_packed):
    """ReLU -> 3x3, stride-1, pad-1, bias-free conv (batch must be 1)."""
    N, Cin, H, W = x_nchw.shape
    assert N == 1, "this synthetic kernel handles batch=1 (as in the module)"
    Cout = w_packed.shape[0]
    assert w_packed.shape[1] == 9 * Cin
    Wp = W + 2  # padded width (left + right zero pad)

    # Output lane extent: H*Wp rounded up to a multiple of 128 (unmasked lane
    # stores, full MXU columns) and of Wp (so it reshapes back to rows).
    nout = H * Wp                                   # 224 for 14x14
    nlane = -(-nout // 128) * 128                   # 256
    nlane = -(-nlane // Wp) * Wp                    # still 256
    assert nlane % Wp == 0 and nlane % 128 == 0
    rows_out = nlane // Wp                          # 16

    # Padded input rows: the largest tap shift is 2*Wp + 2; every shifted
    # nlane-wide slice must stay in bounds of the flattened padded slab.
    max_shift = 2 * Wp + 2
    rows_in = -(-(max_shift + nlane) // Wp)         # 19
    assert rows_in >= H + 2                         # covers the real bottom pad

    # ReLU + bf16 cast + zero-pad fuse into one elementwise pass under jit;
    # the slab reaches the kernel at half the f32 DMA bytes.  No transpose:
    # NCHW already puts channels on sublanes, pixels on lanes.
    xr = jnp.maximum(x_nchw[0], 0.0).astype(jnp.bfloat16)
    xp = jnp.pad(xr, ((0, 0), (1, rows_in - 1 - H), (1, 1)))
    x_flat = xp.reshape(Cin, rows_in * Wp)          # (192, 304) bf16

    flops = 2 * Cout * 9 * Cin * nlane
    bytes_accessed = x_flat.size * 2 + w_packed.size * 2 + Cout * nlane * 4

    out = pl.pallas_call(
        functools.partial(_relu_conv3x3_kernel, Wp=Wp, nlane=nlane, Cin=Cin),
        out_shape=jax.ShapeDtypeStruct((Cout, nlane), jnp.float32),
        in_specs=[
            pl.BlockSpec(memory_space=pltpu.MemorySpace.VMEM),
            pl.BlockSpec(memory_space=pltpu.MemorySpace.VMEM),
        ],
        out_specs=pl.BlockSpec(memory_space=pltpu.MemorySpace.VMEM),
        scratch_shapes=[pltpu.VMEM((9 * Cin, nlane), jnp.bfloat16)],
        cost_estimate=pl.CostEstimate(
            flops=flops, transcendentals=0, bytes_accessed=bytes_accessed),
    )(x_flat, w_packed)

    # (Cout, nlane) -> (Cout, rows_out, Wp) -> drop junk rows/cols -> NCHW.
    # (Consumers that accept the lane-dense (48, 16, 16) slab can skip this.)
    return out.reshape(Cout, rows_out, Wp)[:, :H, :W][None]


if __name__ == "__main__":
    key = jax.random.PRNGKey(0)
    kx, kw = jax.random.split(key)

    # Shapes implied by the module: x (1, 192, 14, 14), weight (48, 192, 3, 3)
    x = jax.random.normal(kx, (1, 192, 14, 14), dtype=jnp.float32)
    w = jax.random.normal(kw, (48, 192, 3, 3), dtype=jnp.float32) * 0.05

    # Weight packing happens once (model-load time), outside the call path.
    w_packed = jax.block_until_ready(pack_conv_weights(w))

    out = jax.block_until_ready(relu_conv2d_3x3(x, w_packed))
    assert out.shape == (1, 48, 14, 14), out.shape

    # Reference check against XLA's conv on ReLU(x).
    ref = lax.conv_general_dilated(
        jnp.maximum(x, 0.0), w,
        window_strides=(1, 1), padding=((1, 1), (1, 1)),
        dimension_numbers=("NCHW", "OIHW", "NCHW"),
        precision=lax.Precision.HIGHEST,
    )
    ref = jax.block_until_ready(ref)
    if not jnp.allclose(out, ref, rtol=5e-2, atol=2e-1):
        raise AssertionError("Pallas relu+conv mismatch vs XLA reference")

    print("KERNEL_OK")
</pallas_src>

<mosaic_0001>
module attributes {stable_mosaic.version = 11 : i64} {
  func.func @_relu_conv3x3_kernel(%arg0: memref<192x304xbf16, #tpu.memory_space<vmem>>, %arg1: memref<48x1728xbf16, #tpu.memory_space<vmem>>, %arg2: memref<48x256xf32, #tpu.memory_space<vmem>>, %arg3: memref<1728x256xbf16, #tpu.memory_space<vmem>>) attributes {dimension_semantics = [], scalar_prefetch = 0 : i64, scratch_operands = 1 : i64, tpu.core_type = #tpu.core_type<tc>} {
    %c0 = arith.constant 0 : index
    %c0_0 = arith.constant 0 : index
    %0 = vector.load %arg0[%c0, %c0_0] : memref<192x304xbf16, #tpu.memory_space<vmem>>, vector<192x256xbf16>
    %c0_1 = arith.constant 0 : index
    %c0_2 = arith.constant 0 : index
    %1 = vector.load %arg3[%c0_1, %c0_2] : memref<1728x256xbf16, #tpu.memory_space<vmem>>, vector<192x256xbf16>
    tpu.vector_store %arg3[%c0_1, %c0_2], %0 {strides = array<i32>} : memref<1728x256xbf16, #tpu.memory_space<vmem>>, vector<192x256xbf16>,
    %c0_3 = arith.constant 0 : index
    %c1 = arith.constant 1 : index
    %2 = vector.load %arg0[%c0_3, %c1] : memref<192x304xbf16, #tpu.memory_space<vmem>>, vector<192x256xbf16>
    %c192 = arith.constant 192 : index
    %c0_4 = arith.constant 0 : index
    %3 = vector.load %arg3[%c192, %c0_4] : memref<1728x256xbf16, #tpu.memory_space<vmem>>, vector<192x256xbf16>
    tpu.vector_store %arg3[%c192, %c0_4], %2 {strides = array<i32>} : memref<1728x256xbf16, #tpu.memory_space<vmem>>, vector<192x256xbf16>,
    %c0_5 = arith.constant 0 : index
    %c2 = arith.constant 2 : index
    %4 = vector.load %arg0[%c0_5, %c2] : memref<192x304xbf16, #tpu.memory_space<vmem>>, vector<192x256xbf16>
    %c384 = arith.constant 384 : index
    %c0_6 = arith.constant 0 : index
    %5 = vector.load %arg3[%c384, %c0_6] : memref<1728x256xbf16, #tpu.memory_space<vmem>>, vector<192x256xbf16>
    tpu.vector_store %arg3[%c384, %c0_6], %4 {strides = array<i32>} : memref<1728x256xbf16, #tpu.memory_space<vmem>>, vector<192x256xbf16>,
    %c0_7 = arith.constant 0 : index
    %c16 = arith.constant 16 : index
    %6 = vector.load %arg0[%c0_7, %c16] : memref<192x304xbf16, #tpu.memory_space<vmem>>, vector<192x256xbf16>
    %c576 = arith.constant 576 : index
    %c0_8 = arith.constant 0 : index
    %7 = vector.load %arg3[%c576, %c0_8] : memref<1728x256xbf16, #tpu.memory_space<vmem>>, vector<192x256xbf16>
    tpu.vector_store %arg3[%c576, %c0_8], %6 {strides = array<i32>} : memref<1728x256xbf16, #tpu.memory_space<vmem>>, vector<192x256xbf16>,
    %c0_9 = arith.constant 0 : index
    %c17 = arith.constant 17 : index
    %8 = vector.load %arg0[%c0_9, %c17] : memref<192x304xbf16, #tpu.memory_space<vmem>>, vector<192x256xbf16>
    %c768 = arith.constant 768 : index
    %c0_10 = arith.constant 0 : index
    %9 = vector.load %arg3[%c768, %c0_10] : memref<1728x256xbf16, #tpu.memory_space<vmem>>, vector<192x256xbf16>
    tpu.vector_store %arg3[%c768, %c0_10], %8 {strides = array<i32>} : memref<1728x256xbf16, #tpu.memory_space<vmem>>, vector<192x256xbf16>,
    %c0_11 = arith.constant 0 : index
    %c18 = arith.constant 18 : index
    %10 = vector.load %arg0[%c0_11, %c18] : memref<192x304xbf16, #tpu.memory_space<vmem>>, vector<192x256xbf16>
    %c960 = arith.constant 960 : index
    %c0_12 = arith.constant 0 : index
    %11 = vector.load %arg3[%c960, %c0_12] : memref<1728x256xbf16, #tpu.memory_space<vmem>>, vector<192x256xbf16>
    tpu.vector_store %arg3[%c960, %c0_12], %10 {strides = array<i32>} : memref<1728x256xbf16, #tpu.memory_space<vmem>>, vector<192x256xbf16>,
    %c0_13 = arith.constant 0 : index
    %c32 = arith.constant 32 : index
    %12 = vector.load %arg0[%c0_13, %c32] : memref<192x304xbf16, #tpu.memory_space<vmem>>, vector<192x256xbf16>
    %c1152 = arith.constant 1152 : index
    %c0_14 = arith.constant 0 : index
    %13 = vector.load %arg3[%c1152, %c0_14] : memref<1728x256xbf16, #tpu.memory_space<vmem>>, vector<192x256xbf16>
    tpu.vector_store %arg3[%c1152, %c0_14], %12 {strides = array<i32>} : memref<1728x256xbf16, #tpu.memory_space<vmem>>, vector<192x256xbf16>,
    %c0_15 = arith.constant 0 : index
    %c33 = arith.constant 33 : index
    %14 = vector.load %arg0[%c0_15, %c33] : memref<192x304xbf16, #tpu.memory_space<vmem>>, vector<192x256xbf16>
    %c1344 = arith.constant 1344 : index
    %c0_16 = arith.constant 0 : index
    %15 = vector.load %arg3[%c1344, %c0_16] : memref<1728x256xbf16, #tpu.memory_space<vmem>>, vector<192x256xbf16>
    tpu.vector_store %arg3[%c1344, %c0_16], %14 {strides = array<i32>} : memref<1728x256xbf16, #tpu.memory_space<vmem>>, vector<192x256xbf16>,
    %c0_17 = arith.constant 0 : index
    %c34 = arith.constant 34 : index
    %16 = vector.load %arg0[%c0_17, %c34] : memref<192x304xbf16, #tpu.memory_space<vmem>>, vector<192x256xbf16>
    %c1536 = arith.constant 1536 : index
    %c0_18 = arith.constant 0 : index
    %17 = vector.load %arg3[%c1536, %c0_18] : memref<1728x256xbf16, #tpu.memory_space<vmem>>, vector<192x256xbf16>
    tpu.vector_store %arg3[%c1536, %c0_18], %16 {strides = array<i32>} : memref<1728x256xbf16, #tpu.memory_space<vmem>>, vector<192x256xbf16>,
    %c0_19 = arith.constant 0 : index
    %c0_20 = arith.constant 0 : index
    %18 = vector.load %arg1[%c0_19, %c0_20] : memref<48x1728xbf16, #tpu.memory_space<vmem>>, vector<48x1728xbf16>
    %c0_21 = arith.constant 0 : index
    %c0_22 = arith.constant 0 : index
    %19 = vector.load %arg3[%c0_21, %c0_22] : memref<1728x256xbf16, #tpu.memory_space<vmem>>, vector<1728x256xbf16>
    %cst = arith.constant dense<0.000000e+00> : vector<48x256xf32>
    %20 = tpu.matmul %18, %19, %cst {dimension_numbers = #tpu.dot_dimension_numbers<[1], [0], [0], [1], [0, 0, 1, 1], [], []>} : vector<48x1728xbf16>, vector<1728x256xbf16>, vector<48x256xf32> -> vector<48x256xf32>
    %c0_23 = arith.constant 0 : index
    %c0_24 = arith.constant 0 : index
    %21 = vector.load %arg2[%c0_23, %c0_24] : memref<48x256xf32, #tpu.memory_space<vmem>>, vector<48x256xf32>
    tpu.vector_store %arg2[%c0_23, %c0_24], %20 {strides = array<i32>} : memref<48x256xf32, #tpu.memory_space<vmem>>, vector<48x256xf32>,
    return
  }
}

</mosaic_0001>

<bundles_post_ra>
// kernel: relu_conv2d_3x3.1
= control target key start
LH: loop header
LB: loop body
LE: loop exit
PB: predicated region body
PF: predicated region fallthrough
CT: control target
= control target key end

     0   :  { %s6306_s13 = smov 127   ;;  %vm300_vm0 = vcmask 1043456   ;;  %vm302_vm1 = vcmask 1039360   ;;  %vm639_vm2 = vcmask 1031168   ;;  %vm976_vm3 = vcmask 916480   ;;  %s6309_s7 = smov 111   ;;  %s9263_s0 = inlined_call_operand.vmem [shape: bf16[192,304], index: 0, kind: input, shape index: {}]   ;;  %s9264_s1 = inlined_call_operand.vmem [shape: bf16[48,1728], index: 1, kind: input, shape index: {}]   ;;  %s9265_s2 = inlined_call_operand.vmem [shape: f32[48,256], index: 2, kind: output, shape index: {}]  }
   0x1   :  { %v6332_v0 = vld [vmem:[%s9263_s0 + $0xc] sm:$0xff]  ;;  %v6337_v1 = vld [vmem:[%s9263_s0] sm:$0xff]  ;;  %v6346_v2 = vld [vmem:[%s9263_s0 + $0x18] sm:$0xff]  ;;  %vm1313_vm4 = vcmask 908288   ;;  %s6311_s15 = smov 95   ;;  %vm1650_vm5 = vcmask 900096  }
   0x2   :  { %160 = vrot.lane.b32.xlu1 %v6332_v0, %s6306_s13  ;;  %156 = vrot.lane.b32.xlu0 %v6337_v1, %s6306_s13  ;;  %v63_v3 = vld [vmem:[%s9263_s0 + $0x14] sm:$0xf]  ;;  %v61_v4 = vld [vmem:[%s9263_s0 + $0x8] sm:$0xf]  ;;  %s6312_s4 = smov 96   ;;  %vm2324_vm6 = vcmask 777216  }
   0x3   :  { %164 = vrot.lane.b32.xlu2 %v6346_v2, %s6306_s13  ;;  %v65_v5 = vld [vmem:[%s9263_s0 + $0x20] sm:$0xf]  ;;  %v67_v6 = vld [vmem:[%s9263_s0 + $0x2c] sm:$0xf]  ;;  %v6368_v7 = vld [vmem:[%s9263_s0 + $0x24] sm:$0xff]  ;;  %vm1987_vm7 = vcmask 785408  }
   0x4   :  { %v6373_v8 = vld [vmem:[%s9263_s0 + $0x30] sm:$0xff]  ;;  %v6383_v9 = vld [vmem:[%s9263_s0 + $0x3c] sm:$0xff]  ;;  %v69_v10 = vld [vmem:[%s9263_s0 + $0x38] sm:$0xf]  ;;  %s6313_s26 = smov 94   ;;  %vm2661_vm8 = vcmask 769024  }
   0x5   :  { %v71_v11 = vld [vmem:[%s9263_s0 + $0x44] sm:$0xf]  ;;  %v73_v12 = vld [vmem:[%s9263_s0 + $0x50] sm:$0xf]  ;;  %v6401_v13 = vld [vmem:[%s9263_s0 + $0x48] sm:$0xff]  ;;  %vm4302_vm9 = vcmask 523264  }
   0x6   :  { %v6406_v14 = vld [vmem:[%s9263_s0 + $0x54] sm:$0xff]  ;;  %v6416_v15 = vld [vmem:[%s9263_s0 + $0x60] sm:$0xff]  ;;  %v75_v16 = vld [vmem:[%s9263_s0 + $0x5c] sm:$0xf] }
   0x7   :  { %v77_v17 = vld [vmem:[%s9263_s0 + $0x68] sm:$0xf]  ;;  %v79_v18 = vld [vmem:[%s9263_s0 + $0x74] sm:$0xf]  ;;  %v6434_v19 = vld [vmem:[%s9263_s0 + $0x6c] sm:$0xff] }
   0x8   :  { %v6439_v20 = vld [vmem:[%s9263_s0 + $0x78] sm:$0xff]  ;;  %v6449_v21 = vld [vmem:[%s9263_s0 + $0x84] sm:$0xff]  ;;  %v81_v22 = vld [vmem:[%s9263_s0 + $0x80] sm:$0xf] }
   0x9   :  { %v83_v23 = vld [vmem:[%s9263_s0 + $0x8c] sm:$0xf]  ;;  %v85_v24 = vld [vmem:[%s9263_s0 + $0x98] sm:$0xf]  ;;  %v6467_v25 = vld [vmem:[%s9263_s0 + $0x90] sm:$0xff] }
   0xa   :  { %162 = vrot.lane.b32.xlu1 %v63_v3, %s6306_s13  ;;  %158 = vrot.lane.b32.xlu0 %v61_v4, %s6306_s13  ;;  %v6472_v26 = vld [vmem:[%s9263_s0 + $0x9c] sm:$0xff]  ;;  %v6482_v27 = vld [vmem:[%s9263_s0 + $0xa8] sm:$0xff] }
   0xb   :  { %166 = vrot.lane.b32.xlu2 %v65_v5, %s6306_s13  ;;  %v87_v28 = vld [vmem:[%s9263_s0 + $0xa4] sm:$0xf]  ;;  %v89_v29 = vld [vmem:[%s9263_s0 + $0xb0] sm:$0xf]  ;;  %v91_v30 = vld [vmem:[%s9263_s0 + $0xbc] sm:$0xf] }
   0xc   :  { %v6500_v31 = vld [vmem:[%s9263_s0 + $0xb4] sm:$0xff]  ;;  %v6505_v32 = vld [vmem:[%s9263_s0 + $0xc0] sm:$0xff]  ;;  %v6515_v33 = vld [vmem:[%s9263_s0 + $0xcc] sm:$0xff] }
   0xd   :  { %v93_v34 = vld [vmem:[%s9263_s0 + $0xc8] sm:$0xf]  ;;  %v95_v35 = vld [vmem:[%s9263_s0 + $0xd4] sm:$0xf]  ;;  %v97_v37 = vld [vmem:[%s9263_s0 + $0xe0] sm:$0xf] }
   0xe   :  { %v6533_v38 = vld [vmem:[%s9263_s0 + $0xd8] sm:$0xff]  ;;  %v6538_v39 = vld [vmem:[%s9263_s0 + $0xe4] sm:$0xff]  ;;  %v6548_v43 = vld [vmem:[%s9263_s0 + $0xf0] sm:$0xff] }
   0xf   :  { %v99_v44 = vld [vmem:[%s9263_s0 + $0xec] sm:$0xf]  ;;  %v101_v46 = vld [vmem:[%s9263_s0 + $0xf8] sm:$0xf]  ;;  %v103_v49 = vld [vmem:[%s9263_s0 + $0x104] sm:$0xf] }
  0x10   :  { %v6568_v50 = vld [vmem:[%s9263_s0 + $0xfc] sm:$0xff]  ;;  %v6573_v51 = vld [vmem:[%s9263_s0 + $0x108] sm:$0xff]  ;;  %v6583_v55 = vld [vmem:[%s9263_s0 + $0x114] sm:$0xff] }
  0x11   :  { %v105_v56 = vld [vmem:[%s9263_s0 + $0x110] sm:$0xf]  ;;  %v107_v57 = vld [vmem:[%s9263_s0 + $0x11c] sm:$0xf] }
  0x12   :  { %170 = vrot.lane.b32.xlu1 %v67_v6, %s6306_s13  ;;  %168 = vrot.lane.b32.xlu0 %v6368_v7, %s6306_s13  ;;  %v399_v6 = vld [vmem:[%s9263_s0 + $0x8] sm:$0xf] }
  0x13   :  { %172 = vrot.lane.b32.xlu2 %v6373_v8, %s6306_s13 }
  0x1a   :  { %176 = vrot.lane.b32.xlu1 %v6383_v9, %s6306_s13  ;;  %174 = vrot.lane.b32.xlu0 %v69_v10, %s6306_s13 }
  0x1b   :  { %178 = vrot.lane.b32.xlu2 %v71_v11, %s6306_s13 }
  0x22   :  { %182 = vrot.lane.b32.xlu1 %v73_v12, %s6306_s13  ;;  %180 = vrot.lane.b32.xlu0 %v6401_v13, %s6306_s13 }
  0x23   :  { %184 = vrot.lane.b32.xlu2 %v6406_v14, %s6306_s13 }
  0x2a   :  { %188 = vrot.lane.b32.xlu1 %v6416_v15, %s6306_s13  ;;  %186 = vrot.lane.b32.xlu0 %v75_v16, %s6306_s13 }
  0x2b   :  { %190 = vrot.lane.b32.xlu2 %v77_v17, %s6306_s13 }
  0x32   :  { %194 = vrot.lane.b32.xlu1 %v79_v18, %s6306_s13  ;;  %192 = vrot.lane.b32.xlu0 %v6434_v19, %s6306_s13 }
  0x33   :  { %196 = vrot.lane.b32.xlu2 %v6439_v20, %s6306_s13 }
  0x3a   :  { %200 = vrot.lane.b32.xlu1 %v6449_v21, %s6306_s13  ;;  %198 = vrot.lane.b32.xlu0 %v81_v22, %s6306_s13 }
  0x3b   :  { %202 = vrot.lane.b32.xlu2 %v83_v23, %s6306_s13 }
  0x42   :  { %206 = vrot.lane.b32.xlu1 %v85_v24, %s6306_s13  ;;  %204 = vrot.lane.b32.xlu0 %v6467_v25, %s6306_s13  ;;  %v401_v24 = vld [vmem:[%s9263_s0 + $0x14] sm:$0xf] }
  0x43   :  { %208 = vrot.lane.b32.xlu2 %v6472_v26, %s6306_s13 }
  0x4a   :  { %212 = vrot.lane.b32.xlu1 %v6482_v27, %s6306_s13  ;;  %210 = vrot.lane.b32.xlu0 %v87_v28, %s6306_s13 }
  0x4b   :  { %214 = vrot.lane.b32.xlu2 %v89_v29, %s6306_s13  ;;  %v403_v29 = vld [vmem:[%s9263_s0 + $0x20] sm:$0xf] }
  0x52   :  { %218 = vrot.lane.b32.xlu1 %v91_v30, %s6306_s13  ;;  %216 = vrot.lane.b32.xlu0 %v6500_v31, %s6306_s13 }
  0x53   :  { %220 = vrot.lane.b32.xlu2 %v6505_v32, %s6306_s13 }
  0x5a   :  { %224 = vrot.lane.b32.xlu1 %v6515_v33, %s6306_s13  ;;  %222 = vrot.lane.b32.xlu0 %v93_v34, %s6306_s13 }
  0x5b   :  { %226 = vrot.lane.b32.xlu2 %v95_v35, %s6306_s13 }
  0x5d   :  { %v165_v36 = vpop.permute.xlu2 %164 }
  0x5e   :  { %v256_v40 = vrot.slane %v165_v36, 4 }
  0x62   :  { %230 = vrot.lane.b32.xlu1 %v97_v37, %s6306_s13  ;;  %228 = vrot.lane.b32.xlu0 %v6533_v38, %s6306_s13 }
  0x63   :  { %232 = vrot.lane.b32.xlu2 %v6538_v39, %s6306_s13 }
  0x65   :  { %v167_v41 = vpop.permute.xlu2 %166 }
  0x66   :  { %v257_v42 = vrot.slane %v167_v41, 4 }
  0x68   :  { %v306_v45 = vsel %vm300_vm0, %v256_v40, %v257_v42 }
  0x69   :  { %v307_v47 = vsel %vm302_vm1, %v165_v36, %v306_v45  ;;  %v405_v45 = vld [vmem:[%s9263_s0 + $0x2c] sm:$0xf] }
  0x6a   :  { %236 = vrot.lane.b32.xlu1 %v6548_v43, %s6306_s13  ;;  %234 = vrot.lane.b32.xlu0 %v99_v44, %s6306_s13  ;;  %376 = vst [vmem:[#allocation2 + $0xd0] sm:$0xff] %v307_v47 }
  0x6b   :  { %238 = vrot.lane.b32.xlu2 %v101_v46, %s6306_s13 }
  0x6d   :  { %v173_v48 = vpop.permute.xlu2 %172 }
  0x6e   :  { %v260_v36 = vrot.slane %v173_v48, 4 }
  0x72   :  { %242 = vrot.lane.b32.xlu1 %v103_v49, %s6306_s13  ;;  %240 = vrot.lane.b32.xlu0 %v6568_v50, %s6306_s13 }
  0x73   :  { %244 = vrot.lane.b32.xlu2 %v6573_v51, %s6306_s13 }
  0x74   :  { %v161_v52 = vpop.permute.xlu1 %160  ;;  %v157_v53 = vpop.permute.xlu0 %156 }
  0x75   :  { %v179_v54 = vpop.permute.xlu2 %178  ;;  %v254_v60 = vrot.slane %v161_v52, 4  ;;  %v252_v61 = vrot.slane %v157_v53, 4 }
  0x76   :  { %v263_v30 = vrot.slane %v179_v54, 4 }
  0x7a   :  { %248 = vrot.lane.b32.xlu1 %v6583_v55, %s6306_s13  ;;  %246 = vrot.lane.b32.xlu0 %v105_v56, %s6306_s13 }
  0x7b   :  { %250 = vrot.lane.b32.xlu2 %v107_v57, %s6306_s13  ;;  %s6307_s13 = smov 126  }
  0x7c   :  { %v163_v58 = vpop.permute.xlu1 %162  ;;  %v159_v59 = vpop.permute.xlu0 %158 }
  0x7d   :  { %v255_v62 = vrot.slane %v163_v58, 4  ;;  %v253_v63 = vrot.slane %v159_v59, 4  ;;  %v6595_v3 = vpop.permute.xlu2 %184  ;;  %v409_v59 = vld [vmem:[%s9263_s0 + $0x44] sm:$0xf] }
  0x7f   :  { %v304_v4 = vsel %vm300_vm0, %v254_v60, %v255_v62  ;;  %v301_v5 = vsel %vm300_vm0, %v252_v61, %v253_v63  ;;  %v266_v63 = vrot.slane %v6595_v3, 4 }
  0x80   :  { %v305_v10 = vsel %vm302_vm1, %v161_v52, %v304_v4  ;;  %v303_v11 = vsel %vm302_vm1, %v157_v53, %v301_v5 }
  0x81   :  { %375 = vst [vmem:[#allocation2 + $0xc8] sm:$0xff] %v305_v10 }
  0x82   :  { %374 = vst [vmem:[#allocation2 + $0xc0] sm:$0xff] %v303_v11  ;;  %496 = vrot.lane.b32.xlu1 %v399_v6, %s6307_s13  ;;  %494 = vrot.lane.b32.xlu0 %v6337_v1, %s6307_s13 }
  0x83   :  { %498 = vrot.lane.b32.xlu2 %v6332_v0, %s6307_s13 }
  0x84   :  { %v171_v12 = vpop.permute.xlu1 %170  ;;  %v169_v16 = vpop.permute.xlu0 %168 }
  0x85   :  { %v259_v17 = vrot.slane %v171_v12, 4  ;;  %v258_v18 = vrot.slane %v169_v16, 4  ;;  %v191_v22 = vpop.permute.xlu2 %190  ;;  %v411_v12 = vld [vmem:[%s9263_s0 + $0x50] sm:$0xf] }
  0x86   :  { %v269_v60 = vrot.slane %v191_v22, 4 }
  0x87   :  { %v308_v23 = vsel %vm300_vm0, %v258_v18, %v259_v17 }
  0x88   :  { %v309_v28 = vsel %vm302_vm1, %v169_v16, %v308_v23 }
  0x89   :  { %377 = vst [vmem:[#allocation2 + $0xd8] sm:$0xff] %v309_v28 }
  0x8a   :  { %502 = vrot.lane.b32.xlu1 %v6346_v2, %s6307_s13  ;;  %500 = vrot.lane.b32.xlu0 %v401_v24, %s6307_s13 }
  0x8b   :  { %504 = vrot.lane.b32.xlu2 %v403_v29, %s6307_s13 }
  0x8c   :  { %v177_v34 = vpop.permute.xlu1 %176  ;;  %v175_v35 = vpop.permute.xlu0 %174 }
  0x8d   :  { %v262_v37 = vrot.slane %v177_v34, 4  ;;  %v261_v40 = vrot.slane %v175_v35, 4  ;;  %v6621_v41 = vpop.permute.xlu2 %196 }
  0x8f   :  { %v312_v42 = vsel %vm300_vm0, %v262_v37, %v263_v30  ;;  %v310_v44 = vsel %vm300_vm0, %v260_v36, %v261_v40 }
  0x90   :  { %v313_v46 = vsel %vm302_vm1, %v177_v34, %v312_v42  ;;  %v311_v47 = vsel %vm302_vm1, %v173_v48, %v310_v44  ;;  %v407_v48 = vld [vmem:[%s9263_s0 + $0x38] sm:$0xf]  ;;  %v415_v34 = vld [vmem:[%s9263_s0 + $0x68] sm:$0xf] }
  0x91   :  { %379 = vst [vmem:[#allocation2 + $0xe8] sm:$0xff] %v313_v46 }
  0x92   :  { %378 = vst [vmem:[#allocation2 + $0xe0] sm:$0xff] %v311_v47  ;;  %508 = vrot.lane.b32.xlu1 %v405_v45, %s6307_s13  ;;  %506 = vrot.lane.b32.xlu0 %v6368_v7, %s6307_s13  ;;  %v272_v47 = vrot.slane %v6621_v41, 4 }
  0x93   :  { %510 = vrot.lane.b32.xlu2 %v6373_v8, %s6307_s13 }
  0x94   :  { %v183_v49 = vpop.permute.xlu1 %182  ;;  %v181_v52 = vpop.permute.xlu0 %180 }
  0x95   :  { %v265_v53 = vrot.slane %v183_v49, 4  ;;  %v264_v54 = vrot.slane %v181_v52, 4  ;;  %v203_v56 = vpop.permute.xlu2 %202 }
  0x96   :  { %v275_v40 = vrot.slane %v203_v56, 4  ;;  %v417_v56 = vld [vmem:[%s9263_s0 + $0x74] sm:$0xf] }
  0x97   :  { %v314_v57 = vsel %vm300_vm0, %v264_v54, %v265_v53 }
  0x98   :  { %v315_v58 = vsel %vm302_vm1, %v181_v52, %v314_v57  ;;  %v6109_v44 = vld [vmem:[#allocation2 + $0xe4] sm:$0xf0] }
  0x99   :  { %380 = vst [vmem:[#allocation2 + $0xf0] sm:$0xff] %v315_v58  ;;  %v5282_v42 = vld [vmem:[#allocation2 + $0xe0] sm:$0xf]  ;;  %v6107_v58 = vld [vmem:[#allocation2 + $0xd4] sm:$0xf0] }
  0x9a   :  { %514 = vrot.lane.b32.xlu1 %v6383_v9, %s6307_s13  ;;  %512 = vrot.lane.b32.xlu0 %v407_v48, %s6307_s13  ;;  %v5283_v54 = vor.u32 %v6109_v44, %v5282_v42 }
  0x9b   :  { %516 = vrot.lane.b32.xlu2 %v409_v59, %s6307_s13 }
  0x9c   :  { %v189_v61 = vpop.permute.xlu1 %188  ;;  %v187_v62 = vpop.permute.xlu0 %186 }
  0x9d   :  { %v268_v4 = vrot.slane %v189_v61, 4  ;;  %v267_v5 = vrot.slane %v187_v62, 4  ;;  %v6648_v6 = vpop.permute.xlu2 %208 }
  0x9f   :  { %v318_v10 = vsel %vm300_vm0, %v268_v4, %v269_v60  ;;  %v316_v11 = vsel %vm300_vm0, %v266_v63, %v267_v5  ;;  %v5266_v63 = vld [vmem:[#allocation2 + $0xc0] sm:$0xf]  ;;  %v6105_v4 = vld [vmem:[#allocation2 + $0xc4] sm:$0xf0] }
  0xa0   :  { %v319_v16 = vsel %vm302_vm1, %v189_v61, %v318_v10  ;;  %v317_v17 = vsel %vm302_vm1, %v6595_v3, %v316_v11  ;;  %v413_v3 = vld [vmem:[%s9263_s0 + $0x5c] sm:$0xf]  ;;  %v5290_v35 = vld [vmem:[#allocation2 + $0xf0] sm:$0xf] }
  0xa1   :  { %382 = vst [vmem:[#allocation2 + $0x100] sm:$0xff] %v319_v16  ;;  %v5274_v61 = vld [vmem:[#allocation2 + $0xd0] sm:$0xf]  ;;  %v5267_v16 = vor.u32 %v6105_v4, %v5266_v63 }
  0xa2   :  { %381 = vst [vmem:[#allocation2 + $0xf8] sm:$0xff] %v317_v17  ;;  %520 = vrot.lane.b32.xlu1 %v411_v12, %s6307_s13  ;;  %518 = vrot.lane.b32.xlu0 %v6401_v13, %s6307_s13  ;;  %v5275_v62 = vor.u32 %v6107_v58, %v5274_v61 }
  0xa3   :  { %522 = vrot.lane.b32.xlu2 %v6406_v14, %s6307_s13 }
  0xa4   :  { %v195_v18 = vpop.permute.xlu1 %194  ;;  %v193_v22 = vpop.permute.xlu0 %192 }
  0xa5   :  { %v271_v23 = vrot.slane %v195_v18, 4  ;;  %v270_v24 = vrot.slane %v193_v22, 4  ;;  %v6663_v28 = vpop.permute.xlu2 %214  ;;  %v419_v18 = vld [vmem:[%s9263_s0 + $0x80] sm:$0xf] }
  0xa7   :  { %v320_v29 = vsel %vm300_vm0, %v270_v24, %v271_v23  ;;  %v281_v23 = vrot.slane %v6663_v28, 4 }
  0xa8   :  { %v321_v30 = vsel %vm302_vm1, %v193_v22, %v320_v29 }
  0xa9   :  { %383 = vst [vmem:[#allocation2 + $0x108] sm:$0xff] %v321_v30  ;;  %v6111_v36 = vld [vmem:[#allocation2 + $0xf4] sm:$0xf0] }
  0xaa   :  { %526 = vrot.lane.b32.xlu1 %v6416_v15, %s6307_s13  ;;  %524 = vrot.lane.b32.xlu0 %v413_v3, %s6307_s13  ;;  %v5291_v37 = vor.u32 %v6111_v36, %v5290_v35  ;;  %v278_v3 = vrot.slane %v6648_v6, 4 }
  0xab   :  { %528 = vrot.lane.b32.xlu2 %v415_v34, %s6307_s13 }
  0xac   :  { %4336 = vmatpush.bf16.msra.mxu1 %v5291_v37  ;;  %v201_v45 = vpop.permute.xlu1 %200  ;;  %v199_v46 = vpop.permute.xlu0 %198 }
  0xad   :  { %v274_v49 = vrot.slane %v201_v45, 4  ;;  %v273_v52 = vrot.slane %v199_v46, 4  ;;  %v6678_v53 = vpop.permute.xlu2 %220 }
  0xaf   :  { %v324_v57 = vsel %vm300_vm0, %v274_v49, %v275_v40  ;;  %v322_v48 = vsel %vm300_vm0, %v272_v47, %v273_v52  ;;  %v423_v40 = vld [vmem:[%s9263_s0 + $0x98] sm:$0xf] }
  0xb0   :  { %v325_v59 = vsel %vm302_vm1, %v201_v45, %v324_v57  ;;  %v323_v60 = vsel %vm302_vm1, %v6621_v41, %v322_v48  ;;  %4337 = vmatpush.bf16.msra.mxu1 %v5283_v54 }
  0xb1   :  { %385 = vst [vmem:[#allocation2 + $0x118] sm:$0xff] %v325_v59 }
  0xb2   :  { %384 = vst [vmem:[#allocation2 + $0x110] sm:$0xff] %v323_v60  ;;  %532 = vrot.lane.b32.xlu1 %v417_v56, %s6307_s13  ;;  %530 = vrot.lane.b32.xlu0 %v6434_v19, %s6307_s13  ;;  %v284_v56 = vrot.slane %v6678_v53, 4 }
  0xb3   :  { %534 = vrot.lane.b32.xlu2 %v6439_v20, %s6307_s13  ;;  %v421_v20 = vld [vmem:[%s9263_s0 + $0x8c] sm:$0xf] }
  0xb4   :  { %4338 = vmatpush.bf16.msra.mxu1 %v5275_v62  ;;  %v207_v5 = vpop.permute.xlu1 %206  ;;  %v205_v10 = vpop.permute.xlu0 %204 }
  0xb5   :  { %v277_v11 = vrot.slane %v207_v5, 4  ;;  %v276_v41 = vrot.slane %v205_v10, 4  ;;  %v227_v12 = vpop.permute.xlu2 %226 }
  0xb7   :  { %v326_v17 = vsel %vm300_vm0, %v276_v41, %v277_v11 }
  0xb8   :  { %v327_v22 = vsel %vm302_vm1, %v205_v10, %v326_v17  ;;  %4339 = vmatpush.bf16.msra.mxu1 %v5267_v16 }
  0xb9   :  { %386 = vst [vmem:[#allocation2 + $0x120] sm:$0xff] %v327_v22 }
  0xba   :  { %538 = vrot.lane.b32.xlu1 %v6449_v21, %s6307_s13  ;;  %536 = vrot.lane.b32.xlu0 %v419_v18, %s6307_s13 }
  0xbb   :  { %540 = vrot.lane.b32.xlu2 %v421_v20, %s6307_s13 }
  0xbc   :  { %v213_v24 = vpop.permute.xlu1 %212  ;;  %v211_v29 = vpop.permute.xlu0 %210 }
  0xbd   :  { %v280_v30 = vrot.slane %v213_v24, 4  ;;  %v279_v34 = vrot.slane %v211_v29, 4  ;;  %v6707_v35 = vpop.permute.xlu2 %232 }
  0xbe   :  { %v290_v20 = vrot.slane %v6707_v35, 4 }
  0xbf   :  { %v330_v36 = vsel %vm300_vm0, %v280_v30, %v281_v23  ;;  %v328_v37 = vsel %vm300_vm0, %v278_v3, %v279_v34 }
  0xc0   :  { %v331_v28 = vsel %vm302_vm1, %v213_v24, %v330_v36  ;;  %v329_v42 = vsel %vm302_vm1, %v6648_v6, %v328_v37  ;;  %v425_v6 = vld [vmem:[%s9263_s0 + $0xa4] sm:$0xf] }
  0xc1   :  { %388 = vst [vmem:[#allocation2 + $0x130] sm:$0xff] %v331_v28 }
  0xc2   :  { %387 = vst [vmem:[#allocation2 + $0x128] sm:$0xff] %v329_v42  ;;  %544 = vrot.lane.b32.xlu1 %v423_v40, %s6307_s13  ;;  %542 = vrot.lane.b32.xlu0 %v6467_v25, %s6307_s13  ;;  %v427_v25 = vld [vmem:[%s9263_s0 + $0xb0] sm:$0xf] }
  0xc3   :  { %546 = vrot.lane.b32.xlu2 %v6472_v26, %s6307_s13  ;;  %v287_v26 = vrot.slane %v227_v12, 4 }
  0xc4   :  { %v219_v44 = vpop.permute.xlu1 %218  ;;  %v217_v45 = vpop.permute.xlu0 %216 }
  0xc5   :  { %v283_v46 = vrot.slane %v219_v44, 4  ;;  %v282_v47 = vrot.slane %v217_v45, 4  ;;  %v239_v49 = vpop.permute.xlu2 %238 }
  0xc7   :  { %v332_v52 = vsel %vm300_vm0, %v282_v47, %v283_v46 }
  0xc8   :  { %v333_v54 = vsel %vm302_vm1, %v217_v45, %v332_v52 }
  0xc9   :  { %389 = vst [vmem:[#allocation2 + $0x138] sm:$0xff] %v333_v54 }
  0xca   :  { %550 = vrot.lane.b32.xlu1 %v6482_v27, %s6307_s13  ;;  %548 = vrot.lane.b32.xlu0 %v425_v6, %s6307_s13  ;;  %v429_v27 = vld [vmem:[%s9263_s0 + $0xbc] sm:$0xf] }
  0xcb   :  { %552 = vrot.lane.b32.xlu2 %v427_v25, %s6307_s13 }
  0xcc   :  { %v225_v57 = vpop.permute.xlu1 %224  ;;  %v223_v48 = vpop.permute.xlu0 %222 }
  0xcd   :  { %v286_v58 = vrot.slane %v225_v57, 4  ;;  %v285_v59 = vrot.slane %v223_v48, 4  ;;  %v6735_v60 = vpop.permute.xlu2 %244 }
  0xce   :  { %v296_v52 = vrot.slane %v6735_v60, 4 }
  0xcf   :  { %v336_v61 = vsel %vm300_vm0, %v286_v58, %v287_v26  ;;  %v334_v62 = vsel %vm300_vm0, %v284_v56, %v285_v59 }
  0xd0   :  { %v337_v63 = vsel %vm302_vm1, %v225_v57, %v336_v61  ;;  %v335_v4 = vsel %vm302_vm1, %v6678_v53, %v334_v62  ;;  %v431_v53 = vld [vmem:[%s9263_s0 + $0xc8] sm:$0xf] }
  0xd1   :  { %391 = vst [vmem:[#allocation2 + $0x148] sm:$0xff] %v337_v63 }
  0xd2   :  { %390 = vst [vmem:[#allocation2 + $0x140] sm:$0xff] %v335_v4  ;;  %556 = vrot.lane.b32.xlu1 %v429_v27, %s6307_s13  ;;  %554 = vrot.lane.b32.xlu0 %v6500_v31, %s6307_s13  ;;  %v433_v31 = vld [vmem:[%s9263_s0 + $0xd4] sm:$0xf] }
  0xd3   :  { %558 = vrot.lane.b32.xlu2 %v6505_v32, %s6307_s13  ;;  %v293_v32 = vrot.slane %v239_v49, 4 }
  0xd4   :  { %v231_v5 = vpop.permute.xlu1 %230  ;;  %v229_v10 = vpop.permute.xlu0 %228 }
  0xd5   :  { %v289_v11 = vrot.slane %v231_v5, 4  ;;  %v288_v41 = vrot.slane %v229_v10, 4  ;;  %v251_v12 = vpop.permute.xlu2 %250 }
  0xd7   :  { %v338_v16 = vsel %vm300_vm0, %v288_v41, %v289_v11 }
  0xd8   :  { %v339_v17 = vsel %vm302_vm1, %v229_v10, %v338_v16 }
  0xd9   :  { %392 = vst [vmem:[#allocation2 + $0x150] sm:$0xff] %v339_v17 }
  0xda   :  { %562 = vrot.lane.b32.xlu1 %v6515_v33, %s6307_s13  ;;  %560 = vrot.lane.b32.xlu0 %v431_v53, %s6307_s13  ;;  %v435_v33 = vld [vmem:[%s9263_s0 + $0xe0] sm:$0xf] }
  0xdb   :  { %564 = vrot.lane.b32.xlu2 %v433_v31, %s6307_s13 }
  0xdc   :  { %v237_v18 = vpop.permute.xlu1 %236  ;;  %v235_v22 = vpop.permute.xlu0 %234 }
  0xdd   :  { %v292_v23 = vrot.slane %v237_v18, 4  ;;  %v291_v24 = vrot.slane %v235_v22, 4  ;;  %v6763_v29 = vpop.permute.xlu2 %498 }
  0xde   :  { %v592_v53 = vrot.slane %v6763_v29, 4 }
  0xdf   :  { %v342_v3 = vsel %vm300_vm0, %v292_v23, %v293_v32  ;;  %v340_v30 = vsel %vm300_vm0, %v290_v20, %v291_v24  ;;  %v736_v23 = vld [vmem:[%s9263_s0 + $0x8] sm:$0xf] }
  0xe0   :  { %v343_v34 = vsel %vm302_vm1, %v237_v18, %v342_v3  ;;  %v341_v36 = vsel %vm302_vm1, %v6707_v35, %v340_v30  ;;  %v437_v35 = vld [vmem:[%s9263_s0 + $0xec] sm:$0xf] }
  0xe1   :  { %394 = vst [vmem:[#allocation2 + $0x160] sm:$0xff] %v343_v34 }
  0xe2   :  { %393 = vst [vmem:[#allocation2 + $0x158] sm:$0xff] %v341_v36  ;;  %568 = vrot.lane.b32.xlu1 %v435_v33, %s6307_s13  ;;  %566 = vrot.lane.b32.xlu0 %v6533_v38, %s6307_s13  ;;  %v439_v38 = vld [vmem:[%s9263_s0 + $0xf8] sm:$0xf]  ;;  %v5338_v33 = vld [vmem:[#allocation2 + $0x150] sm:$0xf] }
  0xe3   :  { %570 = vrot.lane.b32.xlu2 %v6538_v39, %s6307_s13  ;;  %v299_v39 = vrot.slane %v251_v12, 4  ;;  %v5330_v36 = vld [vmem:[#allocation2 + $0x140] sm:$0xf] }
  0xe4   :  { %v243_v37 = vpop.permute.xlu1 %242  ;;  %v241_v40 = vpop.permute.xlu0 %240 }
  0xe5   :  { %v295_v28 = vrot.slane %v243_v37, 4  ;;  %v294_v42 = vrot.slane %v241_v40, 4  ;;  %v505_v44 = vpop.permute.xlu2 %504  ;;  %v6121_v37 = vld [vmem:[#allocation2 + $0x144] sm:$0xf0] }
  0xe6   :  { %v595_v11 = vrot.slane %v505_v44, 4 }
  0xe7   :  { %v344_v45 = vsel %vm300_vm0, %v294_v42, %v295_v28 }
  0xe8   :  { %v345_v46 = vsel %vm302_vm1, %v241_v40, %v344_v45  ;;  %v5346_v32 = vld [vmem:[#allocation2 + $0x160] sm:$0xf]  ;;  %v5331_v45 = vor.u32 %v6121_v37, %v5330_v36 }
  0xe9   :  { %395 = vst [vmem:[#allocation2 + $0x168] sm:$0xff] %v345_v46  ;;  %v6123_v24 = vld [vmem:[#allocation2 + $0x154] sm:$0xf0] }
  0xea   :  { %574 = vrot.lane.b32.xlu1 %v6548_v43, %s6307_s13  ;;  %572 = vrot.lane.b32.xlu0 %v437_v35, %s6307_s13  ;;  %v441_v43 = vld [vmem:[%s9263_s0 + $0x104] sm:$0xf]  ;;  %v5339_v34 = vor.u32 %v6123_v24, %v5338_v33  ;;  %v6119_v46 = vld [vmem:[#allocation2 + $0x134] sm:$0xf0] }
  0xeb   :  { %576 = vrot.lane.b32.xlu2 %v439_v38, %s6307_s13 }
  0xec   :  { %v249_v47 = vpop.permute.xlu1 %248  ;;  %v247_v49 = vpop.permute.xlu0 %246 }
  0xed   :  { %v298_v6 = vrot.slane %v249_v47, 4  ;;  %v297_v54 = vrot.slane %v247_v49, 4  ;;  %v6791_v25 = vpop.permute.xlu2 %510 }
  0xef   :  { %v348_v26 = vsel %vm300_vm0, %v298_v6, %v299_v39  ;;  %v346_v57 = vsel %vm300_vm0, %v296_v52, %v297_v54  ;;  %v5322_v39 = vld [vmem:[#allocation2 + $0x130] sm:$0xf]  ;;  %v6117_v52 = vld [vmem:[#allocation2 + $0x124] sm:$0xf0] }
  0xf0   :  { %v349_v48 = vsel %vm302_vm1, %v249_v47, %v348_v26  ;;  %v347_v56 = vsel %vm302_vm1, %v6735_v60, %v346_v57  ;;  %v443_v60 = vld [vmem:[%s9263_s0 + $0x110] sm:$0xf]  ;;  %v6125_v41 = vld [vmem:[#allocation2 + $0x164] sm:$0xf0]  ;;  %v5323_v47 = vor.u32 %v6119_v46, %v5322_v39  ;;  %v598_v26 = vrot.slane %v6791_v25, 4 }
  0xf1   :  { %397 = vst [vmem:[#allocation2 + $0x178] sm:$0xff] %v349_v48  ;;  %v5347_v22 = vor.u32 %v6125_v41, %v5346_v32  ;;  %v5314_v48 = vld [vmem:[#allocation2 + $0x120] sm:$0xf] }
  0xf2   :  { %396 = vst [vmem:[#allocation2 + $0x170] sm:$0xff] %v347_v56  ;;  %580 = vrot.lane.b32.xlu1 %v441_v43, %s6307_s13  ;;  %578 = vrot.lane.b32.xlu0 %v6568_v50, %s6307_s13  ;;  %v445_v50 = vld [vmem:[%s9263_s0 + $0x11c] sm:$0xf]  ;;  %v5298_v41 = vld [vmem:[#allocation2 + $0x100] sm:$0xf] }
  0xf3   :  { %582 = vrot.lane.b32.xlu2 %v6573_v51, %s6307_s13 }
  0xf4   :  { %v497_v58 = vpop.permute.xlu1 %496  ;;  %v495_v59 = vpop.permute.xlu0 %494 }
  0xf5   :  { %v591_v61 = vrot.slane %v497_v58, 4  ;;  %v590_v62 = vrot.slane %v495_v59, 4  ;;  %v6806_v27 = vpop.permute.xlu2 %516  ;;  %v5315_v58 = vor.u32 %v6117_v52, %v5314_v48  ;;  %v754_v52 = vld [vmem:[%s9263_s0 + $0x74] sm:$0xf] }
  0xf6   :  { %v601_v49 = vrot.slane %v6806_v27, 4  ;;  %v6115_v27 = vld [vmem:[#allocation2 + $0x114] sm:$0xf0] }
  0xf7   :  { %v638_v63 = vsel %vm300_vm0, %v590_v62, %v591_v61  ;;  %v742_v61 = vld [vmem:[%s9263_s0 + $0x2c] sm:$0xf]  ;;  %v5306_v62 = vld [vmem:[#allocation2 + $0x110] sm:$0xf] }
  0xf8   :  { %v640_v4 = vsel %vm639_vm2, %v495_v59, %v638_v63  ;;  %v6127_v5 = vld [vmem:[#allocation2 + $0x174] sm:$0xf0] }
  0xf9   :  { %711 = vst [vmem:[#allocation2 + $0x180] sm:$0xff] %v640_v4  ;;  %v5354_v51 = vld [vmem:[#allocation2 + $0x170] sm:$0xf]  ;;  %v5307_v4 = vor.u32 %v6115_v27, %v5306_v62  ;;  %v6959_v62 = vld [vmem:[%s9263_s0 + $0x9c] sm:$0xff] }
  0xfa   :  { %586 = vrot.lane.b32.xlu1 %v6583_v55, %s6307_s13  ;;  %584 = vrot.lane.b32.xlu0 %v443_v60, %s6307_s13  ;;  %v5355_v10 = vor.u32 %v6127_v5, %v5354_v51  ;;  %v6113_v5 = vld [vmem:[#allocation2 + $0x104] sm:$0xf0]  ;;  %v6967_v27 = vld [vmem:[%s9263_s0 + $0xcc] sm:$0xff]  ;;  %49 = vst [vmem:[#allocation2 + $0x68] sm:$0xff] %v6959_v62 }
  0xfb   :  { %588 = vrot.lane.b32.xlu2 %v445_v50, %s6307_s13  ;;  %s6308_s13 = smov 112   ;;  %53 = vst [vmem:[#allocation2 + $0x88] sm:$0xff] %v6967_v27 }
  0xfc   :  { %4360 = vmatpush.bf16.msra.mxu2 %v5355_v10  ;;  %v503_v12 = vpop.permute.xlu1 %502  ;;  %v501_v16 = vpop.permute.xlu0 %500 }
  0xfd   :  { %v594_v17 = vrot.slane %v503_v12, 4  ;;  %v593_v31 = vrot.slane %v501_v16, 4  ;;  %v6821_v18 = vpop.permute.xlu2 %522 }
  0xff   :  { %v643_v55 = vsel %vm300_vm0, %v594_v17, %v595_v11  ;;  %v641_v20 = vsel %vm300_vm0, %v592_v53, %v593_v31  ;;  %v744_v53 = vld [vmem:[%s9263_s0 + $0x38] sm:$0xf] }
 0x100   :  { %v644_v3 = vsel %vm639_vm2, %v503_v12, %v643_v55  ;;  %v642_v30 = vsel %vm639_vm2, %v6763_v29, %v641_v20  ;;  %4361 = vmatpush.bf16.msra.mxu2 %v5347_v22  ;;  %v5299_v12 = vor.u32 %v6113_v5, %v5298_v41  ;;  %v604_v22 = vrot.slane %v6821_v18, 4  ;;  %v760_v41 = vld [vmem:[%s9263_s0 + $0x98] sm:$0xf] }
 0x101   :  { %713 = vst [vmem:[#allocation2 + $0x190] sm:$0xff] %v644_v3 }
 0x102   :  { %712 = vst [vmem:[#allocation2 + $0x188] sm:$0xff] %v642_v30  ;;  %833 = vrot.lane.b32.xlu1 %v736_v23, %s6308_s13  ;;  %831 = vrot.lane.b32.xlu0 %v6337_v1, %s6308_s13  ;;  %v738_v1 = vld [vmem:[%s9263_s0 + $0x14] sm:$0xf] }
 0x103   :  { %835 = vrot.lane.b32.xlu2 %v6332_v0, %s6308_s13  ;;  %v740_v0 = vld [vmem:[%s9263_s0 + $0x20] sm:$0xf] }
 0x104   :  { %4362 = vmatpush.bf16.msra.mxu2 %v5339_v34  ;;  %v509_v40 = vpop.permute.xlu1 %508  ;;  %v507_v28 = vpop.permute.xlu0 %506  ;;  %v6899_v34 = vld [vmem:[%s9263_s0 + $0x90] sm:$0xff] }
 0x105   :  { %v597_v29 = vrot.slane %v509_v40, 4  ;;  %v596_v42 = vrot.slane %v507_v28, 4  ;;  %v6836_v44 = vpop.permute.xlu2 %528  ;;  %48 = vst [vmem:[#allocation2 + $0x60] sm:$0xff] %v6899_v34 }
 0x106   :  { %v607_v17 = vrot.slane %v6836_v44, 4  ;;  %v6913_v44 = vld [vmem:[%s9263_s0 + $0xa8] sm:$0xff] }
 0x107   :  { %v645_v35 = vsel %vm300_vm0, %v596_v42, %v597_v29  ;;  %v752_v42 = vld [vmem:[%s9263_s0 + $0x68] sm:$0xf]  ;;  %50 = vst [vmem:[#allocation2 + $0x70] sm:$0xff] %v6913_v44 }
 0x108   :  { %v646_v38 = vsel %vm639_vm2, %v507_v28, %v645_v35  ;;  %4363 = vmatpush.bf16.msra.mxu2 %v5331_v45  ;;  %v6921_v45 = vld [vmem:[%s9263_s0 + $0x78] sm:$0xff] }
 0x109   :  { %714 = vst [vmem:[#allocation2 + $0x198] sm:$0xff] %v646_v38 }
 0x10a   :  { %839 = vrot.lane.b32.xlu1 %v6346_v2, %s6308_s13  ;;  %837 = vrot.lane.b32.xlu0 %v738_v1, %s6308_s13  ;;  %46 = vst [vmem:[#allocation2 + $0x50] sm:$0xff] %v6921_v45 }
 0x10b   :  { %841 = vrot.lane.b32.xlu2 %v740_v0, %s6308_s13 }
 0x10c   :  { %4364 = vmatpush.bf16.msra.mxu2 %v5323_v47  ;;  %v515_v6 = vpop.permute.xlu1 %514  ;;  %v513_v54 = vpop.permute.xlu0 %512 }
 0x10d   :  { %v600_v57 = vrot.slane %v515_v6, 4  ;;  %v599_v43 = vrot.slane %v513_v54, 4  ;;  %v6852_v56 = vpop.permute.xlu2 %534 }
 0x10e   :  { %v610_v38 = vrot.slane %v6852_v56, 4 }
 0x10f   :  { %v649_v2 = vsel %vm300_vm0, %v600_v57, %v601_v49  ;;  %v647_v59 = vsel %vm300_vm0, %v598_v26, %v599_v43  ;;  %v6945_v26 = vld [vmem:[%s9263_s0 + $0xb4] sm:$0xff] }
 0x110   :  { %v650_v63 = vsel %vm639_vm2, %v515_v6, %v649_v2  ;;  %v648_v60 = vsel %vm639_vm2, %v6791_v25, %v647_v59  ;;  %4365 = vmatpush.bf16.msra.mxu2 %v5315_v58  ;;  %51 = vst [vmem:[#allocation2 + $0x78] sm:$0xff] %v6945_v26 }
 0x111   :  { %716 = vst [vmem:[#allocation2 + $0x1a8] sm:$0xff] %v650_v63 }
 0x112   :  { %715 = vst [vmem:[#allocation2 + $0x1a0] sm:$0xff] %v648_v60  ;;  %845 = vrot.lane.b32.xlu1 %v742_v61, %s6308_s13  ;;  %843 = vrot.lane.b32.xlu0 %v6368_v7, %s6308_s13  ;;  %v758_v61 = vld [vmem:[%s9263_s0 + $0x8c] sm:$0xf] }
 0x113   :  { %847 = vrot.lane.b32.xlu2 %v6373_v8, %s6308_s13  ;;  %v746_v8 = vld [vmem:[%s9263_s0 + $0x44] sm:$0xf] }
 0x114   :  { %4366 = vmatpush.bf16.msra.mxu2 %v5307_v4  ;;  %v521_v50 = vpop.permute.xlu1 %520  ;;  %v519_v51 = vpop.permute.xlu0 %518 }
 0x115   :  { %v603_v10 = vrot.slane %v521_v50, 4  ;;  %v602_v11 = vrot.slane %v519_v51, 4  ;;  %v541_v25 = vpop.permute.xlu2 %540 }
 0x116   :  { %v613_v35 = vrot.slane %v541_v25, 4 }
 0x117   :  { %v651_v16 = vsel %vm300_vm0, %v602_v11, %v603_v10 }
 0x118   :  { %v652_v7 = vsel %vm639_vm2, %v519_v51, %v651_v16  ;;  %4367 = vmatpush.bf16.msra.mxu2 %v5299_v12  ;;  %v6991_v16 = vld [vmem:[%s9263_s0 + $0xd8] sm:$0xff] }
 0x119   :  { %717 = vst [vmem:[#allocation2 + $0x1b0] sm:$0xff] %v652_v7 }
 0x11a   :  { %851 = vrot.lane.b32.xlu1 %v6383_v9, %s6308_s13  ;;  %849 = vrot.lane.b32.xlu0 %v744_v53, %s6308_s13  ;;  %v748_v9 = vld [vmem:[%s9263_s0 + $0x50] sm:$0xf]  ;;  %54 = vst [vmem:[#allocation2 + $0x90] sm:$0xff] %v6991_v16 }
 0x11b   :  { %853 = vrot.lane.b32.xlu2 %v746_v8, %s6308_s13 }
 0x11c   :  { %v527_v31 = vpop.permute.xlu1 %526  ;;  %v525_v32 = vpop.permute.xlu0 %524 }
 0x11d   :  { %v606_v55 = vrot.slane %v527_v31, 4  ;;  %v605_v20 = vrot.slane %v525_v32, 4  ;;  %v6881_v23 = vpop.permute.xlu2 %546 }
 0x11e   :  { %v616_v5 = vrot.slane %v6881_v23, 4 }
 0x11f   :  { %v655_v24 = vsel %vm300_vm0, %v606_v55, %v607_v17  ;;  %v653_v3 = vsel %vm300_vm0, %v604_v22, %v605_v20  ;;  %v762_v22 = vld [vmem:[%s9263_s0 + $0xa4] sm:$0xf]  ;;  %v764_v20 = vld [vmem:[%s9263_s0 + $0xb0] sm:$0xf] }
 0x120   :  { %v656_v30 = vsel %vm639_vm2, %v527_v31, %v655_v24  ;;  %v654_v33 = vsel %vm639_vm2, %v6821_v18, %v653_v3  ;;  %v7015_v24 = vld [vmem:[%s9263_s0 + $0xc0] sm:$0xff] }
 0x121   :  { %719 = vst [vmem:[#allocation2 + $0x1c0] sm:$0xff] %v656_v30 }
 0x122   :  { %718 = vst [vmem:[#allocation2 + $0x1b8] sm:$0xff] %v654_v33  ;;  %857 = vrot.lane.b32.xlu1 %v748_v9, %s6308_s13  ;;  %855 = vrot.lane.b32.xlu0 %v6401_v13, %s6308_s13  ;;  %v750_v13 = vld [vmem:[%s9263_s0 + $0x5c] sm:$0xf] }
 0x123   :  { %859 = vrot.lane.b32.xlu2 %v6406_v14, %s6308_s13  ;;  %52 = vst [vmem:[#allocation2 + $0x80] sm:$0xff] %v7015_v24 }
 0x124   :  { %v533_v36 = vpop.permute.xlu1 %532  ;;  %v531_v37 = vpop.permute.xlu0 %530 }
 0x125   :  { %v609_v18 = vrot.slane %v533_v36, 4  ;;  %v608_v40 = vrot.slane %v531_v37, 4  ;;  %v553_v28 = vpop.permute.xlu2 %552 }
 0x126   :  { %v619_v63 = vrot.slane %v553_v28, 4 }
 0x127   :  { %v657_v29 = vsel %vm300_vm0, %v608_v40, %v609_v18 }
 0x128   :  { %v658_v14 = vsel %vm639_vm2, %v531_v37, %v657_v29  ;;  %v766_v29 = vld [vmem:[%s9263_s0 + $0xbc] sm:$0xf] }
 0x129   :  { %720 = vst [vmem:[#allocation2 + $0x1c8] sm:$0xff] %v658_v14 }
 0x12a   :  { %863 = vrot.lane.b32.xlu1 %v6416_v15, %s6308_s13  ;;  %861 = vrot.lane.b32.xlu0 %v750_v13, %s6308_s13 }
 0x12b   :  { %865 = vrot.lane.b32.xlu2 %v752_v42, %s6308_s13 }
 0x12c   :  { %v539_v1 = vpop.permute.xlu1 %538  ;;  %v537_v46 = vpop.permute.xlu0 %536 }
 0x12d   :  { %v612_v0 = vrot.slane %v539_v1, 4  ;;  %v611_v15 = vrot.slane %v537_v46, 4  ;;  %v6927_v39 = vpop.permute.xlu2 %558 }
 0x12e   :  { %v622_v33 = vrot.slane %v6927_v39, 4 }
 0x12f   :  { %v661_v47 = vsel %vm300_vm0, %v612_v0, %v613_v35  ;;  %v659_v49 = vsel %vm300_vm0, %v610_v38, %v611_v15  ;;  %v7039_v38 = vld [vmem:[%s9263_s0 + $0xfc] sm:$0xff] }
 0x130   :  { %v662_v6 = vsel %vm639_vm2, %v539_v1, %v661_v47  ;;  %v660_v54 = vsel %vm639_vm2, %v6852_v56, %v659_v49  ;;  %57 = vst [vmem:[#allocation2 + $0xa8] sm:$0xff] %v7039_v38 }
 0x131   :  { %722 = vst [vmem:[#allocation2 + $0x1d8] sm:$0xff] %v662_v6 }
 0x132   :  { %721 = vst [vmem:[#allocation2 + $0x1d0] sm:$0xff] %v660_v54  ;;  %869 = vrot.lane.b32.xlu1 %v754_v52, %s6308_s13  ;;  %867 = vrot.lane.b32.xlu0 %v6434_v19, %s6308_s13  ;;  %v756_v19 = vld [vmem:[%s9263_s0 + $0x80] sm:$0xf] }
 0x133   :  { %871 = vrot.lane.b32.xlu2 %v6921_v45, %s6308_s13 }
 0x134   :  { %v545_v57 = vpop.permute.xlu1 %544  ;;  %v543_v43 = vpop.permute.xlu0 %542 }
 0x135   :  { %v615_v48 = vrot.slane %v545_v57, 4  ;;  %v614_v56 = vrot.slane %v543_v43, 4  ;;  %v565_v58 = vpop.permute.xlu2 %564 }
 0x136   :  { %v625_v3 = vrot.slane %v565_v58, 4  ;;  %v770_v58 = vld [vmem:[%s9263_s0 + $0xd4] sm:$0xf] }
 0x137   :  { %v663_v2 = vsel %vm300_vm0, %v614_v56, %v615_v48  ;;  %v768_v48 = vld [vmem:[%s9263_s0 + $0xc8] sm:$0xf] }
 0x138   :  { %v664_v59 = vsel %vm639_vm2, %v543_v43, %v663_v2  ;;  %v6139_v57 = vld [vmem:[#allocation2 + $0x1d4] sm:$0xf0] }
 0x139   :  { %723 = vst [vmem:[#allocation2 + $0x1e0] sm:$0xff] %v664_v59  ;;  %v5402_v54 = vld [vmem:[#allocation2 + $0x1d0] sm:$0xf]  ;;  %v6137_v59 = vld [vmem:[#allocation2 + $0x1c4] sm:$0xf0] }
 0x13a   :  { %875 = vrot.lane.b32.xlu1 %v6449_v21, %s6308_s13  ;;  %873 = vrot.lane.b32.xlu0 %v756_v19, %s6308_s13  ;;  %v5403_v2 = vor.u32 %v6139_v57, %v5402_v54  ;;  %v7055_v19 = vld [vmem:[%s9263_s0 + $0x114] sm:$0xff]  ;;  %v7121_v57 = vld [vmem:[%s9263_s0 + $0x84] sm:$0xff] }
 0x13b   :  { %877 = vrot.lane.b32.xlu2 %v758_v61, %s6308_s13  ;;  %v7063_v61 = vld [vmem:[%s9263_s0 + $0xe4] sm:$0xff]  ;;  %59 = vst [vmem:[#allocation2 + $0xb8] sm:$0xff] %v7055_v19  ;;  %v6095_v54 = vld [vmem:[#allocation2 + $0x74] sm:$0xf0] }
 0x13c   :  { %v551_v60 = vpop.permute.xlu1 %550  ;;  %v549_v4 = vpop.permute.xlu0 %548  ;;  %55 = vst [vmem:[#allocation2 + $0x98] sm:$0xff] %v7063_v61 }
 0x13d   :  { %v618_v50 = vrot.slane %v551_v60, 4  ;;  %v617_v21 = vrot.slane %v549_v4, 4  ;;  %v6973_v51 = vpop.permute.xlu2 %570  ;;  %47 = vst [vmem:[#allocation2 + $0x58] sm:$0xff] %v7121_v57 }
 0x13f   :  { %v667_v10 = vsel %vm300_vm0, %v618_v50, %v619_v63  ;;  %v665_v11 = vsel %vm300_vm0, %v616_v5, %v617_v21  ;;  %v5394_v5 = vld [vmem:[#allocation2 + $0x1c0] sm:$0xf]  ;;  %v628_v50 = vrot.slane %v6973_v51, 4 }
 0x140   :  { %v668_v25 = vsel %vm639_vm2, %v551_v60, %v667_v10  ;;  %v666_v12 = vsel %vm639_vm2, %v6881_v23, %v665_v11  ;;  %v7007_v23 = vld [vmem:[%s9263_s0 + $0xf0] sm:$0xff]  ;;  %v5395_v11 = vor.u32 %v6137_v59, %v5394_v5  ;;  %v5218_v5 = vld [vmem:[#allocation2 + $0x60] sm:$0xf] }
 0x141   :  { %725 = vst [vmem:[#allocation2 + $0x1f0] sm:$0xff] %v668_v25  ;;  %v6135_v25 = vld [vmem:[#allocation2 + $0x1b4] sm:$0xf0] }
 0x142   :  { %724 = vst [vmem:[#allocation2 + $0x1e8] sm:$0xff] %v666_v12  ;;  %881 = vrot.lane.b32.xlu1 %v760_v41, %s6308_s13  ;;  %879 = vrot.lane.b32.xlu0 %v6899_v34, %s6308_s13 }
 0x143   :  { %883 = vrot.lane.b32.xlu2 %v6959_v62, %s6308_s13  ;;  %56 = vst [vmem:[#allocation2 + $0xa0] sm:$0xff] %v7007_v23 }
 0x144   :  { %v557_v53 = vpop.permute.xlu1 %556  ;;  %v555_v7 = vpop.permute.xlu0 %554 }
 0x145   :  { %v621_v8 = vrot.slane %v557_v53, 4  ;;  %v620_v17 = vrot.slane %v555_v7, 4  ;;  %v6994_v31 = vpop.permute.xlu2 %576 }
 0x146   :  { %v631_v63 = vrot.slane %v6994_v31, 4  ;;  %v5386_v31 = vld [vmem:[#allocation2 + $0x1b0] sm:$0xf] }
 0x147   :  { %v669_v32 = vsel %vm300_vm0, %v620_v17, %v621_v8 }
 0x148   :  { %v670_v55 = vsel %vm639_vm2, %v555_v7, %v669_v32  ;;  %v5418_v42 = vld [vmem:[#allocation2 + $0x1f0] sm:$0xf]  ;;  %v772_v7 = vld [vmem:[%s9263_s0 + $0xe0] sm:$0xf]  ;;  %v5387_v32 = vor.u32 %v6135_v25, %v5386_v31 }
 0x149   :  { %726 = vst [vmem:[#allocation2 + $0x1f8] sm:$0xff] %v670_v55  ;;  %v6141_v46 = vld [vmem:[#allocation2 + $0x1e4] sm:$0xf0] }
 0x14a   :  { %887 = vrot.lane.b32.xlu1 %v6913_v44, %s6308_s13  ;;  %885 = vrot.lane.b32.xlu0 %v762_v22, %s6308_s13  ;;  %v5378_v22 = vld [vmem:[#allocation2 + $0x1a0] sm:$0xf]  ;;  %v6133_v55 = vld [vmem:[#allocation2 + $0x1a4] sm:$0xf0] }
 0x14b   :  { %889 = vrot.lane.b32.xlu2 %v764_v20, %s6308_s13  ;;  %v7088_v20 = vld [vmem:[%s9263_s0] sm:$0xff] }
 0x14c   :  { %v563_v9 = vpop.permute.xlu1 %562  ;;  %v561_v30 = vpop.permute.xlu0 %560  ;;  %36 = vst [vmem:[#allocation2] sm:$0xff] %v7088_v20 }
 0x14d   :  { %v624_v36 = vrot.slane %v563_v9, 4  ;;  %v623_v37 = vrot.slane %v561_v30, 4  ;;  %v7021_v18 = vpop.permute.xlu2 %582 }
 0x14f   :  { %v673_v40 = vsel %vm300_vm0, %v624_v36, %v625_v3  ;;  %v671_v28 = vsel %vm300_vm0, %v622_v33, %v623_v37  ;;  %v5379_v33 = vor.u32 %v6133_v55, %v5378_v22  ;;  %v6131_v37 = vld [vmem:[#allocation2 + $0x194] sm:$0xf0]  ;;  %v7168_v55 = vld [vmem:[%s9263_s0 + $0x24] sm:$0xff] }
 0x150   :  { %v674_v13 = vsel %vm639_vm2, %v563_v9, %v673_v40  ;;  %v672_v14 = vsel %vm639_vm2, %v6927_v39, %v671_v28  ;;  %v6143_v35 = vld [vmem:[#allocation2 + $0x1f4] sm:$0xf0]  ;;  %v5410_v39 = vld [vmem:[#allocation2 + $0x1e0] sm:$0xf]  ;;  %v774_v28 = vld [vmem:[%s9263_s0 + $0xec] sm:$0xf] }
 0x151   :  { %728 = vst [vmem:[#allocation2 + $0x208] sm:$0xff] %v674_v13  ;;  %v5419_v1 = vor.u32 %v6143_v35, %v5418_v42  ;;  %v5411_v52 = vor.u32 %v6141_v46, %v5410_v39  ;;  %v5370_v13 = vld [vmem:[#allocation2 + $0x190] sm:$0xf]  ;;  %v6129_v35 = vld [vmem:[#allocation2 + $0x184] sm:$0xf0]  ;;  %v7162_v22 = vld [vmem:[%s9263_s0 + $0x54] sm:$0xff] }
 0x152   :  { %727 = vst [vmem:[#allocation2 + $0x200] sm:$0xff] %v672_v14  ;;  %893 = vrot.lane.b32.xlu1 %v766_v29, %s6308_s13  ;;  %891 = vrot.lane.b32.xlu0 %v6945_v26, %s6308_s13  ;;  %v776_v14 = vld [vmem:[%s9263_s0 + $0xf8] sm:$0xf]  ;;  %v5371_v42 = vor.u32 %v6131_v37, %v5370_v13  ;;  %v7112_v46 = vld [vmem:[%s9263_s0 + $0x108] sm:$0xff] }
 0x153   :  { %4384 = vmatpush.bf16.msra.mxu3 %v5419_v1  ;;  %895 = vrot.lane.b32.xlu2 %v7015_v24, %s6308_s13  ;;  %v7104_v1 = vld [vmem:[%s9263_s0 + $0x18] sm:$0xff]  ;;  %58 = vst [vmem:[#allocation2 + $0xb0] sm:$0xff] %v7112_v46  ;;  %v7188_v37 = vld [vmem:[%s9263_s0 + $0x30] sm:$0xff] }
 0x154   :  { %v569_v0 = vpop.permute.xlu1 %568  ;;  %v567_v15 = vpop.permute.xlu0 %566  ;;  %38 = vst [vmem:[#allocation2 + $0x10] sm:$0xff] %v7104_v1 }
 0x155   :  { %v627_v47 = vrot.slane %v569_v0, 4  ;;  %v626_v49 = vrot.slane %v567_v15, 4  ;;  %v7042_v6 = vpop.permute.xlu2 %588  ;;  %43 = vst [vmem:[#allocation2 + $0x38] sm:$0xff] %v7162_v22 }
 0x156   :  { %v637_v0 = vrot.slane %v7042_v6, 4  ;;  %39 = vst [vmem:[#allocation2 + $0x18] sm:$0xff] %v7168_v55 }
 0x157   :  { %v675_v43 = vsel %vm300_vm0, %v626_v49, %v627_v47  ;;  %4385 = vmatpush.bf16.msra.mxu3 %v5411_v52  ;;  %v5226_v52 = vld [vmem:[#allocation2 + $0x70] sm:$0xf]  ;;  %40 = vst [vmem:[#allocation2 + $0x20] sm:$0xff] %v7188_v37 }
 0x158   :  { %v676_v56 = vsel %vm639_vm2, %v567_v15, %v675_v43  ;;  %v5362_v15 = vld [vmem:[#allocation2 + $0x180] sm:$0xf]  ;;  %v634_v43 = vrot.slane %v7021_v18, 4 }
 0x159   :  { %729 = vst [vmem:[#allocation2 + $0x210] sm:$0xff] %v676_v56  ;;  %v5363_v49 = vor.u32 %v6129_v35, %v5362_v15 }
 0x15a   :  { %899 = vrot.lane.b32.xlu1 %v6967_v27, %s6308_s13  ;;  %897 = vrot.lane.b32.xlu0 %v768_v48, %s6308_s13 }
 0x15b   :  { %4386 = vmatpush.bf16.msra.mxu3 %v5403_v2  ;;  %901 = vrot.lane.b32.xlu2 %v770_v58, %s6308_s13  ;;  %v5227_v58 = vor.u32 %v6095_v54, %v5226_v52 }
 0x15c   :  { %v575_v60 = vpop.permute.xlu1 %574  ;;  %v573_v4 = vpop.permute.xlu0 %572 }
 0x15d   :  { %v630_v21 = vrot.slane %v575_v60, 4  ;;  %v629_v10 = vrot.slane %v573_v4, 4  ;;  %v7070_v41 = vpop.permute.xlu2 %835  ;;  %4312 = vmatpush.bf16.msra.mxu0 %v5227_v58 }
 0x15e   :  { %v929_v15 = vrot.slane %v7070_v41, 4 }
 0x15f   :  { %v679_v12 = vsel %vm300_vm0, %v630_v21, %v631_v63  ;;  %v677_v53 = vsel %vm300_vm0, %v628_v50, %v629_v10  ;;  %4387 = vmatpush.bf16.msra.mxu3 %v5395_v11  ;;  %v778_v63 = vld [vmem:[%s9263_s0 + $0x104] sm:$0xf]  ;;  %v6093_v50 = vld [vmem:[#allocation2 + $0x64] sm:$0xf0]  ;;  %v7143_v11 = vld [vmem:[%s9263_s0 + $0x6c] sm:$0xff] }
 0x160   :  { %v680_v8 = vsel %vm639_vm2, %v575_v60, %v679_v12  ;;  %v678_v17 = vsel %vm639_vm2, %v6973_v51, %v677_v53  ;;  %v7138_v21 = vld [vmem:[%s9263_s0 + $0x60] sm:$0xff]  ;;  %v5219_v10 = vor.u32 %v6093_v50, %v5218_v5  ;;  %v5210_v12 = vld [vmem:[#allocation2 + $0x50] sm:$0xf]  ;;  %v6091_v53 = vld [vmem:[#allocation2 + $0x54] sm:$0xf0]  ;;  %45 = vst [vmem:[#allocation2 + $0x48] sm:$0xff] %v7143_v11 }
 0x161   :  { %731 = vst [vmem:[#allocation2 + $0x220] sm:$0xff] %v680_v8  ;;  %v5178_v5 = vld [vmem:[#allocation2 + $0x10] sm:$0xf]  ;;  %v6083_v50 = vld [vmem:[#allocation2 + $0x14] sm:$0xf0] }
 0x162   :  { %730 = vst [vmem:[#allocation2 + $0x218] sm:$0xff] %v678_v17  ;;  %905 = vrot.lane.b32.xlu1 %v772_v7, %s6308_s13  ;;  %903 = vrot.lane.b32.xlu0 %v6991_v16, %s6308_s13  ;;  %v7155_v7 = vld [vmem:[%s9263_s0 + $0x48] sm:$0xff] }
 0x163   :  { %4388 = vmatpush.bf16.msra.mxu3 %v5387_v32  ;;  %907 = vrot.lane.b32.xlu2 %v7063_v61, %s6308_s13  ;;  %44 = vst [vmem:[#allocation2 + $0x40] sm:$0xff] %v7138_v21  ;;  %v5211_v32 = vor.u32 %v6091_v53, %v5210_v12  ;;  %v1075_v12 = vld [vmem:[%s9263_s0 + $0x14] sm:$0xf]  ;;  %v5179_v53 = vor.u32 %v6083_v50, %v5178_v5 }
 0x164   :  { %v581_v51 = vpop.permute.xlu1 %580  ;;  %v579_v3 = vpop.permute.xlu0 %578  ;;  %4313 = vmatpush.bf16.msra.mxu0 %v5219_v10  ;;  %42 = vst [vmem:[#allocation2 + $0x30] sm:$0xff] %v7155_v7 }
 0x165   :  { %v633_v9 = vrot.slane %v581_v51, 4  ;;  %v632_v30 = vrot.slane %v579_v3, 4  ;;  %v7091_v36 = vpop.permute.xlu2 %841 }
 0x167   :  { %v681_v40 = vsel %vm300_vm0, %v632_v30, %v633_v9  ;;  %4389 = vmatpush.bf16.msra.mxu3 %v5379_v33  ;;  %v782_v30 = vld [vmem:[%s9263_s0 + $0x11c] sm:$0xf]  ;;  %v6089_v13 = vld [vmem:[#allocation2 + $0x44] sm:$0xf0] }
 0x168   :  { %v682_v29 = vsel %vm639_vm2, %v579_v3, %v681_v40  ;;  %v780_v3 = vld [vmem:[%s9263_s0 + $0x110] sm:$0xf]  ;;  %4314 = vmatpush.bf16.msra.mxu0 %v5211_v32  ;;  %v7183_v33 = vld [vmem:[%s9263_s0 + $0x3c] sm:$0xff] }
 0x169   :  { %732 = vst [vmem:[#allocation2 + $0x228] sm:$0xff] %v682_v29  ;;  %v7199_v29 = vld [vmem:[%s9263_s0 + $0xc] sm:$0xff]  ;;  %v5170_v32 = vld [vmem:[#allocation2] sm:$0xf] }
 0x16a   :  { %911 = vrot.lane.b32.xlu1 %v7007_v23, %s6308_s13  ;;  %909 = vrot.lane.b32.xlu0 %v774_v28, %s6308_s13  ;;  %v5202_v40 = vld [vmem:[#allocation2 + $0x40] sm:$0xf]  ;;  %v932_v28 = vrot.slane %v7091_v36, 4  ;;  %41 = vst [vmem:[#allocation2 + $0x28] sm:$0xff] %v7183_v33 }
 0x16b   :  { %4390 = vmatpush.bf16.msra.mxu3 %v5371_v42  ;;  %913 = vrot.lane.b32.xlu2 %v776_v14, %s6308_s13  ;;  %v5203_v35 = vor.u32 %v6089_v13, %v5202_v40  ;;  %37 = vst [vmem:[#allocation2 + $0x8] sm:$0xff] %v7199_v29 }
 0x16c   :  { %v587_v39 = vpop.permute.xlu1 %586  ;;  %v585_v47 = vpop.permute.xlu0 %584 }
 0x16d   :  { %v636_v48 = vrot.slane %v587_v39, 4  ;;  %v635_v56 = vrot.slane %v585_v47, 4  ;;  %v7124_v6 = vpop.permute.xlu2 %847  ;;  %4315 = vmatpush.bf16.msra.mxu0 %v5203_v35 }
 0x16f   :  { %v685_v2 = vsel %vm300_vm0, %v636_v48, %v637_v0  ;;  %v683_v59 = vsel %vm300_vm0, %v634_v43, %v635_v56  ;;  %4391 = vmatpush.bf16.msra.mxu3 %v5363_v49  ;;  %v5194_v0 = vld [vmem:[#allocation2 + $0x30] sm:$0xf]  ;;  %v6087_v49 = vld [vmem:[#allocation2 + $0x34] sm:$0xf0]  ;;  %v1073_v43 = vld [vmem:[%s9263_s0 + $0x8] sm:$0xf] }
 0x170   :  { %v686_v60 = vsel %vm639_vm2, %v587_v39, %v685_v2  ;;  %v684_v4 = vsel %vm639_vm2, %v7021_v18, %v683_v59  ;;  %v5195_v48 = vor.u32 %v6087_v49, %v5194_v0  ;;  %v5186_v2 = vld [vmem:[#allocation2 + $0x20] sm:$0xf] }
 0x171   :  { %734 = vst [vmem:[#allocation2 + $0x238] sm:$0xff] %v686_v60  ;;  %v6085_v59 = vld [vmem:[#allocation2 + $0x24] sm:$0xf0] }
 0x172   :  { %733 = vst [vmem:[#allocation2 + $0x230] sm:$0xff] %v684_v4  ;;  %917 = vrot.lane.b32.xlu1 %v778_v63, %s6308_s13  ;;  %915 = vrot.lane.b32.xlu0 %v7039_v38, %s6308_s13  ;;  %v5187_v4 = vor.u32 %v6085_v59, %v5186_v2 }
 0x173   :  { %919 = vrot.lane.b32.xlu2 %v7112_v46, %s6308_s13  ;;  %4316 = vmatpush.bf16.msra.mxu0 %v5195_v48 }
 0x174   :  { %v834_v18 = vpop.permute.xlu1 %833  ;;  %v832_v25 = vpop.permute.xlu0 %831 }
 0x175   :  { %v928_v8 = vrot.slane %v834_v18, 4  ;;  %v927_v17 = vrot.slane %v832_v25, 4  ;;  %v7157_v31 = vpop.permute.xlu2 %853 }
 0x177   :  { %v975_v51 = vsel %vm300_vm0, %v927_v17, %v928_v8  ;;  %4317 = vmatpush.bf16.msra.mxu0 %v5187_v4  ;;  %v1077_v17 = vld [vmem:[%s9263_s0 + $0x20] sm:$0xf] }
 0x178   :  { %v977_v9 = vsel %vm976_vm3, %v832_v25, %v975_v51  ;;  %v6081_v51 = vld [vmem:[#allocation2 + $0x4] sm:$0xf0] }
 0x179   :  { %1048 = vst [vmem:[#allocation2 + $0x240] sm:$0xff] %v977_v9  ;;  %v5171_v9 = vor.u32 %v6081_v51, %v5170_v32 }
 0x17a   :  { %923 = vrot.lane.b32.xlu1 %v7055_v19, %s6308_s13  ;;  %921 = vrot.lane.b32.xlu0 %v780_v3, %s6308_s13  ;;  %v938_v3 = vrot.slane %v7157_v31, 4  ;;  %v1079_v31 = vld [vmem:[%s9263_s0 + $0x2c] sm:$0xf] }
 0x17b   :  { %925 = vrot.lane.b32.xlu2 %v782_v30, %s6308_s13  ;;  %4318 = vmatpush.bf16.msra.mxu0 %v5179_v53 }
 0x17c   :  { %v840_v14 = vpop.permute.xlu1 %839  ;;  %v838_v42 = vpop.permute.xlu0 %837 }
 0x17d   :  { %v931_v39 = vrot.slane %v840_v14, 4  ;;  %v930_v36 = vrot.slane %v838_v42, 4  ;;  %v7204_v47 = vpop.permute.xlu2 %859 }
 0x17f   :  { %v980_v52 = vsel %vm300_vm0, %v931_v39, %v932_v28  ;;  %v978_v54 = vsel %vm300_vm0, %v929_v15, %v930_v36  ;;  %v935_v28 = vrot.slane %v7124_v6, 4  ;;  %4319 = vmatpush.bf16.msra.mxu0 %v5171_v9 }
 0x180   :  { %v981_v56 = vsel %vm976_vm3, %v840_v14, %v980_v52  ;;  %v979_v58 = vsel %vm976_vm3, %v7070_v41, %v978_v54 }
 0x181   :  { %1050 = vst [vmem:[#allocation2 + $0x250] sm:$0xff] %v981_v56 }
 0x182   :  { %1049 = vst [vmem:[#allocation2 + $0x248] sm:$0xff] %v979_v58  ;;  %1170 = vrot.lane.b32.xlu1 %v1073_v43, %s6309_s7  ;;  %1168 = vrot.lane.b32.xlu0 %v7088_v20, %s6309_s7  ;;  %v1083_v58 = vld [vmem:[%s9263_s0 + $0x44] sm:$0xf] }
 0x183   :  { %1172 = vrot.lane.b32.xlu2 %v7199_v29, %s6309_s7 }
 0x184   :  { %v846_v63 = vpop.permute.xlu1 %845  ;;  %v844_v60 = vpop.permute.xlu0 %843 }
 0x185   :  { %v934_v41 = vrot.slane %v846_v63, 4  ;;  %v933_v10 = vrot.slane %v844_v60, 4  ;;  %v866_v18 = vpop.permute.xlu2 %865 }
 0x186   :  { %v944_v2 = vrot.slane %v866_v18, 4 }
 0x187   :  { %v982_v25 = vsel %vm300_vm0, %v933_v10, %v934_v41 }
 0x188   :  { %v983_v8 = vsel %vm976_vm3, %v844_v60, %v982_v25  ;;  %v941_v60 = vrot.slane %v7204_v47, 4  ;;  %v1085_v25 = vld [vmem:[%s9263_s0 + $0x50] sm:$0xf] }
 0x189   :  { %1051 = vst [vmem:[#allocation2 + $0x258] sm:$0xff] %v983_v8 }
 0x18a   :  { %1176 = vrot.lane.b32.xlu1 %v7104_v1, %s6309_s7  ;;  %1174 = vrot.lane.b32.xlu0 %v1075_v12, %s6309_s7 }
 0x18b   :  { %1178 = vrot.lane.b32.xlu2 %v1077_v17, %s6309_s7 }
 0x18c   :  { %v852_v30 = vpop.permute.xlu1 %851  ;;  %v850_v40 = vpop.permute.xlu0 %849 }
 0x18d   :  { %v937_v13 = vrot.slane %v852_v30, 4  ;;  %v936_v14 = vrot.slane %v850_v40, 4  ;;  %v7233_v42 = vpop.permute.xlu2 %871 }
 0x18f   :  { %v986_v35 = vsel %vm300_vm0, %v937_v13, %v938_v3  ;;  %v984_v0 = vsel %vm300_vm0, %v935_v28, %v936_v14 }
 0x190   :  { %v987_v15 = vsel %vm976_vm3, %v852_v30, %v986_v35  ;;  %v985_v39 = vsel %vm976_vm3, %v7124_v6, %v984_v0  ;;  %v1081_v6 = vld [vmem:[%s9263_s0 + $0x38] sm:$0xf]  ;;  %v1089_v30 = vld [vmem:[%s9263_s0 + $0x68] sm:$0xf] }
 0x191   :  { %1053 = vst [vmem:[#allocation2 + $0x268] sm:$0xff] %v987_v15 }
 0x192   :  { %1052 = vst [vmem:[#allocation2 + $0x260] sm:$0xff] %v985_v39  ;;  %1182 = vrot.lane.b32.xlu1 %v1079_v31, %s6309_s7  ;;  %1180 = vrot.lane.b32.xlu0 %v7168_v55, %s6309_s7  ;;  %v947_v39 = vrot.slane %v7233_v42, 4 }
 0x193   :  { %1184 = vrot.lane.b32.xlu2 %v7188_v37, %s6309_s7 }
 0x194   :  { %v858_v36 = vpop.permute.xlu1 %857  ;;  %v856_v49 = vpop.permute.xlu0 %855 }
 0x195   :  { %v940_v52 = vrot.slane %v858_v36, 4  ;;  %v939_v54 = vrot.slane %v856_v49, 4  ;;  %v878_v43 = vpop.permute.xlu2 %877 }
 0x196   :  { %v950_v14 = vrot.slane %v878_v43, 4  ;;  %v1091_v43 = vld [vmem:[%s9263_s0 + $0x74] sm:$0xf] }
 0x197   :  { %v988_v48 = vsel %vm300_vm0, %v939_v54, %v940_v52 }
 0x198   :  { %v989_v56 = vsel %vm976_vm3, %v856_v49, %v988_v48  ;;  %v6157_v0 = vld [vmem:[#allocation2 + $0x264] sm:$0xf0] }
 0x199   :  { %1054 = vst [vmem:[#allocation2 + $0x270] sm:$0xff] %v989_v56  ;;  %v5474_v35 = vld [vmem:[#allocation2 + $0x260] sm:$0xf]  ;;  %v6155_v56 = vld [vmem:[#allocation2 + $0x254] sm:$0xf0] }
 0x19a   :  { %1188 = vrot.lane.b32.xlu1 %v7183_v33, %s6309_s7  ;;  %1186 = vrot.lane.b32.xlu0 %v1081_v6, %s6309_s7  ;;  %v5475_v54 = vor.u32 %v6157_v0, %v5474_v35  ;;  %v5442_v35 = vld [vmem:[#allocation2 + $0x220] sm:$0xf] }
 0x19b   :  { %1190 = vrot.lane.b32.xlu2 %v1083_v58, %s6309_s7 }
 0x19c   :  { %v864_v59 = vpop.permute.xlu1 %863  ;;  %v862_v63 = vpop.permute.xlu0 %861 }
 0x19d   :  { %v943_v4 = vrot.slane %v864_v59, 4  ;;  %v942_v5 = vrot.slane %v862_v63, 4  ;;  %v7261_v50 = vpop.permute.xlu2 %883 }
 0x19f   :  { %v992_v41 = vsel %vm300_vm0, %v943_v4, %v944_v2  ;;  %v990_v10 = vsel %vm300_vm0, %v941_v60, %v942_v5  ;;  %v6153_v60 = vld [vmem:[#allocation2 + $0x244] sm:$0xf0] }
 0x1a0   :  { %v993_v18 = vsel %vm976_vm3, %v864_v59, %v992_v41  ;;  %v991_v12 = vsel %vm976_vm3, %v7204_v47, %v990_v10  ;;  %v1087_v47 = vld [vmem:[%s9263_s0 + $0x5c] sm:$0xf]  ;;  %v5482_v40 = vld [vmem:[#allocation2 + $0x270] sm:$0xf] }
 0x1a1   :  { %1056 = vst [vmem:[#allocation2 + $0x280] sm:$0xff] %v993_v18  ;;  %v5466_v59 = vld [vmem:[#allocation2 + $0x250] sm:$0xf] }
 0x1a2   :  { %1055 = vst [vmem:[#allocation2 + $0x278] sm:$0xff] %v991_v12  ;;  %1194 = vrot.lane.b32.xlu1 %v1085_v25, %s6309_s7  ;;  %1192 = vrot.lane.b32.xlu0 %v7155_v7, %s6309_s7  ;;  %v5467_v63 = vor.u32 %v6155_v56, %v5466_v59 }
 0x1a3   :  { %1196 = vrot.lane.b32.xlu2 %v7162_v22, %s6309_s7 }
 0x1a4   :  { %v870_v53 = vpop.permute.xlu1 %869  ;;  %v868_v8 = vpop.permute.xlu0 %867 }
 0x1a5   :  { %v946_v17 = vrot.slane %v870_v53, 4  ;;  %v945_v32 = vrot.slane %v868_v8, 4  ;;  %v7276_v51 = vpop.permute.xlu2 %889  ;;  %v1093_v53 = vld [vmem:[%s9263_s0 + $0x80] sm:$0xf] }
 0x1a7   :  { %v994_v3 = vsel %vm300_vm0, %v945_v32, %v946_v17  ;;  %v6151_v17 = vld [vmem:[#allocation2 + $0x234] sm:$0xf0] }
 0x1a8   :  { %v995_v9 = vsel %vm976_vm3, %v868_v8, %v994_v3  ;;  %v5450_v8 = vld [vmem:[#allocation2 + $0x230] sm:$0xf] }
 0x1a9   :  { %1057 = vst [vmem:[#allocation2 + $0x288] sm:$0xff] %v995_v9  ;;  %v6159_v28 = vld [vmem:[#allocation2 + $0x274] sm:$0xf0]  ;;  %v5451_v3 = vor.u32 %v6151_v17, %v5450_v8  ;;  %v6149_v9 = vld [vmem:[#allocation2 + $0x224] sm:$0xf0] }
 0x1aa   :  { %1200 = vrot.lane.b32.xlu1 %v7138_v21, %s6309_s7  ;;  %1198 = vrot.lane.b32.xlu0 %v1087_v47, %s6309_s7  ;;  %v5483_v13 = vor.u32 %v6159_v28, %v5482_v40  ;;  %v956_v47 = vrot.slane %v7276_v51, 4  ;;  %v953_v28 = vrot.slane %v7261_v50, 4  ;;  %v1097_v51 = vld [vmem:[%s9263_s0 + $0x98] sm:$0xf] }
 0x1ab   :  { %1202 = vrot.lane.b32.xlu2 %v1089_v30, %s6309_s7 }
 0x1ac   :  { %4408 = vmatpush.bf16.msrb.mxu0 %v5483_v13  ;;  %v876_v31 = vpop.permute.xlu1 %875  ;;  %v874_v15 = vpop.permute.xlu0 %873 }
 0x1ad   :  { %v949_v36 = vrot.slane %v876_v31, 4  ;;  %v948_v49 = vrot.slane %v874_v15, 4  ;;  %v7291_v52 = vpop.permute.xlu2 %895 }
 0x1af   :  { %v998_v48 = vsel %vm300_vm0, %v949_v36, %v950_v14  ;;  %v996_v6 = vsel %vm300_vm0, %v947_v39, %v948_v49  ;;  %v6147_v39 = vld [vmem:[#allocation2 + $0x214] sm:$0xf0] }
 0x1b0   :  { %v999_v58 = vsel %vm976_vm3, %v876_v31, %v998_v48  ;;  %v997_v2 = vsel %vm976_vm3, %v7233_v42, %v996_v6  ;;  %4409 = vmatpush.bf16.msrb.mxu0 %v5475_v54  ;;  %v5458_v42 = vld [vmem:[#allocation2 + $0x240] sm:$0xf]  ;;  %v5443_v31 = vor.u32 %v6149_v9, %v5442_v35  ;;  %v5434_v54 = vld [vmem:[#allocation2 + $0x210] sm:$0xf]  ;;  %v6099_v35 = vld [vmem:[#allocation2 + $0x94] sm:$0xf0] }
 0x1b1   :  { %1059 = vst [vmem:[#allocation2 + $0x298] sm:$0xff] %v999_v58  ;;  %v5459_v18 = vor.u32 %v6153_v60, %v5458_v42  ;;  %v5435_v48 = vor.u32 %v6147_v39, %v5434_v54  ;;  %v5426_v6 = vld [vmem:[#allocation2 + $0x200] sm:$0xf]  ;;  %v5258_v42 = vld [vmem:[#allocation2 + $0xb0] sm:$0xf] }
 0x1b2   :  { %1058 = vst [vmem:[#allocation2 + $0x290] sm:$0xff] %v997_v2  ;;  %1206 = vrot.lane.b32.xlu1 %v1091_v43, %s6309_s7  ;;  %1204 = vrot.lane.b32.xlu0 %v7143_v11, %s6309_s7  ;;  %v6145_v43 = vld [vmem:[#allocation2 + $0x204] sm:$0xf0]  ;;  %v5250_v9 = vld [vmem:[#allocation2 + $0xa0] sm:$0xf] }
 0x1b3   :  { %1208 = vrot.lane.b32.xlu2 %v6921_v45, %s6309_s7  ;;  %v1095_v45 = vld [vmem:[%s9263_s0 + $0x8c] sm:$0xf]  ;;  %v1105_v39 = vld [vmem:[%s9263_s0 + $0xc8] sm:$0xf] }
 0x1b4   :  { %4410 = vmatpush.bf16.msrb.mxu0 %v5467_v63  ;;  %v882_v4 = vpop.permute.xlu1 %881  ;;  %v880_v5 = vpop.permute.xlu0 %879  ;;  %v5427_v63 = vor.u32 %v6145_v43, %v5426_v6 }
 0x1b5   :  { %v952_v41 = vrot.slane %v882_v4, 4  ;;  %v951_v10 = vrot.slane %v880_v5, 4  ;;  %v7306_v25 = vpop.permute.xlu2 %901 }
 0x1b7   :  { %v1000_v12 = vsel %vm300_vm0, %v951_v10, %v952_v41 }
 0x1b8   :  { %v1001_v32 = vsel %vm976_vm3, %v880_v5, %v1000_v12  ;;  %4411 = vmatpush.bf16.msrb.mxu0 %v5459_v18  ;;  %v962_v5 = vrot.slane %v7306_v25, 4  ;;  %v6103_v18 = vld [vmem:[#allocation2 + $0xb4] sm:$0xf0]  ;;  %v959_v12 = vrot.slane %v7291_v52, 4  ;;  %v1103_v25 = vld [vmem:[%s9263_s0 + $0xbc] sm:$0xf] }
 0x1b9   :  { %1060 = vst [vmem:[#allocation2 + $0x2a0] sm:$0xff] %v1001_v32  ;;  %v5259_v32 = vor.u32 %v6103_v18, %v5258_v42 }
 0x1ba   :  { %1212 = vrot.lane.b32.xlu1 %v7121_v57, %s6309_s7  ;;  %1210 = vrot.lane.b32.xlu0 %v1093_v53, %s6309_s7 }
 0x1bb   :  { %1214 = vrot.lane.b32.xlu2 %v1095_v45, %s6309_s7  ;;  %4340 = vmatpush.bf16.msra.mxu1 %v5259_v32 }
 0x1bc   :  { %4412 = vmatpush.bf16.msrb.mxu0 %v5451_v3  ;;  %v888_v30 = vpop.permute.xlu1 %887  ;;  %v886_v40 = vpop.permute.xlu0 %885 }
 0x1bd   :  { %v955_v13 = vrot.slane %v888_v30, 4  ;;  %v954_v14 = vrot.slane %v886_v40, 4  ;;  %v7322_v0 = vpop.permute.xlu2 %907 }
 0x1bf   :  { %v1004_v57 = vsel %vm300_vm0, %v955_v13, %v956_v47  ;;  %v1002_v15 = vsel %vm300_vm0, %v953_v28, %v954_v14  ;;  %v5242_v14 = vld [vmem:[#allocation2 + $0x90] sm:$0xf] }
 0x1c0   :  { %v1005_v36 = vsel %vm976_vm3, %v888_v30, %v1004_v57  ;;  %v1003_v49 = vsel %vm976_vm3, %v7261_v50, %v1002_v15  ;;  %4413 = vmatpush.bf16.msrb.mxu0 %v5443_v31  ;;  %v6101_v30 = vld [vmem:[#allocation2 + $0xa4] sm:$0xf0]  ;;  %v5243_v15 = vor.u32 %v6099_v35, %v5242_v14 }
 0x1c1   :  { %1062 = vst [vmem:[#allocation2 + $0x2b0] sm:$0xff] %v1005_v36  ;;  %v5251_v40 = vor.u32 %v6101_v30, %v5250_v9  ;;  %v5234_v36 = vld [vmem:[#allocation2 + $0x80] sm:$0xf] }
 0x1c2   :  { %1061 = vst [vmem:[#allocation2 + $0x2a8] sm:$0xff] %v1003_v49  ;;  %1218 = vrot.lane.b32.xlu1 %v1097_v51, %s6309_s7  ;;  %1216 = vrot.lane.b32.xlu0 %v6899_v34, %s6309_s7  ;;  %v1099_v34 = vld [vmem:[%s9263_s0 + $0xa4] sm:$0xf]  ;;  %v6097_v49 = vld [vmem:[#allocation2 + $0x84] sm:$0xf0] }
 0x1c3   :  { %1220 = vrot.lane.b32.xlu2 %v6959_v62, %s6309_s7  ;;  %v1101_v62 = vld [vmem:[%s9263_s0 + $0xb0] sm:$0xf]  ;;  %4341 = vmatpush.bf16.msra.mxu1 %v5251_v40  ;;  %v5235_v54 = vor.u32 %v6097_v49, %v5234_v36 }
 0x1c4   :  { %4414 = vmatpush.bf16.msrb.mxu0 %v5435_v48  ;;  %v894_v56 = vpop.permute.xlu1 %893  ;;  %v892_v58 = vpop.permute.xlu0 %891 }
 0x1c5   :  { %v958_v2 = vrot.slane %v894_v56, 4  ;;  %v957_v50 = vrot.slane %v892_v58, 4  ;;  %v7337_v59 = vpop.permute.xlu2 %913  ;;  %v965_v56 = vrot.slane %v7322_v0, 4 }
 0x1c6   :  { %v968_v48 = vrot.slane %v7337_v59, 4 }
 0x1c7   :  { %v1006_v60 = vsel %vm300_vm0, %v957_v50, %v958_v2  ;;  %4342 = vmatpush.bf16.msra.mxu1 %v5243_v15 }
 0x1c8   :  { %v1007_v4 = vsel %vm976_vm3, %v892_v58, %v1006_v60  ;;  %4415 = vmatpush.bf16.msrb.mxu0 %v5427_v63 }
 0x1c9   :  { %1063 = vst [vmem:[#allocation2 + $0x2b8] sm:$0xff] %v1007_v4 }
 0x1ca   :  { %1224 = vrot.lane.b32.xlu1 %v6913_v44, %s6309_s7  ;;  %1222 = vrot.lane.b32.xlu0 %v1099_v34, %s6309_s7 }
 0x1cb   :  { %1226 = vrot.lane.b32.xlu2 %v1101_v62, %s6309_s7  ;;  %4343 = vmatpush.bf16.msra.mxu1 %v5235_v54 }
 0x1cc   :  { %v900_v41 = vpop.permute.xlu1 %899  ;;  %v898_v10 = vpop.permute.xlu0 %897 }
 0x1cd   :  { %v961_v53 = vrot.slane %v900_v41, 4  ;;  %v960_v8 = vrot.slane %v898_v10, 4  ;;  %v7353_v17 = vpop.permute.xlu2 %919 }
 0x1cf   :  { %v1010_v45 = vsel %vm300_vm0, %v961_v53, %v962_v5  ;;  %v1008_v44 = vsel %vm300_vm0, %v959_v12, %v960_v8  ;;  %v971_v8 = vrot.slane %v7353_v17, 4 }
 0x1d0   :  { %v1011_v3 = vsel %vm976_vm3, %v900_v41, %v1010_v45  ;;  %v1009_v47 = vsel %vm976_vm3, %v7291_v52, %v1008_v44 }
 0x1d1   :  { %1065 = vst [vmem:[#allocation2 + $0x2c8] sm:$0xff] %v1011_v3 }
 0x1d2   :  { %1064 = vst [vmem:[#allocation2 + $0x2c0] sm:$0xff] %v1009_v47  ;;  %1230 = vrot.lane.b32.xlu1 %v1103_v25, %s6309_s7  ;;  %1228 = vrot.lane.b32.xlu0 %v6945_v26, %s6309_s7 }
 0x1d3   :  { %1232 = vrot.lane.b32.xlu2 %v7015_v24, %s6309_s7  ;;  %v1107_v24 = vld [vmem:[%s9263_s0 + $0xd4] sm:$0xf] }
 0x1d4   :  { %v906_v28 = vpop.permute.xlu1 %905  ;;  %v904_v13 = vpop.permute.xlu0 %903 }
 0x1d5   :  { %v964_v31 = vrot.slane %v906_v28, 4  ;;  %v963_v52 = vrot.slane %v904_v13, 4  ;;  %v926_v57 = vpop.permute.xlu2 %925 }
 0x1d7   :  { %v1012_v51 = vsel %vm300_vm0, %v963_v52, %v964_v31 }
 0x1d8   :  { %v1013_v26 = vsel %vm976_vm3, %v904_v13, %v1012_v51 }
 0x1d9   :  { %1066 = vst [vmem:[#allocation2 + $0x2d0] sm:$0xff] %v1013_v26 }
 0x1da   :  { %1236 = vrot.lane.b32.xlu1 %v6967_v27, %s6309_s7  ;;  %1234 = vrot.lane.b32.xlu0 %v1105_v39, %s6309_s7  ;;  %v1109_v27 = vld [vmem:[%s9263_s0 + $0xe0] sm:$0xf] }
 0x1db   :  { %1238 = vrot.lane.b32.xlu2 %v1107_v24, %s6309_s7 }
 0x1dc   :  { %v912_v6 = vpop.permute.xlu1 %911  ;;  %v910_v43 = vpop.permute.xlu0 %909 }
 0x1dd   :  { %v967_v58 = vrot.slane %v912_v6, 4  ;;  %v966_v2 = vrot.slane %v910_v43, 4  ;;  %v7382_v50 = vpop.permute.xlu2 %1172 }
 0x1de   :  { %v1266_v24 = vrot.slane %v7382_v50, 4 }
 0x1df   :  { %v1016_v63 = vsel %vm300_vm0, %v967_v58, %v968_v48  ;;  %v1014_v60 = vsel %vm300_vm0, %v965_v56, %v966_v2  ;;  %v1410_v56 = vld [vmem:[%s9263_s0 + $0x8] sm:$0xf] }
 0x1e0   :  { %v1017_v59 = vsel %vm976_vm3, %v912_v6, %v1016_v63  ;;  %v1015_v34 = vsel %vm976_vm3, %v7322_v0, %v1014_v60  ;;  %v1111_v0 = vld [vmem:[%s9263_s0 + $0xec] sm:$0xf]  ;;  %v5530_v60 = vld [vmem:[#allocation2 + $0x2d0] sm:$0xf] }
 0x1e1   :  { %1068 = vst [vmem:[#allocation2 + $0x2e0] sm:$0xff] %v1017_v59  ;;  %v5522_v59 = vld [vmem:[#allocation2 + $0x2c0] sm:$0xf] }
 0x1e2   :  { %1067 = vst [vmem:[#allocation2 + $0x2d8] sm:$0xff] %v1015_v34  ;;  %1242 = vrot.lane.b32.xlu1 %v1109_v27, %s6309_s7  ;;  %1240 = vrot.lane.b32.xlu0 %v6991_v16, %s6309_s7  ;;  %v1113_v16 = vld [vmem:[%s9263_s0 + $0xf8] sm:$0xf]  ;;  %v6169_v34 = vld [vmem:[#allocation2 + $0x2c4] sm:$0xf0] }
 0x1e3   :  { %1244 = vrot.lane.b32.xlu2 %v7063_v61, %s6309_s7  ;;  %v974_v61 = vrot.slane %v926_v57, 4 }
 0x1e4   :  { %v918_v4 = vpop.permute.xlu1 %917  ;;  %v916_v62 = vpop.permute.xlu0 %915 }
 0x1e5   :  { %v970_v5 = vrot.slane %v918_v4, 4  ;;  %v969_v41 = vrot.slane %v916_v62, 4  ;;  %v1179_v10 = vpop.permute.xlu2 %1178 }
 0x1e6   :  { %v1269_v15 = vrot.slane %v1179_v10, 4  ;;  %v5523_v10 = vor.u32 %v6169_v34, %v5522_v59 }
 0x1e7   :  { %v1018_v42 = vsel %vm300_vm0, %v969_v41, %v970_v5 }
 0x1e8   :  { %v1019_v18 = vsel %vm976_vm3, %v916_v62, %v1018_v42  ;;  %v5538_v54 = vld [vmem:[#allocation2 + $0x2e0] sm:$0xf] }
 0x1e9   :  { %1069 = vst [vmem:[#allocation2 + $0x2e8] sm:$0xff] %v1019_v18  ;;  %v6171_v58 = vld [vmem:[#allocation2 + $0x2d4] sm:$0xf0] }
 0x1ea   :  { %1248 = vrot.lane.b32.xlu1 %v7007_v23, %s6309_s7  ;;  %1246 = vrot.lane.b32.xlu0 %v1111_v0, %s6309_s7  ;;  %v1115_v23 = vld [vmem:[%s9263_s0 + $0x104] sm:$0xf]  ;;  %v5531_v27 = vor.u32 %v6171_v58, %v5530_v60  ;;  %v6167_v0 = vld [vmem:[#allocation2 + $0x2b4] sm:$0xf0] }
 0x1eb   :  { %1250 = vrot.lane.b32.xlu2 %v1113_v16, %s6309_s7  ;;  %v5514_v16 = vld [vmem:[#allocation2 + $0x2b0] sm:$0xf] }
 0x1ec   :  { %v924_v12 = vpop.permute.xlu1 %923  ;;  %v922_v53 = vpop.permute.xlu0 %921 }
 0x1ed   :  { %v973_v32 = vrot.slane %v924_v12, 4  ;;  %v972_v45 = vrot.slane %v922_v53, 4  ;;  %v7410_v44 = vpop.permute.xlu2 %1184  ;;  %v6165_v53 = vld [vmem:[#allocation2 + $0x2a4] sm:$0xf0] }
 0x1ef   :  { %v1022_v25 = vsel %vm300_vm0, %v973_v32, %v974_v61  ;;  %v1020_v3 = vsel %vm300_vm0, %v971_v8, %v972_v45  ;;  %v5515_v61 = vor.u32 %v6167_v0, %v5514_v16  ;;  %v1272_v45 = vrot.slane %v7410_v44, 4 }
 0x1f0   :  { %v1023_v47 = vsel %vm976_vm3, %v924_v12, %v1022_v25  ;;  %v1021_v9 = vsel %vm976_vm3, %v7353_v17, %v1020_v3  ;;  %v1117_v17 = vld [vmem:[%s9263_s0 + $0x110] sm:$0xf]  ;;  %v6173_v51 = vld [vmem:[#allocation2 + $0x2e4] sm:$0xf0] }
 0x1f1   :  { %1071 = vst [vmem:[#allocation2 + $0x2f8] sm:$0xff] %v1023_v47  ;;  %v5539_v6 = vor.u32 %v6173_v51, %v5538_v54 }
 0x1f2   :  { %1070 = vst [vmem:[#allocation2 + $0x2f0] sm:$0xff] %v1021_v9  ;;  %1254 = vrot.lane.b32.xlu1 %v1115_v23, %s6309_s7  ;;  %1252 = vrot.lane.b32.xlu0 %v7039_v38, %s6309_s7  ;;  %v1119_v38 = vld [vmem:[%s9263_s0 + $0x11c] sm:$0xf]  ;;  %v5506_v23 = vld [vmem:[#allocation2 + $0x2a0] sm:$0xf] }
 0x1f3   :  { %1256 = vrot.lane.b32.xlu2 %v7112_v46, %s6309_s7  ;;  %v5507_v9 = vor.u32 %v6165_v53, %v5506_v23  ;;  %v1430_v23 = vld [vmem:[%s9263_s0 + $0x80] sm:$0xf] }
 0x1f4   :  { %v1171_v30 = vpop.permute.xlu1 %1170  ;;  %v1169_v40 = vpop.permute.xlu0 %1168 }
 0x1f5   :  { %v1265_v28 = vrot.slane %v1171_v30, 4  ;;  %v1264_v13 = vrot.slane %v1169_v40, 4  ;;  %v7425_v14 = vpop.permute.xlu2 %1190 }
 0x1f6   :  { %v1275_v12 = vrot.slane %v7425_v14, 4 }
 0x1f7   :  { %v1312_v35 = vsel %vm300_vm0, %v1264_v13, %v1265_v28  ;;  %v5498_v28 = vld [vmem:[#allocation2 + $0x290] sm:$0xf]  ;;  %v6163_v13 = vld [vmem:[#allocation2 + $0x294] sm:$0xf0] }
 0x1f8   :  { %v1314_v31 = vsel %vm1313_vm4, %v1169_v40, %v1312_v35  ;;  %v6175_v52 = vld [vmem:[#allocation2 + $0x2f4] sm:$0xf0]  ;;  %v1416_v40 = vld [vmem:[%s9263_s0 + $0x2c] sm:$0xf] }
 0x1f9   :  { %1385 = vst [vmem:[#allocation2 + $0x300] sm:$0xff] %v1314_v31  ;;  %v5546_v46 = vld [vmem:[#allocation2 + $0x2f0] sm:$0xf]  ;;  %v6161_v31 = vld [vmem:[#allocation2 + $0x284] sm:$0xf0] }
 0x1fa   :  { %1260 = vrot.lane.b32.xlu1 %v7055_v19, %s6309_s7  ;;  %1258 = vrot.lane.b32.xlu0 %v1117_v17, %s6309_s7  ;;  %v5547_v57 = vor.u32 %v6175_v52, %v5546_v46  ;;  %v5499_v17 = vor.u32 %v6163_v13, %v5498_v28 }
 0x1fb   :  { %1262 = vrot.lane.b32.xlu2 %v1119_v38, %s6309_s7  ;;  %s6310_s7 = smov 110  }
 0x1fc   :  { %4432 = vmatpush.bf16.msrb.mxu1 %v5547_v57  ;;  %v1177_v39 = vpop.permute.xlu1 %1176  ;;  %v1175_v26 = vpop.permute.xlu0 %1174 }
 0x1fd   :  { %v1268_v36 = vrot.slane %v1177_v39, 4  ;;  %v1267_v49 = vrot.slane %v1175_v26, 4  ;;  %v7440_v48 = vpop.permute.xlu2 %1196  ;;  %v1418_v26 = vld [vmem:[%s9263_s0 + $0x38] sm:$0xf] }
 0x1fe   :  { %v1278_v54 = vrot.slane %v7440_v48, 4 }
 0x1ff   :  { %v1317_v19 = vsel %vm300_vm0, %v1268_v36, %v1269_v15  ;;  %v1315_v43 = vsel %vm300_vm0, %v1266_v24, %v1267_v49  ;;  %v5490_v15 = vld [vmem:[#allocation2 + $0x280] sm:$0xf] }
 0x200   :  { %v1318_v2 = vsel %vm1313_vm4, %v1177_v39, %v1317_v19  ;;  %v1316_v63 = vsel %vm1313_vm4, %v7382_v50, %v1315_v43  ;;  %4433 = vmatpush.bf16.msrb.mxu1 %v5539_v6  ;;  %v5491_v51 = vor.u32 %v6161_v31, %v5490_v15  ;;  %v7578_v15 = vld [vmem:[%s9263_s0 + $0x9c] sm:$0xff] }
 0x201   :  { %1387 = vst [vmem:[#allocation2 + $0x310] sm:$0xff] %v1318_v2 }
 0x202   :  { %1386 = vst [vmem:[#allocation2 + $0x308] sm:$0xff] %v1316_v63  ;;  %1507 = vrot.lane.b32.xlu1 %v1410_v56, %s6310_s7  ;;  %1505 = vrot.lane.b32.xlu0 %v7088_v20, %s6310_s7  ;;  %v1412_v20 = vld [vmem:[%s9263_s0 + $0x14] sm:$0xf] }
 0x203   :  { %1509 = vrot.lane.b32.xlu2 %v7199_v29, %s6310_s7  ;;  %v1414_v29 = vld [vmem:[%s9263_s0 + $0x20] sm:$0xf] }
 0x204   :  { %4434 = vmatpush.bf16.msrb.mxu1 %v5531_v27  ;;  %v1183_v4 = vpop.permute.xlu1 %1182  ;;  %v1181_v62 = vpop.permute.xlu0 %1180 }
 0x205   :  { %v1271_v50 = vrot.slane %v1183_v4, 4  ;;  %v1270_v5 = vrot.slane %v1181_v62, 4  ;;  %v7455_v41 = vpop.permute.xlu2 %1202 }
 0x206   :  { %v1281_v24 = vrot.slane %v7455_v41, 4 }
 0x207   :  { %v1319_v42 = vsel %vm300_vm0, %v1270_v5, %v1271_v50 }
 0x208   :  { %v1320_v18 = vsel %vm1313_vm4, %v1181_v62, %v1319_v42  ;;  %4435 = vmatpush.bf16.msrb.mxu1 %v5523_v10 }
 0x209   :  { %1388 = vst [vmem:[#allocation2 + $0x318] sm:$0xff] %v1320_v18 }
 0x20a   :  { %1513 = vrot.lane.b32.xlu1 %v7104_v1, %s6310_s7  ;;  %1511 = vrot.lane.b32.xlu0 %v1412_v20, %s6310_s7 }
 0x20b   :  { %1515 = vrot.lane.b32.xlu2 %v1414_v29, %s6310_s7 }
 0x20c   :  { %4436 = vmatpush.bf16.msrb.mxu1 %v5515_v61  ;;  %v1189_v8 = vpop.permute.xlu1 %1188  ;;  %v1187_v32 = vpop.permute.xlu0 %1186 }
 0x20d   :  { %v1274_v25 = vrot.slane %v1189_v8, 4  ;;  %v1273_v3 = vrot.slane %v1187_v32, 4  ;;  %v7471_v47 = vpop.permute.xlu2 %1208 }
 0x20e   :  { %v1284_v10 = vrot.slane %v7471_v47, 4 }
 0x20f   :  { %v1323_v1 = vsel %vm300_vm0, %v1274_v25, %v1275_v12  ;;  %v1321_v30 = vsel %vm300_vm0, %v1272_v45, %v1273_v3  ;;  %v7541_v12 = vld [vmem:[%s9263_s0 + $0x78] sm:$0xff] }
 0x210   :  { %v1324_v14 = vsel %vm1313_vm4, %v1189_v8, %v1323_v1  ;;  %v1322_v35 = vsel %vm1313_vm4, %v7410_v44, %v1321_v30  ;;  %4437 = vmatpush.bf16.msrb.mxu1 %v5507_v9  ;;  %v6304_v9 = vld [vmem:[#allocation2 + $0x58] sm:$0xff] }
 0x211   :  { %1390 = vst [vmem:[#allocation2 + $0x328] sm:$0xff] %v1324_v14 }
 0x212   :  { %1389 = vst [vmem:[#allocation2 + $0x320] sm:$0xff] %v1322_v35  ;;  %1519 = vrot.lane.b32.xlu1 %v1416_v40, %s6310_s7  ;;  %1517 = vrot.lane.b32.xlu0 %v7168_v55, %s6310_s7 }
 0x213   :  { %1521 = vrot.lane.b32.xlu2 %v7188_v37, %s6310_s7  ;;  %v1420_v37 = vld [vmem:[%s9263_s0 + $0x44] sm:$0xf] }
 0x214   :  { %4438 = vmatpush.bf16.msrb.mxu1 %v5499_v17  ;;  %v1195_v52 = vpop.permute.xlu1 %1194  ;;  %v1193_v38 = vpop.permute.xlu0 %1192 }
 0x215   :  { %v1277_v46 = vrot.slane %v1195_v52, 4  ;;  %v1276_v57 = vrot.slane %v1193_v38, 4  ;;  %v1215_v44 = vpop.permute.xlu2 %1214  ;;  %v1434_v52 = vld [vmem:[%s9263_s0 + $0x98] sm:$0xf] }
 0x217   :  { %v1325_v39 = vsel %vm300_vm0, %v1276_v57, %v1277_v46 }
 0x218   :  { %v1326_v55 = vsel %vm1313_vm4, %v1193_v38, %v1325_v39  ;;  %4439 = vmatpush.bf16.msrb.mxu1 %v5491_v51  ;;  %v7570_v38 = vld [vmem:[%s9263_s0 + $0x90] sm:$0xff] }
 0x219   :  { %1391 = vst [vmem:[#allocation2 + $0x330] sm:$0xff] %v1326_v55 }
 0x21a   :  { %1525 = vrot.lane.b32.xlu1 %v7183_v33, %s6310_s7  ;;  %1523 = vrot.lane.b32.xlu0 %v1418_v26, %s6310_s7  ;;  %v1422_v33 = vld [vmem:[%s9263_s0 + $0x50] sm:$0xf] }
 0x21b   :  { %1527 = vrot.lane.b32.xlu2 %v1420_v37, %s6310_s7 }
 0x21c   :  { %v1201_v36 = vpop.permute.xlu1 %1200  ;;  %v1199_v49 = vpop.permute.xlu0 %1198 }
 0x21d   :  { %v1280_v6 = vrot.slane %v1201_v36, 4  ;;  %v1279_v19 = vrot.slane %v1199_v49, 4  ;;  %v7500_v43 = vpop.permute.xlu2 %1220 }
 0x21e   :  { %v1290_v28 = vrot.slane %v7500_v43, 4 }
 0x21f   :  { %v1329_v56 = vsel %vm300_vm0, %v1280_v6, %v1281_v24  ;;  %v1327_v58 = vsel %vm300_vm0, %v1278_v54, %v1279_v19  ;;  %v7591_v24 = vld [vmem:[%s9263_s0 + $0xa8] sm:$0xff]  ;;  %v1438_v54 = vld [vmem:[%s9263_s0 + $0xb0] sm:$0xf] }
 0x220   :  { %v1330_v2 = vsel %vm1313_vm4, %v1201_v36, %v1329_v56  ;;  %v1328_v63 = vsel %vm1313_vm4, %v7440_v48, %v1327_v58  ;;  %v1424_v48 = vld [vmem:[%s9263_s0 + $0x5c] sm:$0xf]  ;;  %v1436_v36 = vld [vmem:[%s9263_s0 + $0xa4] sm:$0xf] }
 0x221   :  { %1393 = vst [vmem:[#allocation2 + $0x340] sm:$0xff] %v1330_v2 }
 0x222   :  { %1392 = vst [vmem:[#allocation2 + $0x338] sm:$0xff] %v1328_v63  ;;  %1531 = vrot.lane.b32.xlu1 %v1422_v33, %s6310_s7  ;;  %1529 = vrot.lane.b32.xlu0 %v7155_v7, %s6310_s7  ;;  %v1426_v7 = vld [vmem:[%s9263_s0 + $0x68] sm:$0xf] }
 0x223   :  { %1533 = vrot.lane.b32.xlu2 %v7162_v22, %s6310_s7  ;;  %v1287_v22 = vrot.slane %v1215_v44, 4 }
 0x224   :  { %v1207_v60 = vpop.permute.xlu1 %1206  ;;  %v1205_v27 = vpop.permute.xlu0 %1204 }
 0x225   :  { %v1283_v59 = vrot.slane %v1207_v60, 4  ;;  %v1282_v34 = vrot.slane %v1205_v27, 4  ;;  %v1227_v4 = vpop.permute.xlu2 %1226 }
 0x226   :  { %v1293_v1 = vrot.slane %v1227_v4, 4 }
 0x227   :  { %v1331_v62 = vsel %vm300_vm0, %v1282_v34, %v1283_v59  ;;  %v7615_v59 = vld [vmem:[%s9263_s0 + $0xb4] sm:$0xff] }
 0x228   :  { %v1332_v50 = vsel %vm1313_vm4, %v1205_v27, %v1331_v62  ;;  %v1440_v27 = vld [vmem:[%s9263_s0 + $0xbc] sm:$0xf] }
 0x229   :  { %1394 = vst [vmem:[#allocation2 + $0x348] sm:$0xff] %v1332_v50  ;;  %v7623_v50 = vld [vmem:[%s9263_s0 + $0xc0] sm:$0xff] }
 0x22a   :  { %1537 = vrot.lane.b32.xlu1 %v7138_v21, %s6310_s7  ;;  %1535 = vrot.lane.b32.xlu0 %v1424_v48, %s6310_s7  ;;  %v1428_v21 = vld [vmem:[%s9263_s0 + $0x74] sm:$0xf] }
 0x22b   :  { %1539 = vrot.lane.b32.xlu2 %v1426_v7, %s6310_s7 }
 0x22c   :  { %v1213_v5 = vpop.permute.xlu1 %1212  ;;  %v1211_v41 = vpop.permute.xlu0 %1210 }
 0x22d   :  { %v1286_v42 = vrot.slane %v1213_v5, 4  ;;  %v1285_v20 = vrot.slane %v1211_v41, 4  ;;  %v7528_v0 = vpop.permute.xlu2 %1232 }
 0x22e   :  { %v1296_v56 = vrot.slane %v7528_v0, 4 }
 0x22f   :  { %v1335_v18 = vsel %vm300_vm0, %v1286_v42, %v1287_v22  ;;  %v1333_v29 = vsel %vm300_vm0, %v1284_v10, %v1285_v20 }
 0x230   :  { %v1336_v16 = vsel %vm1313_vm4, %v1213_v5, %v1335_v18  ;;  %v1334_v61 = vsel %vm1313_vm4, %v7471_v47, %v1333_v29 }
 0x231   :  { %1396 = vst [vmem:[#allocation2 + $0x358] sm:$0xff] %v1336_v16 }
 0x232   :  { %1395 = vst [vmem:[#allocation2 + $0x350] sm:$0xff] %v1334_v61  ;;  %1543 = vrot.lane.b32.xlu1 %v1428_v21, %s6310_s7  ;;  %1541 = vrot.lane.b32.xlu0 %v7143_v11, %s6310_s7  ;;  %v1432_v11 = vld [vmem:[%s9263_s0 + $0x8c] sm:$0xf] }
 0x233   :  { %1545 = vrot.lane.b32.xlu2 %v7541_v12, %s6310_s7  ;;  %v7636_v61 = vld [vmem:[%s9263_s0 + $0xcc] sm:$0xff] }
 0x234   :  { %v1219_v53 = vpop.permute.xlu1 %1218  ;;  %v1217_v8 = vpop.permute.xlu0 %1216 }
 0x235   :  { %v1289_v32 = vrot.slane %v1219_v53, 4  ;;  %v1288_v45 = vrot.slane %v1217_v8, 4  ;;  %v1239_v25 = vpop.permute.xlu2 %1238  ;;  %v1442_v53 = vld [vmem:[%s9263_s0 + $0xc8] sm:$0xf] }
 0x236   :  { %v1299_v6 = vrot.slane %v1239_v25, 4  ;;  %v6185_v25 = vld [vmem:[#allocation2 + $0x344] sm:$0xf0] }
 0x237   :  { %v1337_v3 = vsel %vm300_vm0, %v1288_v45, %v1289_v32  ;;  %v1444_v32 = vld [vmem:[%s9263_s0 + $0xd4] sm:$0xf] }
 0x238   :  { %v1338_v47 = vsel %vm1313_vm4, %v1217_v8, %v1337_v3  ;;  %v6187_v21 = vld [vmem:[#allocation2 + $0x354] sm:$0xf0] }
 0x239   :  { %1397 = vst [vmem:[#allocation2 + $0x360] sm:$0xff] %v1338_v47  ;;  %v5594_v29 = vld [vmem:[#allocation2 + $0x350] sm:$0xf] }
 0x23a   :  { %1549 = vrot.lane.b32.xlu1 %v6304_v9, %s6310_s7  ;;  %1547 = vrot.lane.b32.xlu0 %v1430_v23, %s6310_s7  ;;  %v5595_v45 = vor.u32 %v6187_v21, %v5594_v29  ;;  %v7707_v29 = vld [vmem:[%s9263_s0 + $0x48] sm:$0xff] }
 0x23b   :  { %1551 = vrot.lane.b32.xlu2 %v1432_v11, %s6310_s7  ;;  %v5586_v11 = vld [vmem:[#allocation2 + $0x340] sm:$0xf] }
 0x23c   :  { %v1225_v30 = vpop.permute.xlu1 %1224  ;;  %v1223_v40 = vpop.permute.xlu0 %1222 }
 0x23d   :  { %v1292_v13 = vrot.slane %v1225_v30, 4  ;;  %v1291_v14 = vrot.slane %v1223_v40, 4  ;;  %v7560_v35 = vpop.permute.xlu2 %1244  ;;  %v5587_v40 = vor.u32 %v6185_v25, %v5586_v11 }
 0x23e   :  { %v1302_v9 = vrot.slane %v7560_v35, 4 }
 0x23f   :  { %v1341_v17 = vsel %vm300_vm0, %v1292_v13, %v1293_v1  ;;  %v1339_v31 = vsel %vm300_vm0, %v1290_v28, %v1291_v14  ;;  %v6183_v13 = vld [vmem:[#allocation2 + $0x334] sm:$0xf0] }
 0x240   :  { %v1342_v46 = vsel %vm1313_vm4, %v1225_v30, %v1341_v17  ;;  %v1340_v57 = vsel %vm1313_vm4, %v7500_v43, %v1339_v31  ;;  %v5602_v10 = vld [vmem:[#allocation2 + $0x360] sm:$0xf] }
 0x241   :  { %1399 = vst [vmem:[#allocation2 + $0x370] sm:$0xff] %v1342_v46  ;;  %v1446_v31 = vld [vmem:[%s9263_s0 + $0xe0] sm:$0xf] }
 0x242   :  { %1398 = vst [vmem:[#allocation2 + $0x368] sm:$0xff] %v1340_v57  ;;  %1555 = vrot.lane.b32.xlu1 %v1434_v52, %s6310_s7  ;;  %1553 = vrot.lane.b32.xlu0 %v7570_v38, %s6310_s7  ;;  %v7661_v52 = vld [vmem:[%s9263_s0 + $0xd8] sm:$0xff] }
 0x243   :  { %1557 = vrot.lane.b32.xlu2 %v7578_v15, %s6310_s7 }
 0x244   :  { %v1231_v44 = vpop.permute.xlu1 %1230  ;;  %v1229_v51 = vpop.permute.xlu0 %1228 }
 0x245   :  { %v1295_v39 = vrot.slane %v1231_v44, 4  ;;  %v1294_v26 = vrot.slane %v1229_v51, 4  ;;  %v7585_v55 = vpop.permute.xlu2 %1250  ;;  %v5578_v44 = vld [vmem:[#allocation2 + $0x330] sm:$0xf] }
 0x246   :  { %v1305_v3 = vrot.slane %v7585_v55, 4  ;;  %v6181_v55 = vld [vmem:[#allocation2 + $0x324] sm:$0xf0] }
 0x247   :  { %v1343_v37 = vsel %vm300_vm0, %v1294_v26, %v1295_v39  ;;  %v5579_v39 = vor.u32 %v6183_v13, %v5578_v44  ;;  %v5570_v26 = vld [vmem:[#allocation2 + $0x320] sm:$0xf]  ;;  %v1456_v44 = vld [vmem:[%s9263_s0 + $0x11c] sm:$0xf] }
 0x248   :  { %v1344_v49 = vsel %vm1313_vm4, %v1229_v51, %v1343_v37  ;;  %v5610_v62 = vld [vmem:[#allocation2 + $0x370] sm:$0xf]  ;;  %v7669_v51 = vld [vmem:[%s9263_s0 + $0xe4] sm:$0xff] }
 0x249   :  { %1400 = vst [vmem:[#allocation2 + $0x378] sm:$0xff] %v1344_v49  ;;  %v6189_v22 = vld [vmem:[#allocation2 + $0x364] sm:$0xf0] }
 0x24a   :  { %1561 = vrot.lane.b32.xlu1 %v7591_v24, %s6310_s7  ;;  %1559 = vrot.lane.b32.xlu0 %v1436_v36, %s6310_s7 }
 0x24b   :  { %1563 = vrot.lane.b32.xlu2 %v1438_v54, %s6310_s7  ;;  %v5571_v54 = vor.u32 %v6181_v55, %v5570_v26 }
 0x24c   :  { %v1237_v19 = vpop.permute.xlu1 %1236  ;;  %v1235_v43 = vpop.permute.xlu0 %1234 }
 0x24d   :  { %v1298_v58 = vrot.slane %v1237_v19, 4  ;;  %v1297_v33 = vrot.slane %v1235_v43, 4  ;;  %v7605_v2 = vpop.permute.xlu2 %1256 }
 0x24f   :  { %v1347_v63 = vsel %vm300_vm0, %v1298_v58, %v1299_v6  ;;  %v1345_v60 = vsel %vm300_vm0, %v1296_v56, %v1297_v33  ;;  %v7682_v56 = vld [vmem:[%s9263_s0 + $0xf0] sm:$0xff]  ;;  %v1448_v58 = vld [vmem:[%s9263_s0 + $0xec] sm:$0xf] }
 0x250   :  { %v1348_v34 = vsel %vm1313_vm4, %v1237_v19, %v1347_v63  ;;  %v1346_v4 = vsel %vm1313_vm4, %v7528_v0, %v1345_v60  ;;  %v6191_v48 = vld [vmem:[#allocation2 + $0x374] sm:$0xf0]  ;;  %v5603_v0 = vor.u32 %v6189_v22, %v5602_v10  ;;  %v5562_v63 = vld [vmem:[#allocation2 + $0x310] sm:$0xf]  ;;  %v1308_v22 = vrot.slane %v7605_v2, 4 }
 0x251   :  { %1402 = vst [vmem:[#allocation2 + $0x388] sm:$0xff] %v1348_v34  ;;  %v5611_v7 = vor.u32 %v6191_v48, %v5610_v62  ;;  %v6179_v19 = vld [vmem:[#allocation2 + $0x314] sm:$0xf0]  ;;  %v6177_v34 = vld [vmem:[#allocation2 + $0x304] sm:$0xf0] }
 0x252   :  { %1401 = vst [vmem:[#allocation2 + $0x380] sm:$0xff] %v1346_v4  ;;  %1567 = vrot.lane.b32.xlu1 %v1440_v27, %s6310_s7  ;;  %1565 = vrot.lane.b32.xlu0 %v7615_v59, %s6310_s7  ;;  %v1450_v60 = vld [vmem:[%s9263_s0 + $0xf8] sm:$0xf]  ;;  %v5563_v27 = vor.u32 %v6179_v19, %v5562_v63 }
 0x253   :  { %4456 = vmatpush.bf16.msrb.mxu2 %v5611_v7  ;;  %1569 = vrot.lane.b32.xlu2 %v7623_v50, %s6310_s7  ;;  %v5554_v7 = vld [vmem:[#allocation2 + $0x300] sm:$0xf] }
 0x254   :  { %v1243_v5 = vpop.permute.xlu1 %1242  ;;  %v1241_v41 = vpop.permute.xlu0 %1240  ;;  %v5555_v10 = vor.u32 %v6177_v34, %v5554_v7  ;;  %v1775_v7 = vld [vmem:[%s9263_s0 + $0xb0] sm:$0xf] }
 0x255   :  { %v1301_v42 = vrot.slane %v1243_v5, 4  ;;  %v1300_v20 = vrot.slane %v1241_v41, 4  ;;  %v7630_v18 = vpop.permute.xlu2 %1262 }
 0x256   :  { %v1311_v4 = vrot.slane %v7630_v18, 4  ;;  %v2096_v18 = vld [vmem:[%s9263_s0 + $0x50] sm:$0xf] }
 0x257   :  { %v1349_v16 = vsel %vm300_vm0, %v1300_v20, %v1301_v42  ;;  %4457 = vmatpush.bf16.msrb.mxu2 %v5603_v0 }
 0x258   :  { %v1350_v8 = vsel %vm1313_vm4, %v1241_v41, %v1349_v16 }
 0x259   :  { %1403 = vst [vmem:[#allocation2 + $0x390] sm:$0xff] %v1350_v8 }
 0x25a   :  { %1573 = vrot.lane.b32.xlu1 %v7636_v61, %s6310_s7  ;;  %1571 = vrot.lane.b32.xlu0 %v1442_v53, %s6310_s7  ;;  %v7715_v53 = vld [vmem:[%s9263_s0 + $0x54] sm:$0xff] }
 0x25b   :  { %4458 = vmatpush.bf16.msrb.mxu2 %v5595_v45  ;;  %1575 = vrot.lane.b32.xlu2 %v1444_v32, %s6310_s7 }
 0x25c   :  { %v1249_v23 = vpop.permute.xlu1 %1248  ;;  %v1247_v47 = vpop.permute.xlu0 %1246 }
 0x25d   :  { %v1304_v1 = vrot.slane %v1249_v23, 4  ;;  %v1303_v30 = vrot.slane %v1247_v47, 4  ;;  %v7651_v28 = vpop.permute.xlu2 %1509  ;;  %v2098_v47 = vld [vmem:[%s9263_s0 + $0x5c] sm:$0xf] }
 0x25e   :  { %v1603_v13 = vrot.slane %v7651_v28, 4 }
 0x25f   :  { %v1353_v14 = vsel %vm300_vm0, %v1304_v1, %v1305_v3  ;;  %v1351_v17 = vsel %vm300_vm0, %v1302_v9, %v1303_v30  ;;  %4459 = vmatpush.bf16.msrb.mxu2 %v5587_v40  ;;  %v1454_v9 = vld [vmem:[%s9263_s0 + $0x110] sm:$0xf] }
 0x260   :  { %v1354_v46 = vsel %vm1313_vm4, %v1249_v23, %v1353_v14  ;;  %v1352_v57 = vsel %vm1313_vm4, %v7560_v35, %v1351_v17  ;;  %v7726_v23 = vld [vmem:[%s9263_s0 + $0x108] sm:$0xff] }
 0x261   :  { %1405 = vst [vmem:[#allocation2 + $0x3a0] sm:$0xff] %v1354_v46 }
 0x262   :  { %1404 = vst [vmem:[#allocation2 + $0x398] sm:$0xff] %v1352_v57  ;;  %1579 = vrot.lane.b32.xlu1 %v1446_v31, %s6310_s7  ;;  %1577 = vrot.lane.b32.xlu0 %v7661_v52, %s6310_s7 }
 0x263   :  { %4460 = vmatpush.bf16.msrb.mxu2 %v5579_v39  ;;  %1581 = vrot.lane.b32.xlu2 %v7669_v51, %s6310_s7  ;;  %v7751_v39 = vld [vmem:[%s9263_s0 + $0x114] sm:$0xff] }
 0x264   :  { %v1255_v35 = vpop.permute.xlu1 %1254  ;;  %v1253_v37 = vpop.permute.xlu0 %1252 }
 0x265   :  { %v1307_v36 = vrot.slane %v1255_v35, 4  ;;  %v1306_v49 = vrot.slane %v1253_v37, 4  ;;  %v7676_v6 = vpop.permute.xlu2 %1515 }
 0x266   :  { %v1606_v1 = vrot.slane %v7676_v6, 4 }
 0x267   :  { %v1355_v43 = vsel %vm300_vm0, %v1306_v49, %v1307_v36  ;;  %4461 = vmatpush.bf16.msrb.mxu2 %v5571_v54 }
 0x268   :  { %v1356_v33 = vsel %vm1313_vm4, %v1253_v37, %v1355_v43  ;;  %v2130_v43 = vld [vmem:[%s9263_s0 + $0x11c] sm:$0xf] }
 0x269   :  { %1406 = vst [vmem:[#allocation2 + $0x3a8] sm:$0xff] %v1356_v33 }
 0x26a   :  { %1585 = vrot.lane.b32.xlu1 %v7682_v56, %s6310_s7  ;;  %1583 = vrot.lane.b32.xlu0 %v1448_v58, %s6310_s7 }
 0x26b   :  { %4462 = vmatpush.bf16.msrb.mxu2 %v5563_v27  ;;  %1587 = vrot.lane.b32.xlu2 %v1450_v60, %s6310_s7 }
 0x26c   :  { %v1261_v62 = vpop.permute.xlu1 %1260  ;;  %v1259_v48 = vpop.permute.xlu0 %1258 }
 0x26d   :  { %v1310_v5 = vrot.slane %v1261_v62, 4  ;;  %v1309_v41 = vrot.slane %v1259_v48, 4  ;;  %v7697_v42 = vpop.permute.xlu2 %1521 }
 0x26e   :  { %v1609_v60 = vrot.slane %v7697_v42, 4 }
 0x26f   :  { %v1359_v20 = vsel %vm300_vm0, %v1310_v5, %v1311_v4  ;;  %v1357_v0 = vsel %vm300_vm0, %v1308_v22, %v1309_v41  ;;  %4463 = vmatpush.bf16.msrb.mxu2 %v5555_v10 }
 0x270   :  { %v1360_v21 = vsel %vm1313_vm4, %v1261_v62, %v1359_v20  ;;  %v1358_v16 = vsel %vm1313_vm4, %v7605_v2, %v1357_v0 }
 0x271   :  { %1408 = vst [vmem:[#allocation2 + $0x3b8] sm:$0xff] %v1360_v21 }
 0x272   :  { %1407 = vst [vmem:[#allocation2 + $0x3b0] sm:$0xff] %v1358_v16  ;;  %2205 = vrot.lane.b32.xlu1 %v2096_v18, %s6311_s15  ;;  %2203 = vrot.lane.b32.xlu0 %v7707_v29, %s6311_s15  ;;  %v1777_v16 = vld [vmem:[%s9263_s0 + $0xbc] sm:$0xf] }
 0x273   :  { %2207 = vrot.lane.b32.xlu2 %v7715_v53, %s6311_s15 }
 0x274   :  { %v1508_v8 = vpop.permute.xlu1 %1507  ;;  %v1506_v32 = vpop.permute.xlu0 %1505 }
 0x275   :  { %v1602_v45 = vrot.slane %v1508_v8, 4  ;;  %v1601_v2 = vrot.slane %v1506_v32, 4  ;;  %v1528_v25 = vpop.permute.xlu2 %1527 }
 0x276   :  { %v1612_v58 = vrot.slane %v1528_v25, 4 }
 0x277   :  { %v1649_v3 = vsel %vm300_vm0, %v1601_v2, %v1602_v45 }
 0x278   :  { %v1651_v11 = vsel %vm1650_vm5, %v1506_v32, %v1649_v3  ;;  %v2092_v32 = vld [vmem:[%s9263_s0 + $0x38] sm:$0xf] }
 0x279   :  { %1722 = vst [vmem:[#allocation2 + $0x3c0] sm:$0xff] %v1651_v11 }
 0x27a   :  { %1593 = vrot.lane.b32.xlu1 %v7726_v23, %s6310_s7  ;;  %2209 = vrot.lane.b32.xlu0 %v2098_v47, %s6311_s15 }
 0x27b   :  { %1595 = vrot.lane.b32.xlu2 %v1454_v9, %s6310_s7 }
 0x27c   :  { %v1514_v30 = vpop.permute.xlu1 %1513  ;;  %v1512_v40 = vpop.permute.xlu0 %1511 }
 0x27d   :  { %v1605_v14 = vrot.slane %v1514_v30, 4  ;;  %v1604_v17 = vrot.slane %v1512_v40, 4  ;;  %v7741_v31 = vpop.permute.xlu2 %1533  ;;  %v2094_v40 = vld [vmem:[%s9263_s0 + $0x44] sm:$0xf] }
 0x27e   :  { %v1615_v3 = vrot.slane %v7741_v31, 4 }
 0x27f   :  { %v1654_v46 = vsel %vm300_vm0, %v1605_v14, %v1606_v1  ;;  %v1652_v57 = vsel %vm300_vm0, %v1603_v13, %v1604_v17  ;;  %v7817_v13 = vld [vmem:[%s9263_s0 + $0x3c] sm:$0xff] }
 0x280   :  { %v1655_v26 = vsel %vm1650_vm5, %v1514_v30, %v1654_v46  ;;  %v1653_v55 = vsel %vm1650_vm5, %v7651_v28, %v1652_v57  ;;  %v2128_v28 = vld [vmem:[%s9263_s0 + $0x110] sm:$0xf]  ;;  %v7828_v46 = vld [vmem:[%s9263_s0 + $0xfc] sm:$0xff] }
 0x281   :  { %1724 = vst [vmem:[#allocation2 + $0x3d0] sm:$0xff] %v1655_v26 }
 0x282   :  { %1723 = vst [vmem:[#allocation2 + $0x3c8] sm:$0xff] %v1653_v55  ;;  %1599 = vrot.lane.b32.xlu1 %v1456_v44, %s6310_s7  ;;  %1597 = vrot.lane.b32.xlu0 %v7751_v39, %s6310_s7 }
 0x283   :  { %2267 = vrot.lane.b32.xlu2 %v7726_v23, %s6311_s15 }
 0x284   :  { %v1520_v35 = vpop.permute.xlu1 %1519  ;;  %v1518_v37 = vpop.permute.xlu0 %1517 }
 0x285   :  { %v1608_v36 = vrot.slane %v1520_v35, 4  ;;  %v1607_v49 = vrot.slane %v1518_v37, 4  ;;  %v1540_v54 = vpop.permute.xlu2 %1539 }
 0x286   :  { %v1618_v45 = vrot.slane %v1540_v54, 4 }
 0x287   :  { %v1656_v6 = vsel %vm300_vm0, %v1607_v49, %v1608_v36  ;;  %v2124_v49 = vld [vmem:[%s9263_s0 + $0xf8] sm:$0xf] }
 0x288   :  { %v1657_v19 = vsel %vm1650_vm5, %v1518_v37, %v1656_v6  ;;  %v1452_v37 = vld [vmem:[%s9263_s0 + $0x104] sm:$0xf] }
 0x289   :  { %1725 = vst [vmem:[#allocation2 + $0x3d8] sm:$0xff] %v1657_v19 }
 0x28a   :  { %2271 = vrot.lane.b32.xlu1 %v7751_v39, %s6311_s15  ;;  %2269 = vrot.lane.b32.xlu0 %v2128_v28, %s6311_s15 }
 0x28b   :  { %2273 = vrot.lane.b32.xlu2 %v2130_v43, %s6311_s15 }
 0x28c   :  { %v1526_v33 = vpop.permute.xlu1 %1525  ;;  %v1524_v63 = vpop.permute.xlu0 %1523 }
 0x28d   :  { %v1611_v27 = vrot.slane %v1526_v33, 4  ;;  %v1610_v34 = vrot.slane %v1524_v63, 4  ;;  %v7774_v4 = vpop.permute.xlu2 %1545 }
 0x28f   :  { %v1660_v62 = vsel %vm300_vm0, %v1611_v27, %v1612_v58  ;;  %v1658_v48 = vsel %vm300_vm0, %v1609_v60, %v1610_v34  ;;  %v1621_v60 = vrot.slane %v7774_v4, 4 }
 0x290   :  { %v1661_v22 = vsel %vm1650_vm5, %v1526_v33, %v1660_v62  ;;  %v1659_v5 = vsel %vm1650_vm5, %v7697_v42, %v1658_v48  ;;  %v7793_v42 = vld [vmem:[%s9263_s0 + $0x30] sm:$0xff] }
 0x291   :  { %1727 = vst [vmem:[#allocation2 + $0x3e8] sm:$0xff] %v1661_v22 }
 0x292   :  { %1726 = vst [vmem:[#allocation2 + $0x3e0] sm:$0xff] %v1659_v5  ;;  %1900 = vrot.lane.b32.xlu1 %v1775_v7, %s6312_s4  ;;  %1898 = vrot.lane.b32.xlu0 %v7591_v24, %s6312_s4  ;;  %v2126_v5 = vld [vmem:[%s9263_s0 + $0x104] sm:$0xf] }
 0x293   :  { %1902 = vrot.lane.b32.xlu2 %v7615_v59, %s6312_s4 }
 0x294   :  { %v1532_v41 = vpop.permute.xlu1 %1531  ;;  %v1530_v10 = vpop.permute.xlu0 %1529 }
 0x295   :  { %v1614_v20 = vrot.slane %v1532_v41, 4  ;;  %v1613_v0 = vrot.slane %v1530_v10, 4  ;;  %v1552_v18 = vpop.permute.xlu2 %1551  ;;  %v6203_v41 = vld [vmem:[#allocation2 + $0x3d4] sm:$0xf0] }
 0x296   :  { %v1624_v19 = vrot.slane %v1552_v18, 4 }
 0x297   :  { %v1662_v21 = vsel %vm300_vm0, %v1613_v0, %v1614_v20  ;;  %v5658_v0 = vld [vmem:[#allocation2 + $0x3d0] sm:$0xf] }
 0x298   :  { %v1663_v8 = vsel %vm1650_vm5, %v1530_v10, %v1662_v21  ;;  %v6205_v58 = vld [vmem:[#allocation2 + $0x3e4] sm:$0xf0]  ;;  %v5659_v18 = vor.u32 %v6203_v41, %v5658_v0  ;;  %v2120_v0 = vld [vmem:[%s9263_s0 + $0xe0] sm:$0xf] }
 0x299   :  { %1728 = vst [vmem:[#allocation2 + $0x3f0] sm:$0xff] %v1663_v8  ;;  %v5666_v43 = vld [vmem:[#allocation2 + $0x3e0] sm:$0xf]  ;;  %v6201_v21 = vld [vmem:[#allocation2 + $0x3c4] sm:$0xf0] }
 0x29a   :  { %2195 = vrot.lane.b32.xlu1 %v7793_v42, %s6311_s15  ;;  %1904 = vrot.lane.b32.xlu0 %v1777_v16, %s6312_s4  ;;  %v5667_v48 = vor.u32 %v6205_v58, %v5666_v43  ;;  %v7896_v58 = vld [vmem:[%s9263_s0 + $0x24] sm:$0xff] }
 0x29b   :  { %2197 = vrot.lane.b32.xlu2 %v2092_v32, %s6311_s15 }
 0x29c   :  { %v1538_v2 = vpop.permute.xlu1 %1537  ;;  %v1536_v25 = vpop.permute.xlu0 %1535 }
 0x29d   :  { %v1617_v47 = vrot.slane %v1538_v2, 4  ;;  %v1616_v11 = vrot.slane %v1536_v25, 4  ;;  %v7807_v9 = vpop.permute.xlu2 %1557 }
 0x29f   :  { %v1666_v1 = vsel %vm300_vm0, %v1617_v47, %v1618_v45  ;;  %v1664_v30 = vsel %vm300_vm0, %v1615_v3, %v1616_v11  ;;  %v1771_v47 = vld [vmem:[%s9263_s0 + $0x98] sm:$0xf]  ;;  %v5642_v11 = vld [vmem:[#allocation2 + $0x3b0] sm:$0xf] }
 0x2a0   :  { %v1667_v14 = vsel %vm1650_vm5, %v1538_v2, %v1666_v1  ;;  %v1665_v17 = vsel %vm1650_vm5, %v7741_v31, %v1664_v30  ;;  %v5674_v54 = vld [vmem:[#allocation2 + $0x3f0] sm:$0xf]  ;;  %v6199_v1 = vld [vmem:[#allocation2 + $0x3b4] sm:$0xf0] }
 0x2a1   :  { %1730 = vst [vmem:[#allocation2 + $0x400] sm:$0xff] %v1667_v14 }
 0x2a2   :  { %1729 = vst [vmem:[#allocation2 + $0x3f8] sm:$0xff] %v1665_v17  ;;  %2201 = vrot.lane.b32.xlu1 %v2094_v40, %s6311_s15  ;;  %2199 = vrot.lane.b32.xlu0 %v7817_v13, %s6311_s15  ;;  %v5643_v40 = vor.u32 %v6199_v1, %v5642_v11  ;;  %v6197_v17 = vld [vmem:[#allocation2 + $0x3a4] sm:$0xf0] }
 0x2a3   :  { %1589 = vrot.lane.b32.xlu2 %v7828_v46, %s6310_s7 }
 0x2a4   :  { %v1544_v57 = vpop.permute.xlu1 %1543  ;;  %v1542_v44 = vpop.permute.xlu0 %1541 }
 0x2a5   :  { %v1620_v26 = vrot.slane %v1544_v57, 4  ;;  %v1619_v55 = vrot.slane %v1542_v44, 4  ;;  %v7832_v31 = vpop.permute.xlu2 %1563 }
 0x2a6   :  { %v1630_v14 = vrot.slane %v7832_v31, 4  ;;  %v2088_v31 = vld [vmem:[%s9263_s0 + $0x20] sm:$0xf] }
 0x2a7   :  { %v1668_v35 = vsel %vm300_vm0, %v1619_v55, %v1620_v26  ;;  %v1627_v26 = vrot.slane %v7807_v9, 4 }
 0x2a8   :  { %v1669_v36 = vsel %vm1650_vm5, %v1542_v44, %v1668_v35 }
 0x2a9   :  { %1731 = vst [vmem:[#allocation2 + $0x408] sm:$0xff] %v1669_v36  ;;  %v6207_v6 = vld [vmem:[#allocation2 + $0x3f4] sm:$0xf0] }
 0x2aa   :  { %2259 = vrot.lane.b32.xlu1 %v7682_v56, %s6311_s15  ;;  %1591 = vrot.lane.b32.xlu0 %v1452_v37, %s6310_s7  ;;  %v5675_v28 = vor.u32 %v6207_v6, %v5674_v54  ;;  %v5634_v37 = vld [vmem:[#allocation2 + $0x3a0] sm:$0xf]  ;;  %v7888_v6 = vld [vmem:[%s9263_s0 + $0x18] sm:$0xff] }
 0x2ab   :  { %2261 = vrot.lane.b32.xlu2 %v2124_v49, %s6311_s15  ;;  %v5635_v49 = vor.u32 %v6197_v17, %v5634_v37 }
 0x2ac   :  { %4480 = vmatpush.bf16.msrb.mxu3 %v5675_v28  ;;  %v1550_v33 = vpop.permute.xlu1 %1549  ;;  %v1548_v63 = vpop.permute.xlu0 %1547  ;;  %v6195_v28 = vld [vmem:[#allocation2 + $0x394] sm:$0xf0] }
 0x2ad   :  { %v1623_v27 = vrot.slane %v1550_v33, 4  ;;  %v1622_v34 = vrot.slane %v1548_v63, 4  ;;  %v7847_v62 = vpop.permute.xlu2 %1569 }
 0x2af   :  { %v1672_v7 = vsel %vm300_vm0, %v1623_v27, %v1624_v19  ;;  %v1670_v22 = vsel %vm300_vm0, %v1621_v60, %v1622_v34  ;;  %v5618_v60 = vld [vmem:[#allocation2 + $0x380] sm:$0xf]  ;;  %v6193_v27 = vld [vmem:[#allocation2 + $0x384] sm:$0xf0] }
 0x2b0   :  { %v1673_v10 = vsel %vm1650_vm5, %v1550_v33, %v1672_v7  ;;  %v1671_v20 = vsel %vm1650_vm5, %v7774_v4, %v1670_v22  ;;  %4481 = vmatpush.bf16.msrb.mxu3 %v5667_v48  ;;  %v5650_v4 = vld [vmem:[#allocation2 + $0x3c0] sm:$0xf]  ;;  %v5626_v33 = vld [vmem:[#allocation2 + $0x390] sm:$0xf] }
 0x2b1   :  { %1733 = vst [vmem:[#allocation2 + $0x418] sm:$0xff] %v1673_v10  ;;  %v5651_v25 = vor.u32 %v6201_v21, %v5650_v4  ;;  %v5627_v63 = vor.u32 %v6195_v28, %v5626_v33  ;;  %v2090_v10 = vld [vmem:[%s9263_s0 + $0x2c] sm:$0xf]  ;;  %v7971_v33 = vld [vmem:[%s9263_s0] sm:$0xff] }
 0x2b2   :  { %1732 = vst [vmem:[#allocation2 + $0x410] sm:$0xff] %v1671_v20  ;;  %2265 = vrot.lane.b32.xlu1 %v2126_v5, %s6311_s15  ;;  %2263 = vrot.lane.b32.xlu0 %v7828_v46, %s6311_s15  ;;  %v5619_v5 = vor.u32 %v6193_v27, %v5618_v60  ;;  %v7979_v27 = vld [vmem:[%s9263_s0 + $0xc] sm:$0xff] }
 0x2b3   :  { %1890 = vrot.lane.b32.xlu2 %v7570_v38, %s6312_s4  ;;  %v1773_v38 = vld [vmem:[%s9263_s0 + $0xa4] sm:$0xf] }
 0x2b4   :  { %4482 = vmatpush.bf16.msrb.mxu3 %v5659_v18  ;;  %v1556_v16 = vpop.permute.xlu1 %1555  ;;  %v1554_v8 = vpop.permute.xlu0 %1553 }
 0x2b5   :  { %v1626_v32 = vrot.slane %v1556_v16, 4  ;;  %v1625_v45 = vrot.slane %v1554_v8, 4  ;;  %v7862_v2 = vpop.permute.xlu2 %1575 }
 0x2b6   :  { %v1636_v18 = vrot.slane %v7862_v2, 4 }
 0x2b7   :  { %v1674_v3 = vsel %vm300_vm0, %v1625_v45, %v1626_v32 }
 0x2b8   :  { %v1675_v30 = vsel %vm1650_vm5, %v1554_v8, %v1674_v3  ;;  %4483 = vmatpush.bf16.msrb.mxu3 %v5651_v25  ;;  %v1633_v8 = vrot.slane %v7847_v62, 4 }
 0x2b9   :  { %1734 = vst [vmem:[#allocation2 + $0x420] sm:$0xff] %v1675_v30 }
 0x2ba   :  { %1894 = vrot.lane.b32.xlu1 %v7578_v15, %s6312_s4  ;;  %1892 = vrot.lane.b32.xlu0 %v1771_v47, %s6312_s4 }
 0x2bb   :  { %1896 = vrot.lane.b32.xlu2 %v1773_v38, %s6312_s4 }
 0x2bc   :  { %4484 = vmatpush.bf16.msrb.mxu3 %v5643_v40  ;;  %v1562_v57 = vpop.permute.xlu1 %1561  ;;  %v1560_v44 = vpop.permute.xlu0 %1559 }
 0x2bd   :  { %v1629_v55 = vrot.slane %v1562_v57, 4  ;;  %v1628_v35 = vrot.slane %v1560_v44, 4  ;;  %v7878_v36 = vpop.permute.xlu2 %1581  ;;  %v6046_v44 = vld [vmem:[%s9264_s1 + $0x3c] sm:$0xf0] }
 0x2bf   :  { %v1678_v15 = vsel %vm300_vm0, %v1629_v55, %v1630_v14  ;;  %v1676_v54 = vsel %vm300_vm0, %v1627_v26, %v1628_v35 }
 0x2c0   :  { %v1679_v19 = vsel %vm1650_vm5, %v1562_v57, %v1678_v15  ;;  %v1677_v43 = vsel %vm1650_vm5, %v7807_v9, %v1676_v54  ;;  %4485 = vmatpush.bf16.msrb.mxu3 %v5635_v49  ;;  %v5010_v57 = vld [vmem:[%s9264_s1 + $0x8] sm:$0xf]  ;;  %v1639_v49 = vrot.slane %v7878_v36, 4 }
 0x2c1   :  { %1736 = vst [vmem:[#allocation2 + $0x430] sm:$0xff] %v1679_v19  ;;  %v7957_v55 = vor.u32 %v6046_v44, %v5010_v57  ;;  %v8044_v44 = vld [vmem:[%s9263_s0 + $0x6c] sm:$0xff] }
 0x2c2   :  { %1735 = vst [vmem:[#allocation2 + $0x428] sm:$0xff] %v1677_v43  ;;  %2189 = vrot.lane.b32.xlu1 %v2088_v31, %s6311_s15  ;;  %2187 = vrot.lane.b32.xlu0 %v7888_v6, %s6311_s15  ;;  %v2084_v43 = vld [vmem:[%s9263_s0 + $0x8] sm:$0xf] }
 0x2c3   :  { %2191 = vrot.lane.b32.xlu2 %v7896_v58, %s6311_s15  ;;  %4368 = vmatmul.bf16.vlgmr.msra.gmra.mxu2 %v7957_v55 }
 0x2c4   :  { %4486 = vmatpush.bf16.msrb.mxu3 %v5627_v63  ;;  %v1568_v9 = vpop.permute.xlu1 %1567  ;;  %v1566_v34 = vpop.permute.xlu0 %1565 }
 0x2c5   :  { %v1632_v48 = vrot.slane %v1568_v9, 4  ;;  %v1631_v7 = vrot.slane %v1566_v34, 4  ;;  %v1588_v22 = vpop.permute.xlu2 %1587  ;;  %v5002_v9 = vld [vmem:[%s9264_s1] sm:$0xf] }
 0x2c6   :  { %v1642_v26 = vrot.slane %v1588_v22, 4 }
 0x2c7   :  { %v1680_v41 = vsel %vm300_vm0, %v1631_v7, %v1632_v48 }
 0x2c8   :  { %v1681_v20 = vsel %vm1650_vm5, %v1566_v34, %v1680_v41  ;;  %4487 = vmatpush.bf16.msrb.mxu3 %v5619_v5  ;;  %v6045_v34 = vld [vmem:[%s9264_s1 + $0x34] sm:$0xf0] }
 0x2c9   :  { %1737 = vst [vmem:[#allocation2 + $0x438] sm:$0xff] %v1681_v20  ;;  %v2086_v20 = vld [vmem:[%s9263_s0 + $0x14] sm:$0xf] }
 0x2ca   :  { %2251 = vrot.lane.b32.xlu1 %v7661_v52, %s6311_s15  ;;  %2193 = vrot.lane.b32.xlu0 %v2090_v10, %s6311_s15  ;;  %v2122_v52 = vld [vmem:[%s9263_s0 + $0xec] sm:$0xf] }
 0x2cb   :  { %2253 = vrot.lane.b32.xlu2 %v2120_v0, %s6311_s15 }
 0x2cc   :  { %v1574_v21 = vpop.permute.xlu1 %1573  ;;  %v1572_v16 = vpop.permute.xlu0 %1571 }
 0x2cd   :  { %v1635_v32 = vrot.slane %v1574_v21, 4  ;;  %v1634_v45 = vrot.slane %v1572_v16, 4  ;;  %v7917_v4 = vpop.permute.xlu2 %2207  ;;  %v5012_v16 = vld [vmem:[%s9264_s1 + $0x40] sm:$0xf0] }
 0x2cf   :  { %v1684_v25 = vsel %vm300_vm0, %v1635_v32, %v1636_v18  ;;  %v1682_v3 = vsel %vm300_vm0, %v1633_v8, %v1634_v45  ;;  %v2116_v18 = vld [vmem:[%s9263_s0 + $0xc8] sm:$0xf] }
 0x2d0   :  { %v1685_v2 = vsel %vm1650_vm5, %v1574_v21, %v1684_v25  ;;  %v1683_v47 = vsel %vm1650_vm5, %v7847_v62, %v1682_v3  ;;  %v7938_v62 = vld [vmem:[%s9263_s0 + $0x84] sm:$0xff]  ;;  %v6039_v21 = vld [vmem:[%s9264_s1 + $0xc] sm:$0xf]  ;;  %v2289_v3 = vrot.slane %v7917_v4, 4 }
 0x2d1   :  { %1739 = vst [vmem:[#allocation2 + $0x448] sm:$0xff] %v1685_v2  ;;  %v8012_v8 = vor.u32 %v6039_v21, %v5012_v16 }
 0x2d2   :  { %1738 = vst [vmem:[#allocation2 + $0x440] sm:$0xff] %v1683_v47  ;;  %2257 = vrot.lane.b32.xlu1 %v2122_v52, %s6311_s15  ;;  %2255 = vrot.lane.b32.xlu0 %v7669_v51, %s6311_s15  ;;  %v1767_v51 = vld [vmem:[%s9263_s0 + $0x80] sm:$0xf] }
 0x2d3   :  { %1882 = vrot.lane.b32.xlu2 %v7541_v12, %s6312_s4  ;;  %v1769_v12 = vld [vmem:[%s9263_s0 + $0x8c] sm:$0xf]  ;;  %4392 = vmatmul.bf16.vlgmr.msra.gmra.mxu3 %v8012_v8 }
 0x2d4   :  { %v1580_v11 = vpop.permute.xlu1 %1579  ;;  %v1578_v1 = vpop.permute.xlu0 %1577 }
 0x2d5   :  { %v1638_v30 = vrot.slane %v1580_v11, 4  ;;  %v1637_v38 = vrot.slane %v1578_v1, 4  ;;  %v7932_v40 = vpop.permute.xlu2 %1595 }
 0x2d6   :  { %v1646_v32 = vrot.slane %v7932_v40, 4  ;;  %v8031_v40 = vld [vmem:[%s9263_s0 + $0x60] sm:$0xff] }
 0x2d7   :  { %v1686_v14 = vsel %vm300_vm0, %v1637_v38, %v1638_v30 }
 0x2d8   :  { %v1687_v17 = vsel %vm1650_vm5, %v1578_v1, %v1686_v14  ;;  %v2118_v1 = vld [vmem:[%s9263_s0 + $0xd4] sm:$0xf] }
 0x2d9   :  { %1740 = vst [vmem:[#allocation2 + $0x450] sm:$0xff] %v1687_v17 }
 0x2da   :  { %1886 = vrot.lane.b32.xlu1 %v7938_v62, %s6312_s4  ;;  %1884 = vrot.lane.b32.xlu0 %v1767_v51, %s6312_s4 }
 0x2db   :  { %1888 = vrot.lane.b32.xlu2 %v1769_v12, %s6312_s4 }
 0x2dc   :  { %v1586_v35 = vpop.permute.xlu1 %1585  ;;  %v1584_v37 = vpop.permute.xlu0 %1583 }
 0x2dd   :  { %v1641_v15 = vrot.slane %v1586_v35, 4  ;;  %v1640_v54 = vrot.slane %v1584_v37, 4  ;;  %v7960_v31 = vpop.permute.xlu2 %2267  ;;  %v1765_v37 = vld [vmem:[%s9263_s0 + $0x74] sm:$0xf] }
 0x2df   :  { %v1690_v28 = vsel %vm300_vm0, %v1641_v15, %v1642_v26  ;;  %v1688_v19 = vsel %vm300_vm0, %v1639_v49, %v1640_v54  ;;  %v6038_v15 = vld [vmem:[%s9264_s1 + $0x4] sm:$0xf] }
 0x2e0   :  { %v1691_v63 = vsel %vm1650_vm5, %v1586_v35, %v1690_v28  ;;  %v1689_v60 = vsel %vm1650_vm5, %v7878_v36, %v1688_v19  ;;  %v7990_v36 = vor.u32 %v6045_v34, %v5002_v9  ;;  %v5004_v28 = vld [vmem:[%s9264_s1 + $0x38] sm:$0xf0]  ;;  %v2319_v9 = vrot.slane %v7960_v31, 4 }
 0x2e1   :  { %1742 = vst [vmem:[#allocation2 + $0x460] sm:$0xff] %v1691_v63 }
 0x2e2   :  { %1741 = vst [vmem:[#allocation2 + $0x458] sm:$0xff] %v1689_v60  ;;  %2181 = vrot.lane.b32.xlu1 %v2084_v43, %s6311_s15  ;;  %2179 = vrot.lane.b32.xlu0 %v7971_v33, %s6311_s15  ;;  %v8063_v43 = vor.u32 %v6038_v15, %v5004_v28 }
 0x2e3   :  { %2183 = vrot.lane.b32.xlu2 %v7979_v27, %s6311_s15  ;;  %4320 = vmatmul.bf16.vlgmr.msra.gmra.mxu0 %v7990_v36 }
 0x2e4   :  { %v2206_v48 = vpop.permute.xlu1 %2205  ;;  %v2204_v7 = vpop.permute.xlu0 %2203  ;;  %4344 = vmatmul.bf16.vlgmr.msra.gmra.mxu1 %v8063_v43 }
 0x2e5   :  { %v2288_v22 = vrot.slane %v2206_v48, 4  ;;  %v2287_v5 = vrot.slane %v2204_v7, 4  ;;  %v2274_v41 = vpop.permute.xlu2 %2273 }
 0x2e6   :  { %v2322_v19 = vrot.slane %v2274_v41, 4  ;;  %v1791_v41 = vld [vmem:[%s9263_s0 + $0x110] sm:$0xf] }
 0x2e7   :  { %v2336_v10 = vsel %vm300_vm0, %v2287_v5, %v2288_v22 }
 0x2e8   :  { %v2337_v0 = vsel %vm2324_vm6, %v2204_v7, %v2336_v10 }
 0x2e9   :  { %2402 = vst [vmem:[#allocation2 + $0x570] sm:$0xff] %v2337_v0 }
 0x2ea   :  { %2243 = vrot.lane.b32.xlu1 %v7623_v50, %s6311_s15  ;;  %2185 = vrot.lane.b32.xlu0 %v2086_v20, %s6311_s15 }
 0x2eb   :  { %2245 = vrot.lane.b32.xlu2 %v2116_v18, %s6311_s15 }
 0x2ec   :  { %v1594_v45 = vpop.permute.xlu1 %1593  ;;  %v2210_v25 = vpop.permute.xlu0 %2209 }
 0x2ed   :  { %v1645_v52 = vrot.slane %v1594_v45, 4  ;;  %v2290_v2 = vrot.slane %v2210_v25, 4  ;;  %v8018_v47 = vpop.permute.xlu2 %1902 }
 0x2ef   :  { %v1694_v50 = vsel %vm300_vm0, %v1645_v52, %v1646_v32  ;;  %v2338_v11 = vsel %vm300_vm0, %v2289_v3, %v2290_v2  ;;  %v1793_v52 = vld [vmem:[%s9263_s0 + $0x11c] sm:$0xf] }
 0x2f0   :  { %v1695_v30 = vsel %vm1650_vm5, %v1594_v45, %v1694_v50  ;;  %v2339_v38 = vsel %vm2324_vm6, %v7917_v4, %v2338_v11  ;;  %v5866_v35 = vld [vmem:[#allocation2 + $0x570] sm:$0xf] }
 0x2f1   :  { %1744 = vst [vmem:[#allocation2 + $0x470] sm:$0xff] %v1695_v30 }
 0x2f2   :  { %2403 = vst [vmem:[#allocation2 + $0x578] sm:$0xff] %v2339_v38  ;;  %2249 = vrot.lane.b32.xlu1 %v2118_v1, %s6311_s15  ;;  %2247 = vrot.lane.b32.xlu0 %v7636_v61, %s6311_s15  ;;  %v1763_v61 = vld [vmem:[%s9263_s0 + $0x68] sm:$0xf] }
 0x2f3   :  { %1874 = vrot.lane.b32.xlu2 %v8031_v40, %s6312_s4 }
 0x2f4   :  { %v1600_v14 = vpop.permute.xlu1 %1599  ;;  %v1598_v51 = vpop.permute.xlu0 %1597 }
 0x2f5   :  { %v1648_v17 = vrot.slane %v1600_v14, 4  ;;  %v1647_v12 = vrot.slane %v1598_v51, 4  ;;  %v8038_v4 = vpop.permute.xlu2 %2197  ;;  %v1968_v14 = vrot.slane %v8018_v47, 4 }
 0x2f6   :  { %v2284_v1 = vrot.slane %v8038_v4, 4 }
 0x2f7   :  { %v1696_v57 = vsel %vm300_vm0, %v1647_v12, %v1648_v17 }
 0x2f8   :  { %v1697_v26 = vsel %vm1650_vm5, %v1598_v51, %v1696_v57  ;;  %v5738_v0 = vld [vmem:[#allocation2 + $0x470] sm:$0xf] }
 0x2f9   :  { %1745 = vst [vmem:[#allocation2 + $0x478] sm:$0xff] %v1697_v26  ;;  %v6255_v49 = vld [vmem:[#allocation2 + $0x574] sm:$0xf0] }
 0x2fa   :  { %1878 = vrot.lane.b32.xlu1 %v8044_v44, %s6312_s4  ;;  %1876 = vrot.lane.b32.xlu0 %v1763_v61, %s6312_s4  ;;  %v5867_v54 = vor.u32 %v6255_v49, %v5866_v35  ;;  %v2114_v61 = vld [vmem:[%s9263_s0 + $0xbc] sm:$0xf] }
 0x2fb   :  { %1880 = vrot.lane.b32.xlu2 %v1765_v37, %s6312_s4 }
 0x2fc   :  { %4552 = vmatpush.bf16.msra.mxu2 %v5867_v54  ;;  %v2272_v63 = vpop.permute.xlu1 %2271  ;;  %v2270_v60 = vpop.permute.xlu0 %2269 }
 0x2fd   :  { %v2321_v34 = vrot.slane %v2272_v63, 4  ;;  %v2320_v48 = vrot.slane %v2270_v60, 4  ;;  %v8066_v7 = vpop.permute.xlu2 %1589 }
 0x2ff   :  { %v2370_v22 = vsel %vm300_vm0, %v2321_v34, %v2322_v19  ;;  %v2368_v5 = vsel %vm300_vm0, %v2319_v9, %v2320_v48 }
 0x300   :  { %v2371_v10 = vsel %vm2324_vm6, %v2272_v63, %v2370_v22  ;;  %v2369_v20 = vsel %vm2324_vm6, %v7960_v31, %v2368_v5  ;;  %v6223_v18 = vld [vmem:[#allocation2 + $0x474] sm:$0xf0]  ;;  %v1643_v22 = vrot.slane %v8066_v7, 4 }
 0x301   :  { %2419 = vst [vmem:[#allocation2 + $0x5f8] sm:$0xff] %v2371_v10  ;;  %v5739_v21 = vor.u32 %v6223_v18, %v5738_v0 }
 0x302   :  { %2418 = vst [vmem:[#allocation2 + $0x5f0] sm:$0xff] %v2369_v20  ;;  %1932 = vrot.lane.b32.xlu1 %v1791_v41, %s6312_s4  ;;  %1930 = vrot.lane.b32.xlu0 %v7726_v23, %s6312_s4  ;;  %v2112_v23 = vld [vmem:[%s9263_s0 + $0xb0] sm:$0xf] }
 0x303   :  { %4504 = vmatpush.bf16.msra.mxu0 %v5739_v21  ;;  %1934 = vrot.lane.b32.xlu2 %v7751_v39, %s6312_s4 }
 0x304   :  { %v1901_v16 = vpop.permute.xlu1 %1900  ;;  %v1899_v32 = vpop.permute.xlu0 %1898 }
 0x305   :  { %v1967_v45 = vrot.slane %v1901_v16, 4  ;;  %v1966_v25 = vrot.slane %v1899_v32, 4  ;;  %v2262_v31 = vpop.permute.xlu2 %2261 }
 0x306   :  { %v2316_v9 = vrot.slane %v2262_v31, 4 }
 0x307   :  { %v2015_v3 = vsel %vm300_vm0, %v1966_v25, %v1967_v45 }
 0x308   :  { %v2016_v2 = vsel %vm1987_vm7, %v1899_v32, %v2015_v3  ;;  %v6271_v50 = vld [vmem:[#allocation2 + $0x5f4] sm:$0xf0] }
 0x309   :  { %2073 = vst [vmem:[#allocation2 + $0x4f0] sm:$0xff] %v2016_v2  ;;  %v5930_v39 = vld [vmem:[#allocation2 + $0x5f0] sm:$0xf] }
 0x30a   :  { %2235 = vrot.lane.b32.xlu1 %v7591_v24, %s6311_s15  ;;  %1936 = vrot.lane.b32.xlu0 %v1793_v52, %s6312_s4  ;;  %v5931_v11 = vor.u32 %v6271_v50, %v5930_v39  ;;  %v8147_v50 = vld [vmem:[%s9263_s0 + $0x90] sm:$0xff]  ;;  %v5730_v39 = vld [vmem:[#allocation2 + $0x460] sm:$0xf] }
 0x30b   :  { %2237 = vrot.lane.b32.xlu2 %v2112_v23, %s6311_s15 }
 0x30c   :  { %4576 = vmatpush.bf16.msra.mxu3 %v5931_v11  ;;  %v2196_v30 = vpop.permute.xlu1 %2195  ;;  %v1905_v38 = vpop.permute.xlu0 %1904 }
 0x30d   :  { %v2283_v51 = vrot.slane %v2196_v30, 4  ;;  %v1969_v17 = vrot.slane %v1905_v38, 4  ;;  %v8096_v12 = vpop.permute.xlu2 %1890  ;;  %v6219_v38 = vld [vmem:[#allocation2 + $0x454] sm:$0xf0] }
 0x30f   :  { %v2332_v57 = vsel %vm300_vm0, %v2283_v51, %v2284_v1  ;;  %v2017_v24 = vsel %vm300_vm0, %v1968_v14, %v1969_v17  ;;  %v1962_v17 = vrot.slane %v8096_v12, 4 }
 0x310   :  { %v2333_v4 = vsel %vm2324_vm6, %v2196_v30, %v2332_v57  ;;  %v2018_v26 = vsel %vm1987_vm7, %v8018_v47, %v2017_v24  ;;  %v1759_v47 = vld [vmem:[%s9263_s0 + $0x50] sm:$0xf] }
 0x311   :  { %2400 = vst [vmem:[#allocation2 + $0x560] sm:$0xff] %v2333_v4 }
 0x312   :  { %2074 = vst [vmem:[#allocation2 + $0x4f8] sm:$0xff] %v2018_v26  ;;  %2241 = vrot.lane.b32.xlu1 %v2114_v61, %s6311_s15  ;;  %2239 = vrot.lane.b32.xlu0 %v7615_v59, %s6311_s15  ;;  %v1761_v59 = vld [vmem:[%s9263_s0 + $0x5c] sm:$0xf]  ;;  %v5722_v61 = vld [vmem:[#allocation2 + $0x450] sm:$0xf] }
 0x313   :  { %1866 = vrot.lane.b32.xlu2 %v7707_v29, %s6312_s4  ;;  %v5802_v29 = vld [vmem:[#allocation2 + $0x4f0] sm:$0xf]  ;;  %v5723_v26 = vor.u32 %v6219_v38, %v5722_v61  ;;  %v5682_v61 = vld [vmem:[#allocation2 + $0x400] sm:$0xf] }
 0x314   :  { %v2202_v35 = vpop.permute.xlu1 %2201  ;;  %v2200_v37 = vpop.permute.xlu0 %2199 }
 0x315   :  { %v2286_v49 = vrot.slane %v2202_v35, 4  ;;  %v2285_v15 = vrot.slane %v2200_v37, 4  ;;  %v8111_v54 = vpop.permute.xlu2 %1896  ;;  %v6217_v35 = vld [vmem:[#allocation2 + $0x444] sm:$0xf0] }
 0x316   :  { %v1965_v30 = vrot.slane %v8111_v54, 4  ;;  %v8172_v54 = vld [vmem:[%s9263_s0 + $0x9c] sm:$0xff] }
 0x317   :  { %v2334_v28 = vsel %vm300_vm0, %v2285_v15, %v2286_v49  ;;  %v2110_v15 = vld [vmem:[%s9263_s0 + $0xa4] sm:$0xf] }
 0x318   :  { %v2335_v19 = vsel %vm2324_vm6, %v2200_v37, %v2334_v28  ;;  %v5858_v16 = vld [vmem:[#allocation2 + $0x560] sm:$0xf] }
 0x319   :  { %2401 = vst [vmem:[#allocation2 + $0x568] sm:$0xff] %v2335_v19  ;;  %v6239_v63 = vld [vmem:[#allocation2 + $0x4f4] sm:$0xf0]  ;;  %v5714_v28 = vld [vmem:[#allocation2 + $0x440] sm:$0xf] }
 0x31a   :  { %1870 = vrot.lane.b32.xlu1 %v7715_v53, %s6312_s4  ;;  %1868 = vrot.lane.b32.xlu0 %v1759_v47, %s6312_s4  ;;  %v5803_v60 = vor.u32 %v6239_v63, %v5802_v29  ;;  %v1787_v53 = vld [vmem:[%s9263_s0 + $0xf8] sm:$0xf] }
 0x31b   :  { %1872 = vrot.lane.b32.xlu2 %v1761_v59, %s6312_s4 }
 0x31c   :  { %4528 = vmatpush.bf16.msra.mxu1 %v5803_v60  ;;  %v2260_v34 = vpop.permute.xlu1 %2259  ;;  %v1592_v48 = vpop.permute.xlu0 %1591  ;;  %v5715_v60 = vor.u32 %v6217_v35, %v5714_v28 }
 0x31d   :  { %v2315_v5 = vrot.slane %v2260_v34, 4  ;;  %v1644_v41 = vrot.slane %v1592_v48, 4  ;;  %v8126_v10 = vpop.permute.xlu2 %2191 }
 0x31f   :  { %v2364_v20 = vsel %vm300_vm0, %v2315_v5, %v2316_v9  ;;  %v1692_v0 = vsel %vm300_vm0, %v1643_v22, %v1644_v41  ;;  %v6215_v9 = vld [vmem:[#allocation2 + $0x434] sm:$0xf0]  ;;  %v5706_v5 = vld [vmem:[#allocation2 + $0x430] sm:$0xf] }
 0x320   :  { %v2365_v18 = vsel %vm2324_vm6, %v2260_v34, %v2364_v20  ;;  %v1693_v21 = vsel %vm1650_vm5, %v8066_v7, %v1692_v0  ;;  %v6253_v32 = vld [vmem:[#allocation2 + $0x564] sm:$0xf0]  ;;  %v5707_v20 = vor.u32 %v6215_v9, %v5706_v5 }
 0x321   :  { %2416 = vst [vmem:[#allocation2 + $0x5e0] sm:$0xff] %v2365_v18  ;;  %v5859_v45 = vor.u32 %v6253_v32, %v5858_v16  ;;  %v6213_v18 = vld [vmem:[#allocation2 + $0x424] sm:$0xf0]  ;;  %v1757_v16 = vld [vmem:[%s9263_s0 + $0x44] sm:$0xf] }
 0x322   :  { %1743 = vst [vmem:[#allocation2 + $0x468] sm:$0xff] %v1693_v21  ;;  %1924 = vrot.lane.b32.xlu1 %v1787_v53, %s6312_s4  ;;  %1922 = vrot.lane.b32.xlu0 %v7682_v56, %s6312_s4  ;;  %v1789_v56 = vld [vmem:[%s9263_s0 + $0x104] sm:$0xf]  ;;  %v1755_v53 = vld [vmem:[%s9263_s0 + $0x38] sm:$0xf] }
 0x323   :  { %4553 = vmatpush.bf16.msra.mxu2 %v5859_v45  ;;  %1926 = vrot.lane.b32.xlu2 %v7828_v46, %s6312_s4  ;;  %v2108_v46 = vld [vmem:[%s9263_s0 + $0x98] sm:$0xf]  ;;  %v5698_v32 = vld [vmem:[#allocation2 + $0x420] sm:$0xf] }
 0x324   :  { %v2266_v25 = vpop.permute.xlu1 %2265  ;;  %v2264_v31 = vpop.permute.xlu0 %2263 }
 0x325   :  { %v2318_v3 = vrot.slane %v2266_v25, 4  ;;  %v2317_v52 = vrot.slane %v2264_v31, 4  ;;  %v8141_v2 = vpop.permute.xlu2 %2253  ;;  %v5699_v25 = vor.u32 %v6213_v18, %v5698_v32 }
 0x327   :  { %v2366_v7 = vsel %vm300_vm0, %v2317_v52, %v2318_v3  ;;  %v2312_v3 = vrot.slane %v8141_v2, 4  ;;  %v5690_v52 = vld [vmem:[#allocation2 + $0x410] sm:$0xf]  ;;  %v1783_v2 = vld [vmem:[%s9263_s0 + $0xe0] sm:$0xf] }
 0x328   :  { %v2367_v23 = vsel %vm2324_vm6, %v2264_v31, %v2366_v7  ;;  %v5922_v59 = vld [vmem:[#allocation2 + $0x5e0] sm:$0xf]  ;;  %v6211_v7 = vld [vmem:[#allocation2 + $0x414] sm:$0xf0] }
 0x329   :  { %2417 = vst [vmem:[#allocation2 + $0x5e8] sm:$0xff] %v2367_v23  ;;  %v6221_v11 = vld [vmem:[#allocation2 + $0x464] sm:$0xf0] }
 0x32a   :  { %2227 = vrot.lane.b32.xlu1 %v8147_v50, %s6311_s15  ;;  %1928 = vrot.lane.b32.xlu0 %v1789_v56, %s6312_s4  ;;  %v5731_v1 = vor.u32 %v6221_v11, %v5730_v39 }
 0x32b   :  { %2229 = vrot.lane.b32.xlu2 %v2108_v46, %s6311_s15  ;;  %v2281_v46 = vrot.slane %v8126_v10, 4 }
 0x32c   :  { %4505 = vmatpush.bf16.msra.mxu0 %v5731_v1  ;;  %v1895_v14 = vpop.permute.xlu1 %1894  ;;  %v1893_v51 = vpop.permute.xlu0 %1892 }
 0x32d   :  { %v1964_v57 = vrot.slane %v1895_v14, 4  ;;  %v1963_v24 = vrot.slane %v1893_v51, 4  ;;  %v8162_v4 = vpop.permute.xlu2 %1882  ;;  %v6209_v51 = vld [vmem:[#allocation2 + $0x404] sm:$0xf0] }
 0x32f   :  { %v2013_v37 = vsel %vm300_vm0, %v1964_v57, %v1965_v30  ;;  %v2011_v49 = vsel %vm300_vm0, %v1962_v17, %v1963_v24  ;;  %v8216_v24 = vld [vmem:[%s9263_s0 + $0xe4] sm:$0xff] }
 0x330   :  { %v2014_v47 = vsel %vm1987_vm7, %v1895_v14, %v2013_v37  ;;  %v2012_v19 = vsel %vm1987_vm7, %v8096_v12, %v2011_v49  ;;  %4506 = vmatpush.bf16.msra.mxu0 %v5723_v26  ;;  %v6269_v29 = vld [vmem:[#allocation2 + $0x5e4] sm:$0xf0]  ;;  %v8208_v14 = vld [vmem:[%s9263_s0 + $0xd8] sm:$0xff]  ;;  %v5683_v26 = vor.u32 %v6209_v51, %v5682_v61 }
 0x331   :  { %2072 = vst [vmem:[#allocation2 + $0x4e8] sm:$0xff] %v2014_v47  ;;  %v5923_v63 = vor.u32 %v6269_v29, %v5922_v59  ;;  %v8227_v47 = vld [vmem:[%s9263_s0 + $0x78] sm:$0xff]  ;;  %v2104_v29 = vld [vmem:[%s9263_s0 + $0x80] sm:$0xf] }
 0x332   :  { %2071 = vst [vmem:[#allocation2 + $0x4e0] sm:$0xff] %v2012_v19  ;;  %2233 = vrot.lane.b32.xlu1 %v2110_v15, %s6311_s15  ;;  %2231 = vrot.lane.b32.xlu0 %v8172_v54, %s6311_s15  ;;  %v1785_v19 = vld [vmem:[%s9263_s0 + $0xec] sm:$0xf] }
 0x333   :  { %4577 = vmatpush.bf16.msra.mxu3 %v5923_v63  ;;  %1858 = vrot.lane.b32.xlu2 %v7793_v42, %s6312_s4 }
 0x334   :  { %4507 = vmatpush.bf16.msra.mxu0 %v5715_v60  ;;  %v2190_v34 = vpop.permute.xlu1 %2189  ;;  %v2188_v12 = vpop.permute.xlu0 %2187 }
 0x335   :  { %v2280_v48 = vrot.slane %v2190_v34, 4  ;;  %v2279_v22 = vrot.slane %v2188_v12, 4  ;;  %v8182_v41 = vpop.permute.xlu2 %1888 }
 0x336   :  { %v1961_v34 = vrot.slane %v8182_v41, 4 }
 0x337   :  { %v2328_v0 = vsel %vm300_vm0, %v2279_v22, %v2280_v48  ;;  %v1958_v22 = vrot.slane %v8162_v4, 4 }
 0x338   :  { %v2329_v21 = vsel %vm2324_vm6, %v2188_v12, %v2328_v0  ;;  %4508 = vmatpush.bf16.msra.mxu0 %v5707_v20  ;;  %v6237_v42 = vld [vmem:[#allocation2 + $0x4e4] sm:$0xf0] }
 0x339   :  { %2398 = vst [vmem:[#allocation2 + $0x550] sm:$0xff] %v2329_v21  ;;  %v5794_v45 = vld [vmem:[#allocation2 + $0x4e0] sm:$0xf]  ;;  %v2106_v21 = vld [vmem:[%s9263_s0 + $0x8c] sm:$0xf] }
 0x33a   :  { %1862 = vrot.lane.b32.xlu1 %v7817_v13, %s6312_s4  ;;  %1860 = vrot.lane.b32.xlu0 %v1755_v53, %s6312_s4  ;;  %v5795_v31 = vor.u32 %v6237_v42, %v5794_v45  ;;  %v5691_v13 = vor.u32 %v6211_v7, %v5690_v52 }
 0x33b   :  { %1864 = vrot.lane.b32.xlu2 %v1757_v16, %s6312_s4 }
 0x33c   :  { %4509 = vmatpush.bf16.msra.mxu0 %v5699_v25  ;;  %4529 = vmatpush.bf16.msra.mxu1 %v5795_v31  ;;  %v2252_v56 = vpop.permute.xlu1 %2251  ;;  %v2194_v23 = vpop.permute.xlu0 %2193 }
 0x33d   :  { %v2311_v39 = vrot.slane %v2252_v56, 4  ;;  %v2282_v11 = vrot.slane %v2194_v23, 4  ;;  %v8198_v1 = vpop.permute.xlu2 %2183 }
 0x33f   :  { %v2360_v30 = vsel %vm300_vm0, %v2311_v39, %v2312_v3  ;;  %v2330_v38 = vsel %vm300_vm0, %v2281_v46, %v2282_v11 }
 0x340   :  { %v2361_v17 = vsel %vm2324_vm6, %v2252_v56, %v2360_v30  ;;  %v2331_v57 = vsel %vm2324_vm6, %v8126_v10, %v2330_v38  ;;  %4510 = vmatpush.bf16.msra.mxu0 %v5691_v13  ;;  %v5850_v63 = vld [vmem:[#allocation2 + $0x550] sm:$0xf]  ;;  %v1751_v56 = vld [vmem:[%s9263_s0 + $0x20] sm:$0xf]  ;;  %v2277_v38 = vrot.slane %v8198_v1, 4 }
 0x341   :  { %2414 = vst [vmem:[#allocation2 + $0x5d0] sm:$0xff] %v2361_v17 }
 0x342   :  { %2399 = vst [vmem:[#allocation2 + $0x558] sm:$0xff] %v2331_v57  ;;  %1916 = vrot.lane.b32.xlu1 %v1783_v2, %s6312_s4  ;;  %1914 = vrot.lane.b32.xlu0 %v8208_v14, %s6312_s4 }
 0x343   :  { %1918 = vrot.lane.b32.xlu2 %v8216_v24, %s6312_s4 }
 0x344   :  { %4511 = vmatpush.bf16.msra.mxu0 %v5683_v26  ;;  %v2258_v10 = vpop.permute.xlu1 %2257  ;;  %v2256_v35 = vpop.permute.xlu0 %2255  ;;  %v1778_v26 = vld [vmem:[%s9263_s0 + $0xc0] sm:$0xff] }
 0x345   :  { %v2314_v37 = vrot.slane %v2258_v10, 4  ;;  %v2313_v49 = vrot.slane %v2256_v35, 4  ;;  %v2246_v15 = vpop.permute.xlu2 %2245 }
 0x346   :  { %v2308_v11 = vrot.slane %v2246_v15, 4 }
 0x347   :  { %v2362_v28 = vsel %vm300_vm0, %v2313_v49, %v2314_v37  ;;  %v8286_v37 = vld [vmem:[%s9263_s0 + $0xcc] sm:$0xff] }
 0x348   :  { %v2363_v59 = vsel %vm2324_vm6, %v2256_v35, %v2362_v28  ;;  %v5914_v16 = vld [vmem:[#allocation2 + $0x5d0] sm:$0xf] }
 0x349   :  { %2415 = vst [vmem:[#allocation2 + $0x5d8] sm:$0xff] %v2363_v59  ;;  %v6251_v60 = vld [vmem:[#allocation2 + $0x554] sm:$0xf0] }
 0x34a   :  { %2219 = vrot.lane.b32.xlu1 %v8227_v47, %s6311_s15  ;;  %1920 = vrot.lane.b32.xlu0 %v1785_v19, %s6312_s4  ;;  %v5851_v9 = vor.u32 %v6251_v60, %v5850_v63  ;;  %v2100_v60 = vld [vmem:[%s9263_s0 + $0x68] sm:$0xf] }
 0x34b   :  { %2221 = vrot.lane.b32.xlu2 %v2104_v29, %s6311_s15  ;;  %v1781_v29 = vld [vmem:[%s9263_s0 + $0xd4] sm:$0xf] }
 0x34c   :  { %4554 = vmatpush.bf16.msra.mxu2 %v5851_v9  ;;  %v1887_v12 = vpop.permute.xlu1 %1886  ;;  %v1885_v48 = vpop.permute.xlu0 %1884 }
 0x34d   :  { %v1960_v5 = vrot.slane %v1887_v12, 4  ;;  %v1959_v20 = vrot.slane %v1885_v48, 4  ;;  %v8242_v0 = vpop.permute.xlu2 %1874 }
 0x34f   :  { %v2009_v53 = vsel %vm300_vm0, %v1960_v5, %v1961_v34  ;;  %v2007_v18 = vsel %vm300_vm0, %v1958_v22, %v1959_v20  ;;  %v1954_v20 = vrot.slane %v8242_v0, 4 }
 0x350   :  { %v2010_v41 = vsel %vm1987_vm7, %v1887_v12, %v2009_v53  ;;  %v2008_v42 = vsel %vm1987_vm7, %v8162_v4, %v2007_v18  ;;  %v6267_v32 = vld [vmem:[#allocation2 + $0x5d4] sm:$0xf0] }
 0x351   :  { %2070 = vst [vmem:[#allocation2 + $0x4d8] sm:$0xff] %v2010_v41  ;;  %v5915_v45 = vor.u32 %v6267_v32, %v5914_v16  ;;  %v2102_v16 = vld [vmem:[%s9263_s0 + $0x74] sm:$0xf] }
 0x352   :  { %2069 = vst [vmem:[#allocation2 + $0x4d0] sm:$0xff] %v2008_v42  ;;  %2225 = vrot.lane.b32.xlu1 %v2106_v21, %s6311_s15  ;;  %2223 = vrot.lane.b32.xlu0 %v7938_v62, %s6311_s15  ;;  %v1753_v62 = vld [vmem:[%s9263_s0 + $0x2c] sm:$0xf] }
 0x353   :  { %4578 = vmatpush.bf16.msra.mxu3 %v5915_v45  ;;  %1850 = vrot.lane.b32.xlu2 %v7888_v6, %s6312_s4 }
 0x354   :  { %v2182_v25 = vpop.permute.xlu1 %2181  ;;  %v2180_v31 = vpop.permute.xlu0 %2179 }
 0x355   :  { %v2276_v3 = vrot.slane %v2182_v25, 4  ;;  %v2275_v52 = vrot.slane %v2180_v31, 4  ;;  %v1881_v7 = vpop.permute.xlu2 %1880 }
 0x356   :  { %v1957_v48 = vrot.slane %v1881_v7, 4 }
 0x357   :  { %v2323_v4 = vsel %vm300_vm0, %v2275_v52, %v2276_v3 }
 0x358   :  { %v2325_v23 = vsel %vm2324_vm6, %v2180_v31, %v2323_v4  ;;  %v6235_v46 = vld [vmem:[#allocation2 + $0x4d4] sm:$0xf0] }
 0x359   :  { %2396 = vst [vmem:[#allocation2 + $0x540] sm:$0xff] %v2325_v23  ;;  %v5786_v6 = vld [vmem:[#allocation2 + $0x4d0] sm:$0xf] }
 0x35a   :  { %1854 = vrot.lane.b32.xlu1 %v7896_v58, %s6312_s4  ;;  %1852 = vrot.lane.b32.xlu0 %v1751_v56, %s6312_s4  ;;  %v5787_v39 = vor.u32 %v6235_v46, %v5786_v6  ;;  %v1779_v58 = vld [vmem:[%s9263_s0 + $0xc8] sm:$0xf] }
 0x35b   :  { %1856 = vrot.lane.b32.xlu2 %v1753_v62, %s6312_s4  ;;  %v1747_v46 = vld [vmem:[%s9263_s0 + $0x8] sm:$0xf] }
 0x35c   :  { %4530 = vmatpush.bf16.msra.mxu1 %v5787_v39  ;;  %v2244_v13 = vpop.permute.xlu1 %2243  ;;  %v2186_v30 = vpop.permute.xlu0 %2185 }
 0x35d   :  { %v2307_v2 = vrot.slane %v2244_v13, 4  ;;  %v2278_v51 = vrot.slane %v2186_v30, 4  ;;  %v8270_v17 = vpop.permute.xlu2 %1934 }
 0x35f   :  { %v2356_v57 = vsel %vm300_vm0, %v2307_v2, %v2308_v11  ;;  %v2326_v61 = vsel %vm300_vm0, %v2277_v38, %v2278_v51 }
 0x360   :  { %v2357_v10 = vsel %vm2324_vm6, %v2244_v13, %v2356_v57  ;;  %v2327_v35 = vsel %vm2324_vm6, %v8198_v1, %v2326_v61  ;;  %v5842_v9 = vld [vmem:[#allocation2 + $0x540] sm:$0xf]  ;;  %v1984_v13 = vrot.slane %v8270_v17, 4  ;;  %v6060_v61 = vld [vmem:[%s9264_s1 + $0xac] sm:$0xf0] }
 0x361   :  { %2412 = vst [vmem:[#allocation2 + $0x5c0] sm:$0xff] %v2357_v10 }
 0x362   :  { %2397 = vst [vmem:[#allocation2 + $0x548] sm:$0xff] %v2327_v35  ;;  %1908 = vrot.lane.b32.xlu1 %v1779_v58, %s6312_s4  ;;  %1906 = vrot.lane.b32.xlu0 %v1778_v26, %s6312_s4  ;;  %v2449_v35 = vld [vmem:[%s9263_s0 + $0xb0] sm:$0xf] }
 0x363   :  { %1910 = vrot.lane.b32.xlu2 %v8286_v37, %s6312_s4 }
 0x364   :  { %v2250_v49 = vpop.permute.xlu1 %2249  ;;  %v2248_v15 = vpop.permute.xlu0 %2247 }
 0x365   :  { %v2310_v28 = vrot.slane %v2250_v49, 4  ;;  %v2309_v19 = vrot.slane %v2248_v15, 4  ;;  %v8292_v59 = vpop.permute.xlu2 %2237  ;;  %v2448_v49 = vld [vmem:[%s9263_s0 + $0xa8] sm:$0xff] }
 0x366   :  { %v2304_v11 = vrot.slane %v8292_v59, 4  ;;  %v5058_v59 = vld [vmem:[%s9264_s1 + $0x70] sm:$0xf] }
 0x367   :  { %v2358_v1 = vsel %vm300_vm0, %v2309_v19, %v2310_v28  ;;  %v2450_v19 = vld [vmem:[%s9263_s0 + $0xb4] sm:$0xff] }
 0x368   :  { %v2359_v63 = vsel %vm2324_vm6, %v2248_v15, %v2358_v1  ;;  %v5906_v25 = vld [vmem:[#allocation2 + $0x5c0] sm:$0xf]  ;;  %v6059_v1 = vld [vmem:[%s9264_s1 + $0xa4] sm:$0xf0] }
 0x369   :  { %2413 = vst [vmem:[#allocation2 + $0x5c8] sm:$0xff] %v2359_v63  ;;  %v6249_v34 = vld [vmem:[#allocation2 + $0x544] sm:$0xf0] }
 0x36a   :  { %2211 = vrot.lane.b32.xlu1 %v8031_v40, %s6311_s15  ;;  %1912 = vrot.lane.b32.xlu0 %v1781_v29, %s6312_s4  ;;  %v5843_v12 = vor.u32 %v6249_v34, %v5842_v9 }
 0x36b   :  { %2213 = vrot.lane.b32.xlu2 %v2100_v60, %s6311_s15 }
 0x36c   :  { %4555 = vmatpush.bf16.msra.mxu2 %v5843_v12  ;;  %v1879_v22 = vpop.permute.xlu1 %1878  ;;  %v1877_v5 = vpop.permute.xlu0 %1876  ;;  %v6053_v12 = vld [vmem:[%s9264_s1 + $0x7c] sm:$0xf] }
 0x36d   :  { %v1956_v53 = vrot.slane %v1879_v22, 4  ;;  %v1955_v18 = vrot.slane %v1877_v5, 4  ;;  %v8307_v21 = vpop.permute.xlu2 %1866 }
 0x36f   :  { %v2005_v41 = vsel %vm300_vm0, %v1956_v53, %v1957_v48  ;;  %v2003_v42 = vsel %vm300_vm0, %v1954_v20, %v1955_v18  ;;  %v5068_v48 = vld [vmem:[%s9264_s1 + $0xb0] sm:$0xf0]  ;;  %v2451_v20 = vld [vmem:[%s9263_s0 + $0xbc] sm:$0xf]  ;;  %v2445_v18 = vld [vmem:[%s9263_s0 + $0x98] sm:$0xf] }
 0x370   :  { %v2006_v32 = vsel %vm1987_vm7, %v1879_v22, %v2005_v41  ;;  %v2004_v45 = vsel %vm1987_vm7, %v8242_v0, %v2003_v42  ;;  %v6265_v31 = vld [vmem:[#allocation2 + $0x5c4] sm:$0xf0]  ;;  %v8383_v22 = vor.u32 %v6053_v12, %v5068_v48 }
 0x371   :  { %2068 = vst [vmem:[#allocation2 + $0x4c8] sm:$0xff] %v2006_v32  ;;  %v5907_v3 = vor.u32 %v6265_v31, %v5906_v25 }
 0x372   :  { %2067 = vst [vmem:[#allocation2 + $0x4c0] sm:$0xff] %v2004_v45  ;;  %2217 = vrot.lane.b32.xlu1 %v2102_v16, %s6311_s15  ;;  %2215 = vrot.lane.b32.xlu0 %v8044_v44, %s6311_s15  ;;  %v1749_v44 = vld [vmem:[%s9263_s0 + $0x14] sm:$0xf]  ;;  %v1950_v45 = vrot.slane %v8307_v21, 4 }
 0x373   :  { %4579 = vmatpush.bf16.msra.mxu3 %v5907_v3  ;;  %1842 = vrot.lane.b32.xlu2 %v7971_v33, %s6312_s4 }
 0x374   :  { %v1933_v52 = vpop.permute.xlu1 %1932  ;;  %v1931_v7 = vpop.permute.xlu0 %1930  ;;  %4397 = vmatmul.bf16.gmra.mxu3 %v8383_v22 }
 0x375   :  { %v1983_v4 = vrot.slane %v1933_v52, 4  ;;  %v1982_v56 = vrot.slane %v1931_v7, 4  ;;  %v8322_v23 = vpop.permute.xlu2 %1872 }
 0x376   :  { %v1953_v32 = vrot.slane %v8322_v23, 4  ;;  %v5122_v23 = vld [vmem:[%s9264_s1 + $0xe8] sm:$0xf] }
 0x377   :  { %v2031_v0 = vsel %vm300_vm0, %v1982_v56, %v1983_v4  ;;  %v5060_v4 = vld [vmem:[%s9264_s1 + $0xa8] sm:$0xf0] }
 0x378   :  { %v2032_v62 = vsel %vm1987_vm7, %v1931_v7, %v2031_v0  ;;  %v6233_v6 = vld [vmem:[#allocation2 + $0x4c4] sm:$0xf0]  ;;  %v6074_v0 = vld [vmem:[%s9264_s1 + $0x11c] sm:$0xf0] }
 0x379   :  { %2081 = vst [vmem:[#allocation2 + $0x530] sm:$0xff] %v2032_v62  ;;  %v5778_v33 = vld [vmem:[#allocation2 + $0x4c0] sm:$0xf] }
 0x37a   :  { %1846 = vrot.lane.b32.xlu1 %v7979_v27, %s6312_s4  ;;  %1844 = vrot.lane.b32.xlu0 %v1747_v46, %s6312_s4  ;;  %v5779_v39 = vor.u32 %v6233_v6, %v5778_v33  ;;  %v5066_v27 = vld [vmem:[%s9264_s1 + $0x78] sm:$0xf]  ;;  %v2447_v6 = vld [vmem:[%s9263_s0 + $0xa4] sm:$0xf] }
 0x37b   :  { %1848 = vrot.lane.b32.xlu2 %v1749_v44, %s6312_s4  ;;  %v8346_v58 = vor.u32 %v6060_v61, %v5066_v27  ;;  %v8421_v44 = vor.u32 %v6074_v0, %v5122_v23  ;;  %v6047_v23 = vld [vmem:[%s9264_s1 + $0x44] sm:$0xf0] }
 0x37c   :  { %4531 = vmatpush.bf16.msra.mxu1 %v5779_v39  ;;  %v2236_v30 = vpop.permute.xlu1 %2235  ;;  %v1937_v38 = vpop.permute.xlu0 %1936 }
 0x37d   :  { %v2303_v2 = vrot.slane %v2236_v30, 4  ;;  %v1985_v51 = vrot.slane %v1937_v38, 4  ;;  %v8338_v57 = vpop.permute.xlu2 %1926  ;;  %4373 = vmatmul.bf16.gmra.mxu2 %v8346_v58  ;;  %v5114_v38 = vld [vmem:[%s9264_s1 + $0xe0] sm:$0xf] }
 0x37f   :  { %v2352_v26 = vsel %vm300_vm0, %v2303_v2, %v2304_v11  ;;  %v2033_v10 = vsel %vm300_vm0, %v1984_v13, %v1985_v51  ;;  %v6073_v2 = vld [vmem:[%s9264_s1 + $0x114] sm:$0xf0] }
 0x380   :  { %v2353_v15 = vsel %vm2324_vm6, %v2236_v30, %v2352_v26  ;;  %v2034_v28 = vsel %vm1987_vm7, %v8270_v17, %v2033_v10  ;;  %v8371_v17 = vor.u32 %v6059_v1, %v5058_v59  ;;  %v5834_v41 = vld [vmem:[#allocation2 + $0x530] sm:$0xf]  ;;  %v2443_v59 = vld [vmem:[%s9263_s0 + $0x8c] sm:$0xf] }
 0x381   :  { %2410 = vst [vmem:[#allocation2 + $0x5b0] sm:$0xff] %v2353_v15  ;;  %v2441_v15 = vld [vmem:[%s9263_s0 + $0x80] sm:$0xf] }
 0x382   :  { %2082 = vst [vmem:[#allocation2 + $0x538] sm:$0xff] %v2034_v28  ;;  %2574 = vrot.lane.b32.xlu1 %v2449_v35, %s6313_s26  ;;  %2572 = vrot.lane.b32.xlu0 %v2448_v49, %s6313_s26  ;;  %v6067_v35 = vld [vmem:[%s9264_s1 + $0xec] sm:$0xf] }
 0x383   :  { %2576 = vrot.lane.b32.xlu2 %v2450_v19, %s6313_s26  ;;  %4325 = vmatmul.bf16.gmra.mxu0 %v8371_v17 }
 0x384   :  { %v2242_v29 = vpop.permute.xlu1 %2241  ;;  %v2240_v63 = vpop.permute.xlu0 %2239 }
 0x385   :  { %v2306_v60 = vrot.slane %v2242_v29, 4  ;;  %v2305_v9 = vrot.slane %v2240_v63, 4  ;;  %v8375_v34 = vpop.permute.xlu2 %2229  ;;  %v6305_v29 = vld [vmem:[%s9263_s0 + $0x84] sm:$0xff] }
 0x387   :  { %v2354_v5 = vsel %vm300_vm0, %v2305_v9, %v2306_v60  ;;  %v2300_v60 = vrot.slane %v8375_v34, 4  ;;  %v1980_v9 = vrot.slane %v8338_v57, 4 }
 0x388   :  { %v2355_v53 = vsel %vm2324_vm6, %v2240_v63, %v2354_v5  ;;  %v5898_v11 = vld [vmem:[#allocation2 + $0x5b0] sm:$0xf] }
 0x389   :  { %2411 = vst [vmem:[#allocation2 + $0x5b8] sm:$0xff] %v2355_v53  ;;  %v6247_v42 = vld [vmem:[#allocation2 + $0x534] sm:$0xf0] }
 0x38a   :  { %2564 = vrot.lane.b32.xlu1 %v8147_v50, %s6313_s26  ;;  %2578 = vrot.lane.b32.xlu0 %v2451_v20, %s6313_s26  ;;  %v5835_v16 = vor.u32 %v6247_v42, %v5834_v41  ;;  %v6052_v50 = vld [vmem:[%s9264_s1 + $0x74] sm:$0xf]  ;;  %v5116_v41 = vld [vmem:[%s9264_s1 + $0x118] sm:$0xf0] }
 0x38b   :  { %2566 = vrot.lane.b32.xlu2 %v2445_v18, %s6313_s26  ;;  %v8408_v56 = vor.u32 %v6052_v50, %v5060_v4  ;;  %v6066_v18 = vld [vmem:[%s9264_s1 + $0xe4] sm:$0xf]  ;;  %v5026_v42 = vld [vmem:[%s9264_s1 + $0x18] sm:$0xf]  ;;  %v2438_v50 = vld [vmem:[%s9263_s0 + $0x6c] sm:$0xff] }
 0x38c   :  { %4556 = vmatpush.bf16.msra.mxu2 %v5835_v16  ;;  %v1871_v25 = vpop.permute.xlu1 %1870  ;;  %v1869_v31 = vpop.permute.xlu0 %1868  ;;  %v8477_v34 = vor.u32 %v6066_v18, %v5116_v41  ;;  %v6048_v16 = vld [vmem:[%s9264_s1 + $0x4c] sm:$0xf0] }
 0x38d   :  { %v1952_v3 = vrot.slane %v1871_v25, 4  ;;  %v1951_v52 = vrot.slane %v1869_v31, 4  ;;  %v8400_v7 = vpop.permute.xlu2 %1858  ;;  %4349 = vmatmul.bf16.gmra.mxu1 %v8408_v56  ;;  %4378 = vmatmul.bf16.gmra.mxu2 %v8421_v44  ;;  %v8490_v31 = vor.u32 %v6048_v16, %v5026_v42  ;;  %v5018_v4 = vld [vmem:[%s9264_s1 + $0x10] sm:$0xf] }
 0x38f   :  { %v2001_v46 = vsel %vm300_vm0, %v1952_v3, %v1953_v32  ;;  %v1999_v62 = vsel %vm300_vm0, %v1950_v45, %v1951_v52 }
 0x390   :  { %v2002_v33 = vsel %vm1987_vm7, %v1871_v25, %v2001_v46  ;;  %v2000_v39 = vsel %vm1987_vm7, %v8307_v21, %v1999_v62  ;;  %v6263_v13 = vld [vmem:[#allocation2 + $0x5b4] sm:$0xf0]  ;;  %v8437_v21 = vor.u32 %v6073_v2, %v5114_v38  ;;  %v2437_v25 = vld [vmem:[%s9263_s0 + $0x68] sm:$0xf]  ;;  %v2439_v38 = vld [vmem:[%s9263_s0 + $0x74] sm:$0xf] }
 0x391   :  { %2066 = vst [vmem:[#allocation2 + $0x4b8] sm:$0xff] %v2002_v33  ;;  %v5899_v30 = vor.u32 %v6263_v13, %v5898_v11 }
 0x392   :  { %2065 = vst [vmem:[#allocation2 + $0x4b0] sm:$0xff] %v2000_v39  ;;  %2570 = vrot.lane.b32.xlu1 %v2447_v6, %s6313_s26  ;;  %2568 = vrot.lane.b32.xlu0 %v8172_v54, %s6313_s26  ;;  %v5124_v54 = vld [vmem:[%s9264_s1 + $0x120] sm:$0xf0]  ;;  %v6041_v39 = vld [vmem:[%s9264_s1 + $0x1c] sm:$0xf] }
 0x393   :  { %4580 = vmatpush.bf16.msra.mxu3 %v5899_v30  ;;  %2556 = vrot.lane.b32.xlu2 %v8227_v47, %s6313_s26  ;;  %v8450_v49 = vor.u32 %v6067_v35, %v5124_v54  ;;  %v2432_v30 = vld [vmem:[%s9263_s0 + $0x48] sm:$0xff]  ;;  %v1946_v54 = vrot.slane %v8400_v7, 4 }
 0x394   :  { %v1925_v51 = vpop.permute.xlu1 %1924  ;;  %v1923_v27 = vpop.permute.xlu0 %1922  ;;  %4330 = vmatmul.bf16.gmra.mxu0 %v8437_v21 }
 0x395   :  { %v1979_v61 = vrot.slane %v1925_v51, 4  ;;  %v1978_v26 = vrot.slane %v1923_v27, 4  ;;  %v8442_v10 = vpop.permute.xlu2 %1864  ;;  %4402 = vmatmul.bf16.gmra.mxu3 %v8450_v49  ;;  %v2433_v51 = vld [vmem:[%s9263_s0 + $0x50] sm:$0xf] }
 0x396   :  { %v1949_v35 = vrot.slane %v8442_v10, 4 }
 0x397   :  { %v2027_v47 = vsel %vm300_vm0, %v1978_v26, %v1979_v61 }
 0x398   :  { %v2028_v28 = vsel %vm1987_vm7, %v1923_v27, %v2027_v47  ;;  %v6231_v19 = vld [vmem:[#allocation2 + $0x4b4] sm:$0xf0] }
 0x399   :  { %2079 = vst [vmem:[#allocation2 + $0x520] sm:$0xff] %v2028_v28  ;;  %v5770_v1 = vld [vmem:[#allocation2 + $0x4b0] sm:$0xf] }
 0x39a   :  { %2560 = vrot.lane.b32.xlu1 %v6305_v29, %s6313_s26  ;;  %2558 = vrot.lane.b32.xlu0 %v2441_v15, %s6313_s26  ;;  %v5771_v63 = vor.u32 %v6231_v19, %v5770_v1  ;;  %v6040_v1 = vld [vmem:[%s9264_s1 + $0x14] sm:$0xf]  ;;  %v5020_v29 = vld [vmem:[%s9264_s1 + $0x48] sm:$0xf0] }
 0x39b   :  { %2562 = vrot.lane.b32.xlu2 %v2443_v59, %s6313_s26  ;;  %v8548_v10 = vor.u32 %v6040_v1, %v5020_v29  ;;  %v5076_v1 = vld [vmem:[%s9264_s1 + $0xb8] sm:$0xf0]  ;;  %v5138_v29 = vld [vmem:[%s9264_s1 + $0xf8] sm:$0xf] }
 0x39c   :  { %4532 = vmatpush.bf16.msra.mxu1 %v5771_v63  ;;  %v2228_v12 = vpop.permute.xlu1 %2227  ;;  %v1929_v48 = vpop.permute.xlu0 %1928  ;;  %v5082_v63 = vld [vmem:[%s9264_s1 + $0x88] sm:$0xf] }
 0x39d   :  { %v2299_v5 = vrot.slane %v2228_v12, 4  ;;  %v1981_v20 = vrot.slane %v1929_v48, 4  ;;  %v8469_v53 = vpop.permute.xlu2 %1918  ;;  %4354 = vmatmul.bf16.gmra.mxu1 %v8477_v34  ;;  %4464 = vmatmul.bf16.vlgmr.msrb.gmra.mxu2 %v8490_v31  ;;  %v2435_v48 = vld [vmem:[%s9263_s0 + $0x5c] sm:$0xf] }
 0x39f   :  { %v2348_v32 = vsel %vm300_vm0, %v2299_v5, %v2300_v60  ;;  %v2029_v45 = vsel %vm300_vm0, %v1980_v9, %v1981_v20  ;;  %v6062_v60 = vld [vmem:[%s9264_s1 + $0xbc] sm:$0xf0]  ;;  %v2434_v5 = vld [vmem:[%s9263_s0 + $0x54] sm:$0xff] }
 0x3a0   :  { %v2349_v3 = vsel %vm2324_vm6, %v2228_v12, %v2348_v32  ;;  %v2030_v52 = vsel %vm1987_vm7, %v8338_v57, %v2029_v45  ;;  %v8509_v57 = vor.u32 %v6047_v23, %v5018_v4  ;;  %v5826_v27 = vld [vmem:[#allocation2 + $0x520] sm:$0xf]  ;;  %v8564_v20 = vor.u32 %v6062_v60, %v5082_v63  ;;  %v2464_v32 = vld [vmem:[%s9263_s0 + $0x108] sm:$0xff]  ;;  %v6076_v63 = vld [vmem:[%s9264_s1 + $0x12c] sm:$0xf0] }
 0x3a1   :  { %2408 = vst [vmem:[#allocation2 + $0x5a0] sm:$0xff] %v2349_v3 }
 0x3a2   :  { %2080 = vst [vmem:[#allocation2 + $0x528] sm:$0xff] %v2030_v52  ;;  %2550 = vrot.lane.b32.xlu1 %v2437_v25, %s6313_s26  ;;  %2548 = vrot.lane.b32.xlu0 %v8031_v40, %s6313_s26  ;;  %v5028_v40 = vld [vmem:[%s9264_s1 + $0x50] sm:$0xf0]  ;;  %v5074_v25 = vld [vmem:[%s9264_s1 + $0x80] sm:$0xf] }
 0x3a3   :  { %2552 = vrot.lane.b32.xlu2 %v2438_v50, %s6313_s26  ;;  %v8521_v11 = vor.u32 %v6041_v39, %v5028_v40  ;;  %9278 = vst [vmem:[#allocation4_spill] sm:$0xff] %v8564_v20  ;;  %v2466_v40 = vld [vmem:[%s9263_s0 + $0x114] sm:$0xff] }
 0x3a4   :  { %v2234_v0 = vpop.permute.xlu1 %2233  ;;  %v2232_v46 = vpop.permute.xlu0 %2231  ;;  %4416 = vmatmul.bf16.vlgmr.msrb.gmra.mxu0 %v8509_v57 }
 0x3a5   :  { %v2302_v62 = vrot.slane %v2234_v0, 4  ;;  %v2301_v6 = vrot.slane %v2232_v46, 4  ;;  %v8513_v33 = vpop.permute.xlu2 %2221  ;;  %9277 = vst [vmem:[#allocation3_spill] sm:$0xff] %v8521_v11  ;;  %4488 = vmatmul.bf16.vlgmr.msrb.gmra.mxu3 %v8521_v11 }
 0x3a7   :  { %v2350_v13 = vsel %vm300_vm0, %v2301_v6, %v2302_v62  ;;  %v5084_v62 = vld [vmem:[%s9264_s1 + $0xc0] sm:$0xf0] }
 0x3a8   :  { %v2351_v2 = vsel %vm2324_vm6, %v2232_v46, %v2350_v13  ;;  %v5890_v42 = vld [vmem:[#allocation2 + $0x5a0] sm:$0xf]  ;;  %v6055_v46 = vld [vmem:[%s9264_s1 + $0x8c] sm:$0xf]  ;;  %v2465_v13 = vld [vmem:[%s9263_s0 + $0x110] sm:$0xf] }
 0x3a9   :  { %2409 = vst [vmem:[#allocation2 + $0x5a8] sm:$0xff] %v2351_v2  ;;  %v6245_v61 = vld [vmem:[#allocation2 + $0x524] sm:$0xf0]  ;;  %v8594_v6 = vor.u32 %v6055_v46, %v5084_v62  ;;  %v2467_v2 = vld [vmem:[%s9263_s0 + $0x11c] sm:$0xf] }
 0x3aa   :  { %2540 = vrot.lane.b32.xlu1 %v2432_v30, %s6313_s26  ;;  %2554 = vrot.lane.b32.xlu0 %v2439_v38, %s6313_s26  ;;  %v5827_v26 = vor.u32 %v6245_v61, %v5826_v27  ;;  %v2296_v61 = vrot.slane %v8513_v33, 4 }
 0x3ab   :  { %2542 = vrot.lane.b32.xlu2 %v2433_v51, %s6313_s26  ;;  %9279 = vst [vmem:[#allocation5_spill] sm:$0xff] %v8594_v6 }
 0x3ac   :  { %4557 = vmatpush.bf16.msra.mxu2 %v5827_v26  ;;  %v1863_v47 = vpop.permute.xlu1 %1862  ;;  %v1861_v15 = vpop.permute.xlu0 %1860  ;;  %v1976_v26 = vrot.slane %v8469_v53, 4 }
 0x3ad   :  { %v1948_v28 = vrot.slane %v1863_v47, 4  ;;  %v1947_v19 = vrot.slane %v1861_v15, 4  ;;  %v8540_v59 = vpop.permute.xlu2 %1850  ;;  %4440 = vmatmul.bf16.vlgmr.msrb.gmra.mxu1 %v8548_v10  ;;  %4469 = vmatmul.bf16.gmra.mxu2 %v8564_v20  ;;  %v5716_v20 = vld [vmem:[#allocation2 + $0x448] sm:$0xf0] }
 0x3af   :  { %v1997_v9 = vsel %vm300_vm0, %v1948_v28, %v1949_v35  ;;  %v1995_v12 = vsel %vm300_vm0, %v1946_v54, %v1947_v19  ;;  %v6054_v19 = vld [vmem:[%s9264_s1 + $0x84] sm:$0xf] }
 0x3b0   :  { %v1998_v18 = vsel %vm1987_vm7, %v1863_v47, %v1997_v9  ;;  %v1996_v41 = vsel %vm1987_vm7, %v8400_v7, %v1995_v12  ;;  %v6261_v16 = vld [vmem:[#allocation2 + $0x5a4] sm:$0xf0]  ;;  %v6061_v7 = vld [vmem:[%s9264_s1 + $0xb4] sm:$0xf0]  ;;  %v8621_v33 = vor.u32 %v6054_v19, %v5076_v1  ;;  %v6068_v19 = vld [vmem:[%s9264_s1 + $0xf4] sm:$0xf] }
 0x3b1   :  { %2064 = vst [vmem:[#allocation2 + $0x4a8] sm:$0xff] %v1998_v18  ;;  %v5891_v45 = vor.u32 %v6261_v16, %v5890_v42  ;;  %v8582_v3 = vor.u32 %v6061_v7, %v5074_v25  ;;  %v2429_v12 = vld [vmem:[%s9263_s0 + $0x38] sm:$0xf]  ;;  %v2430_v42 = vld [vmem:[%s9263_s0 + $0x3c] sm:$0xff]  ;;  %v5130_v16 = vld [vmem:[%s9264_s1 + $0xf0] sm:$0xf] }
 0x3b2   :  { %2063 = vst [vmem:[#allocation2 + $0x4a0] sm:$0xff] %v1996_v41  ;;  %2546 = vrot.lane.b32.xlu1 %v2435_v48, %s6313_s26  ;;  %2544 = vrot.lane.b32.xlu0 %v2434_v5, %s6313_s26  ;;  %v2428_v48 = vld [vmem:[%s9263_s0 + $0x30] sm:$0xff]  ;;  %v8637_v5 = vor.u32 %v6076_v63, %v5138_v29  ;;  %v5132_v1 = vld [vmem:[%s9264_s1 + $0x128] sm:$0xf0] }
 0x3b3   :  { %4581 = vmatpush.bf16.msra.mxu3 %v5891_v45  ;;  %2604 = vrot.lane.b32.xlu2 %v2464_v32, %s6313_s26  ;;  %v6075_v32 = vld [vmem:[%s9264_s1 + $0x124] sm:$0xf0] }
 0x3b4   :  { %v1917_v52 = vpop.permute.xlu1 %1916  ;;  %v1915_v50 = vpop.permute.xlu0 %1914  ;;  %4421 = vmatmul.bf16.gmra.mxu0 %v8582_v3  ;;  %9280 = vst [vmem:[#allocation6_spill] sm:$0xff] %v8637_v5 }
 0x3b5   :  { %v1975_v4 = vrot.slane %v1917_v52, 4  ;;  %v1974_v23 = vrot.slane %v1915_v50, 4  ;;  %v8586_v0 = vpop.permute.xlu2 %1856  ;;  %4493 = vmatmul.bf16.gmra.mxu3 %v8594_v6 }
 0x3b7   :  { %v2023_v39 = vsel %vm300_vm0, %v1974_v23, %v1975_v4  ;;  %v6069_v4 = vld [vmem:[%s9264_s1 + $0xfc] sm:$0xf]  ;;  %v5140_v23 = vld [vmem:[%s9264_s1 + $0x130] sm:$0xf0] }
 0x3b8   :  { %v2024_v30 = vsel %vm1987_vm7, %v1915_v50, %v2023_v39  ;;  %v6229_v38 = vld [vmem:[#allocation2 + $0x4a4] sm:$0xf0]  ;;  %v8667_v46 = vor.u32 %v6069_v4, %v5140_v23  ;;  %v2460_v39 = vld [vmem:[%s9263_s0 + $0xf0] sm:$0xff] }
 0x3b9   :  { %2077 = vst [vmem:[#allocation2 + $0x510] sm:$0xff] %v2024_v30  ;;  %v5762_v51 = vld [vmem:[#allocation2 + $0x4a0] sm:$0xf]  ;;  %v2461_v30 = vld [vmem:[%s9263_s0 + $0xf8] sm:$0xf] }
 0x3ba   :  { %2608 = vrot.lane.b32.xlu1 %v2466_v40, %s6313_s26  ;;  %2606 = vrot.lane.b32.xlu0 %v2465_v13, %s6313_s26  ;;  %v5763_v27 = vor.u32 %v6229_v38, %v5762_v51  ;;  %9281 = vst [vmem:[#allocation7_spill] sm:$0xff] %v8667_v46  ;;  %v2431_v40 = vld [vmem:[%s9263_s0 + $0x44] sm:$0xf] }
 0x3bb   :  { %2610 = vrot.lane.b32.xlu2 %v2467_v2, %s6313_s26 }
 0x3bc   :  { %4533 = vmatpush.bf16.msra.mxu1 %v5763_v27  ;;  %v2220_v35 = vpop.permute.xlu1 %2219  ;;  %v1921_v54 = vpop.permute.xlu0 %1920  ;;  %v1945_v27 = vrot.slane %v8586_v0, 4  ;;  %v8694_v0 = vor.u32 %v6068_v19, %v5132_v1 }
 0x3bd   :  { %v2295_v47 = vrot.slane %v2220_v35, 4  ;;  %v1977_v15 = vrot.slane %v1921_v54, 4  ;;  %v8613_v28 = vpop.permute.xlu2 %1910  ;;  %4445 = vmatmul.bf16.gmra.mxu1 %v8621_v33  ;;  %4474 = vmatmul.bf16.gmra.mxu2 %v8637_v5 }
 0x3bf   :  { %v2344_v60 = vsel %vm300_vm0, %v2295_v47, %v2296_v61  ;;  %v2025_v9 = vsel %vm300_vm0, %v1976_v26, %v1977_v15  ;;  %v1942_v61 = vrot.slane %v8540_v59, 4 }
 0x3c0   :  { %v2345_v18 = vsel %vm2324_vm6, %v2220_v35, %v2344_v60  ;;  %v2026_v41 = vsel %vm1987_vm7, %v8469_v53, %v2025_v9  ;;  %v8655_v53 = vor.u32 %v6075_v32, %v5130_v16  ;;  %v5818_v38 = vld [vmem:[#allocation2 + $0x510] sm:$0xf]  ;;  %v2463_v60 = vld [vmem:[%s9263_s0 + $0x104] sm:$0xf]  ;;  %v2462_v9 = vld [vmem:[%s9263_s0 + $0xfc] sm:$0xff] }
 0x3c1   :  { %2406 = vst [vmem:[#allocation2 + $0x590] sm:$0xff] %v2345_v18  ;;  %v5034_v32 = vld [vmem:[%s9264_s1 + $0x20] sm:$0xf] }
 0x3c2   :  { %2078 = vst [vmem:[#allocation2 + $0x518] sm:$0xff] %v2026_v41  ;;  %2534 = vrot.lane.b32.xlu1 %v2429_v12, %s6313_s26  ;;  %2532 = vrot.lane.b32.xlu0 %v2428_v48, %s6313_s26 }
 0x3c3   :  { %2536 = vrot.lane.b32.xlu2 %v2430_v42, %s6313_s26  ;;  %v2424_v42 = vld [vmem:[%s9263_s0 + $0x18] sm:$0xff] }
 0x3c4   :  { %v2226_v45 = vpop.permute.xlu1 %2225  ;;  %v2224_v25 = vpop.permute.xlu0 %2223  ;;  %4426 = vmatmul.bf16.gmra.mxu0 %v8655_v53 }
 0x3c5   :  { %v2298_v7 = vrot.slane %v2226_v45, 4  ;;  %v2297_v52 = vrot.slane %v2224_v25, 4  ;;  %v8659_v50 = vpop.permute.xlu2 %2213  ;;  %4498 = vmatmul.bf16.gmra.mxu3 %v8667_v46  ;;  %v6049_v45 = vld [vmem:[%s9264_s1 + $0x54] sm:$0xf0] }
 0x3c7   :  { %v2346_v62 = vsel %vm300_vm0, %v2297_v52, %v2298_v7 }
 0x3c8   :  { %v2347_v13 = vsel %vm2324_vm6, %v2224_v25, %v2346_v62  ;;  %v5882_v18 = vld [vmem:[#allocation2 + $0x590] sm:$0xf] }
 0x3c9   :  { %2407 = vst [vmem:[#allocation2 + $0x598] sm:$0xff] %v2347_v13  ;;  %v6243_v2 = vld [vmem:[#allocation2 + $0x514] sm:$0xf0] }
 0x3ca   :  { %2596 = vrot.lane.b32.xlu1 %v2460_v39, %s6313_s26  ;;  %2538 = vrot.lane.b32.xlu0 %v2431_v40, %s6313_s26  ;;  %v5819_v51 = vor.u32 %v6243_v2, %v5818_v38  ;;  %v2426_v39 = vld [vmem:[%s9263_s0 + $0x24] sm:$0xff]  ;;  %v2425_v40 = vld [vmem:[%s9263_s0 + $0x20] sm:$0xf] }
 0x3cb   :  { %2598 = vrot.lane.b32.xlu2 %v2461_v30, %s6313_s26  ;;  %v2427_v38 = vld [vmem:[%s9263_s0 + $0x2c] sm:$0xf] }
 0x3cc   :  { %4558 = vmatpush.bf16.msra.mxu2 %v5819_v51  ;;  %v1855_v26 = vpop.permute.xlu1 %1854  ;;  %v1853_v35 = vpop.permute.xlu0 %1852 }
 0x3cd   :  { %v1944_v54 = vrot.slane %v1855_v26, 4  ;;  %v1943_v47 = vrot.slane %v1853_v35, 4  ;;  %v8686_v15 = vpop.permute.xlu2 %1842  ;;  %4450 = vmatmul.bf16.gmra.mxu1 %v8694_v0  ;;  %v1972_v35 = vrot.slane %v8613_v28, 4 }
 0x3cf   :  { %v1993_v29 = vsel %vm300_vm0, %v1944_v54, %v1945_v27  ;;  %v1991_v63 = vsel %vm300_vm0, %v1942_v61, %v1943_v47  ;;  %v2292_v27 = vrot.slane %v8659_v50, 4 }
 0x3d0   :  { %v1994_v12 = vsel %vm1987_vm7, %v1855_v26, %v1993_v29  ;;  %v1992_v48 = vsel %vm1987_vm7, %v8540_v59, %v1991_v63  ;;  %v6259_v41 = vld [vmem:[#allocation2 + $0x594] sm:$0xf0]  ;;  %v8719_v59 = vor.u32 %v6049_v45, %v5034_v32  ;;  %v2457_v63 = vld [vmem:[%s9263_s0 + $0xe0] sm:$0xf]  ;;  %v6094_v32 = vld [vmem:[#allocation2 + $0x74] sm:$0xf] }
 0x3d1   :  { %2062 = vst [vmem:[#allocation2 + $0x498] sm:$0xff] %v1994_v12  ;;  %v5883_v16 = vor.u32 %v6259_v41, %v5882_v18  ;;  %v6063_v12 = vld [vmem:[%s9264_s1 + $0xc4] sm:$0xf0]  ;;  %v5228_v45 = vld [vmem:[#allocation2 + $0x78] sm:$0xf0] }
 0x3d2   :  { %2061 = vst [vmem:[#allocation2 + $0x490] sm:$0xff] %v1992_v48  ;;  %2602 = vrot.lane.b32.xlu1 %v2463_v60, %s6313_s26  ;;  %2600 = vrot.lane.b32.xlu0 %v2462_v9, %s6313_s26  ;;  %v5090_v9 = vld [vmem:[%s9264_s1 + $0x90] sm:$0xf] }
 0x3d3   :  { %4582 = vmatpush.bf16.msra.mxu3 %v5883_v16  ;;  %2524 = vrot.lane.b32.xlu2 %v2424_v42, %s6313_s26  ;;  %v8760_v48 = vor.u32 %v6063_v12, %v5090_v9 }
 0x3d4   :  { %v1909_v25 = vpop.permute.xlu1 %1908  ;;  %v1907_v7 = vpop.permute.xlu0 %1906  ;;  %4512 = vmatmul.bf16.vlgmr.msra.gmra.mxu0 %v8719_v59 }
 0x3d5   :  { %v1971_v52 = vrot.slane %v1909_v25, 4  ;;  %v1970_v4 = vrot.slane %v1907_v7, 4  ;;  %v8723_v23 = vpop.permute.xlu2 %1848 }
 0x3d7   :  { %v2019_v62 = vsel %vm300_vm0, %v1970_v4, %v1971_v52  ;;  %v5042_v52 = vld [vmem:[%s9264_s1 + $0x28] sm:$0xf]  ;;  %v6050_v4 = vld [vmem:[%s9264_s1 + $0x5c] sm:$0xf0] }
 0x3d8   :  { %v2020_v13 = vsel %vm1987_vm7, %v1907_v7, %v2019_v62  ;;  %v6227_v30 = vld [vmem:[#allocation2 + $0x494] sm:$0xf0]  ;;  %v2421_v62 = vld [vmem:[%s9263_s0 + $0x8] sm:$0xf] }
 0x3d9   :  { %2075 = vst [vmem:[#allocation2 + $0x500] sm:$0xff] %v2020_v13  ;;  %v5754_v2 = vld [vmem:[#allocation2 + $0x490] sm:$0xf]  ;;  %v5231_v13 = vor.u32 %v6094_v32, %v5228_v45 }
 0x3da   :  { %2528 = vrot.lane.b32.xlu1 %v2426_v39, %s6313_s26  ;;  %2526 = vrot.lane.b32.xlu0 %v2425_v40, %s6313_s26  ;;  %v5755_v51 = vor.u32 %v6227_v30, %v5754_v2  ;;  %v5220_v2 = vld [vmem:[#allocation2 + $0x68] sm:$0xf0] }
 0x3db   :  { %2530 = vrot.lane.b32.xlu2 %v2427_v38, %s6313_s26  ;;  %v6092_v38 = vld [vmem:[#allocation2 + $0x64] sm:$0xf] }
 0x3dc   :  { %4534 = vmatpush.bf16.msra.mxu1 %v5755_v51  ;;  %v2212_v61 = vpop.permute.xlu1 %2211  ;;  %v1913_v26 = vpop.permute.xlu0 %1912  ;;  %v1941_v51 = vrot.slane %v8723_v23, 4  ;;  %v2423_v23 = vld [vmem:[%s9263_s0 + $0x14] sm:$0xf] }
 0x3dd   :  { %v2291_v54 = vrot.slane %v2212_v61, 4  ;;  %v1973_v47 = vrot.slane %v1913_v26, 4  ;;  %v8741_v19 = vpop.permute.xlu2 %2576 }
 0x3df   :  { %v2340_v1 = vsel %vm300_vm0, %v2291_v54, %v2292_v27  ;;  %v2021_v29 = vsel %vm300_vm0, %v1972_v35, %v1973_v47  ;;  %v8787_v27 = vor.u32 %v6050_v4, %v5042_v52  ;;  %v1938_v35 = vrot.slane %v8686_v15, 4  ;;  %v6088_v4 = vld [vmem:[#allocation2 + $0x44] sm:$0xf] }
 0x3e0   :  { %v2341_v50 = vsel %vm2324_vm6, %v2212_v61, %v2340_v1  ;;  %v2022_v60 = vsel %vm1987_vm7, %v8613_v28, %v2021_v29  ;;  %v5810_v39 = vld [vmem:[#allocation2 + $0x500] sm:$0xf]  ;;  %v5223_v1 = vor.u32 %v6092_v38, %v5220_v2  ;;  %v5292_v29 = vld [vmem:[#allocation2 + $0xf8] sm:$0xf0]  ;;  %v5284_v38 = vld [vmem:[#allocation2 + $0xe8] sm:$0xf0] }
 0x3e1   :  { %2404 = vst [vmem:[#allocation2 + $0x580] sm:$0xff] %v2341_v50  ;;  %v6090_v50 = vld [vmem:[#allocation2 + $0x54] sm:$0xf]  ;;  %v6077_v2 = vld [vmem:[%s9264_s1 + $0x134] sm:$0xf0] }
 0x3e2   :  { %2076 = vst [vmem:[#allocation2 + $0x508] sm:$0xff] %v2022_v60  ;;  %2590 = vrot.lane.b32.xlu1 %v2457_v63, %s6313_s26  ;;  %2588 = vrot.lane.b32.xlu0 %v8208_v14, %s6313_s26  ;;  %v2420_v14 = vld [vmem:[%s9263_s0] sm:$0xff]  ;;  %v5212_v60 = vld [vmem:[#allocation2 + $0x58] sm:$0xf0] }
 0x3e3   :  { %2592 = vrot.lane.b32.xlu2 %v8216_v24, %s6313_s26  ;;  %v2459_v24 = vld [vmem:[%s9263_s0 + $0xec] sm:$0xf]  ;;  %9282 = vst [vmem:[#allocation8_spill] sm:$0xff] %v8787_v27  ;;  %v5215_v52 = vor.u32 %v6090_v50, %v5212_v60  ;;  %v2453_v50 = vld [vmem:[%s9263_s0 + $0xc8] sm:$0xf] }
 0x3e4   :  { %v2218_v28 = vpop.permute.xlu1 %2217  ;;  %v2216_v18 = vpop.permute.xlu0 %2215  ;;  %4517 = vmatmul.bf16.gmra.mxu0 %v8760_v48  ;;  %v6086_v60 = vld [vmem:[#allocation2 + $0x34] sm:$0xf] }
 0x3e5   :  { %v2294_v41 = vrot.slane %v2218_v28, 4  ;;  %v2293_v42 = vrot.slane %v2216_v18, 4  ;;  %v8765_v16 = vpop.permute.xlu2 %2566  ;;  %v2422_v28 = vld [vmem:[%s9263_s0 + $0xc] sm:$0xff] }
 0x3e7   :  { %v2342_v25 = vsel %vm300_vm0, %v2293_v42, %v2294_v41  ;;  %v5044_v41 = vld [vmem:[%s9264_s1 + $0x60] sm:$0xf0] }
 0x3e8   :  { %v2343_v7 = vsel %vm2324_vm6, %v2216_v18, %v2342_v25  ;;  %v6043_v18 = vld [vmem:[%s9264_s1 + $0x2c] sm:$0xf]  ;;  %v5874_v45 = vld [vmem:[#allocation2 + $0x580] sm:$0xf] }
 0x3e9   :  { %2405 = vst [vmem:[#allocation2 + $0x588] sm:$0xff] %v2343_v7  ;;  %v6241_v40 = vld [vmem:[#allocation2 + $0x504] sm:$0xf0]  ;;  %v6110_v7 = vld [vmem:[#allocation2 + $0xf4] sm:$0xf] }
 0x3ea   :  { %2516 = vrot.lane.b32.xlu1 %v2420_v14, %s6313_s26  ;;  %2594 = vrot.lane.b32.xlu0 %v2459_v24, %s6313_s26  ;;  %v5811_v30 = vor.u32 %v6241_v40, %v5810_v39  ;;  %v2452_v14 = vld [vmem:[%s9263_s0 + $0xc0] sm:$0xff]  ;;  %v5295_v39 = vor.u32 %v6110_v7, %v5292_v29  ;;  %v5204_v40 = vld [vmem:[#allocation2 + $0x48] sm:$0xf0] }
 0x3eb   :  { %2518 = vrot.lane.b32.xlu2 %v2421_v62, %s6313_s26  ;;  %v4321_v62 = vpop.f32.mrf.mxu0 }
 0x3ec   :  { %4559 = vmatpush.bf16.msra.mxu2 %v5811_v30  ;;  %v1847_v61 = vpop.permute.xlu1 %1846  ;;  %v1845_v26 = vpop.permute.xlu0 %1844  ;;  %v6108_v30 = vld [vmem:[#allocation2 + $0xe4] sm:$0xf] }
 0x3ed   :  { %v1940_v54 = vrot.slane %v1847_v61, 4  ;;  %v1939_v47 = vrot.slane %v1845_v26, 4  ;;  %v8791_v63 = vpop.permute.xlu2 %2556 }
 0x3ef   :  { %v1989_v9 = vsel %vm300_vm0, %v1940_v54, %v1941_v51  ;;  %v1986_v12 = vsel %vm300_vm0, %v1938_v35, %v1939_v47  ;;  %4560 = vmatmul.bf16.vlgmr.msra.gmra.mxu2 %v8787_v27  ;;  %v5207_v47 = vor.u32 %v6088_v4, %v5204_v40  ;;  %v5188_v40 = vld [vmem:[#allocation2 + $0x28] sm:$0xf0] }
 0x3f0   :  { %4648 = vmatpush.bf16.msrb.mxu2 %v5231_v13  ;;  %v1990_v42 = vsel %vm1987_vm7, %v1847_v61, %v1989_v9  ;;  %v1988_v32 = vsel %vm1987_vm7, %v8686_v15, %v1986_v12  ;;  %v6257_v25 = vld [vmem:[#allocation2 + $0x584] sm:$0xf0]  ;;  %v8816_v15 = vor.u32 %v6043_v18, %v5044_v41  ;;  %v5146_v13 = vld [vmem:[%s9264_s1 + $0x100] sm:$0xf]  ;;  %v5196_v9 = vld [vmem:[#allocation2 + $0x38] sm:$0xf0] }
 0x3f1   :  { %2060 = vst [vmem:[#allocation2 + $0x488] sm:$0xff] %v1990_v42  ;;  %v5875_v24 = vor.u32 %v6257_v25, %v5874_v45  ;;  %v8825_v26 = vor.u32 %v6077_v2, %v5146_v13  ;;  %v5036_v18 = vld [vmem:[%s9264_s1 + $0x58] sm:$0xf0]  ;;  %v5098_v41 = vld [vmem:[%s9264_s1 + $0x98] sm:$0xf]  ;;  %v5199_v7 = vor.u32 %v6086_v60, %v5196_v9  ;;  %v4345_v13 = vpop.f32.mrf.mxu1 }
 0x3f2   :  { %2059 = vst [vmem:[#allocation2 + $0x480] sm:$0xff] %v1988_v32  ;;  %2522 = vrot.lane.b32.xlu1 %v2423_v23, %s6313_s26  ;;  %2520 = vrot.lane.b32.xlu0 %v2422_v28, %s6313_s26  ;;  %v5287_v23 = vor.u32 %v6108_v30, %v5284_v38  ;;  %v6042_v28 = vld [vmem:[%s9264_s1 + $0x24] sm:$0xf]  ;;  %v6064_v45 = vld [vmem:[%s9264_s1 + $0xcc] sm:$0xf0]  ;;  %v2637_v38 = vrot.slane %v8765_v16, 4 }
 0x3f3   :  { %9283 = vst [vmem:[#allocation9_spill] sm:$0xff] %v8816_v15  ;;  %4583 = vmatpush.bf16.msra.mxu3 %v5875_v24  ;;  %2580 = vrot.lane.b32.xlu2 %v2452_v14, %s6313_s26  ;;  %v2455_v25 = vld [vmem:[%s9263_s0 + $0xd4] sm:$0xf]  ;;  %v8854_v30 = vpop.f32.mrf.mxu0  ;;  %v8857_v2 = vor.u32 %v6042_v28, %v5036_v18  ;;  %v5260_v9 = vld [vmem:[#allocation2 + $0xb8] sm:$0xf0] }
 0x3f4   :  { %4649 = vmatpush.bf16.msrb.mxu2 %v5223_v1  ;;  %v2575_v51 = vpop.permute.xlu1 %2574  ;;  %v2573_v61 = vpop.permute.xlu0 %2572  ;;  %v5276_v1 = vld [vmem:[#allocation2 + $0xd8] sm:$0xf0]  ;;  %4522 = vmatmul.bf16.gmra.mxu0 %v8825_v26  ;;  %v6106_v24 = vld [vmem:[#allocation2 + $0xd4] sm:$0xf] }
 0x3f5   :  { %v2641_v35 = vrot.slane %v2575_v51, 4  ;;  %v2640_v54 = vrot.slane %v2573_v61, 4  ;;  %v8827_v29 = vpop.permute.xlu2 %2562  ;;  %v5279_v4 = vor.u32 %v6106_v24, %v5276_v1  ;;  %v8859_v51 = vor.u32 %v6064_v45, %v5098_v41  ;;  %v6102_v16 = vld [vmem:[#allocation2 + $0xb4] sm:$0xf]  ;;  %v5180_v41 = vld [vmem:[#allocation2 + $0x18] sm:$0xf0] }
 0x3f6   :  { %4584 = vmatmul.bf16.vlgmr.msra.gmra.mxu3 %v8816_v15  ;;  %v6082_v18 = vld [vmem:[#allocation2 + $0x14] sm:$0xf]  ;;  %v5263_v24 = vor.u32 %v6102_v16, %v5260_v9 }
 0x3f7   :  { %4672 = vmatpush.bf16.msrb.mxu3 %v5295_v39  ;;  %v2689_v12 = vsel %vm300_vm0, %v2640_v54, %v2641_v35  ;;  %v6084_v39 = vld [vmem:[#allocation2 + $0x24] sm:$0xf]  ;;  %9284 = vst [vmem:[#allocation10_spill] sm:$0xff] %v8859_v51  ;;  %v5268_v35 = vld [vmem:[#allocation2 + $0xc8] sm:$0xf0]  ;;  %v2642_v54 = vrot.slane %v8741_v19, 4 }
 0x3f8   :  { %4650 = vmatpush.bf16.msrb.mxu2 %v5215_v52  ;;  %v2690_v42 = vsel %vm2661_vm8, %v2573_v61, %v2689_v12  ;;  %v6225_v32 = vld [vmem:[#allocation2 + $0x484] sm:$0xf0]  ;;  %v6104_v61 = vld [vmem:[#allocation2 + $0xc4] sm:$0xf]  ;;  %v5191_v60 = vor.u32 %v6084_v39, %v5188_v40  ;;  %v5100_v45 = vld [vmem:[%s9264_s1 + $0xd0] sm:$0xf0] }
 0x3f9   :  { %2747 = vst [vmem:[#allocation2 + $0x670] sm:$0xff] %v2690_v42  ;;  %v5746_v14 = vld [vmem:[#allocation2 + $0x480] sm:$0xf]  ;;  %v5271_v28 = vor.u32 %v6104_v61, %v5268_v35  ;;  %v5252_v39 = vld [vmem:[#allocation2 + $0xa8] sm:$0xf0]  ;;  %v4393_v35 = vpop.f32.mrf.mxu3 }
 0x3fa   :  { %2584 = vrot.lane.b32.xlu1 %v8286_v37, %s6313_s26  ;;  %2582 = vrot.lane.b32.xlu0 %v2453_v50, %s6313_s26  ;;  %v5747_v52 = vor.u32 %v6225_v32, %v5746_v14  ;;  %v4346_v37 = vadd.f32 %v4345_v13, %v4321_v62  ;;  %v6057_v32 = vld [vmem:[%s9264_s1 + $0x9c] sm:$0xf]  ;;  %v6080_v13 = vld [vmem:[#allocation2 + $0x4] sm:$0xf] }
 0x3fb   :  { %4673 = vmatpush.bf16.msrb.mxu3 %v5287_v23  ;;  %2586 = vrot.lane.b32.xlu2 %v2455_v25, %s6313_s26  ;;  %v8878_v40 = vor.u32 %v6057_v32, %v5100_v45  ;;  %v6156_v32 = vld [vmem:[#allocation2 + $0x264] sm:$0xf]  ;;  %v5476_v45 = vld [vmem:[#allocation2 + $0x268] sm:$0xf0] }
 0x3fc   :  { %4651 = vmatpush.bf16.msrb.mxu2 %v5207_v47  ;;  %4535 = vmatpush.bf16.msra.mxu1 %v5747_v52  ;;  %v2565_v47 = vpop.permute.xlu1 %2564  ;;  %v2579_v1 = vpop.permute.xlu0 %2578  ;;  %v5183_v52 = vor.u32 %v6082_v18, %v5180_v41  ;;  %v6098_v18 = vld [vmem:[#allocation2 + $0x94] sm:$0xf]  ;;  %v5244_v41 = vld [vmem:[#allocation2 + $0x98] sm:$0xf0] }
 0x3fd   :  { %v2636_v23 = vrot.slane %v2565_v47, 4  ;;  %v2643_v50 = vrot.slane %v2579_v1, 4  ;;  %v8863_v12 = vpop.permute.xlu2 %2552  ;;  %9285 = vst [vmem:[#allocation11_spill] sm:$0xff] %v8878_v40 }
 0x3ff   :  { %4674 = vmatpush.bf16.msrb.mxu3 %v5279_v4  ;;  %v2685_v42 = vsel %vm300_vm0, %v2636_v23, %v2637_v38  ;;  %v2691_v62 = vsel %vm300_vm0, %v2642_v54, %v2643_v50  ;;  %4536 = vmatmul.bf16.vlgmr.msra.gmra.mxu1 %v8857_v2  ;;  %v6100_v4 = vld [vmem:[#allocation2 + $0xa4] sm:$0xf]  ;;  %v5172_v38 = vld [vmem:[#allocation2 + $0x8] sm:$0xf0]  ;;  %v8880_v54 = vpop.f32.mrf.mxu1  ;;  %v5484_v50 = vld [vmem:[#allocation2 + $0x278] sm:$0xf0] }
 0x400   :  { %4652 = vmatpush.bf16.msrb.mxu2 %v5199_v7  ;;  %v2686_v25 = vsel %vm2661_vm8, %v2565_v47, %v2685_v42  ;;  %v2692_v14 = vsel %vm2661_vm8, %v8741_v19, %v2691_v62  ;;  %v4369_v7 = vpop.f32.mrf.mxu2  ;;  %v4326_v47 = vpop.f32.mrf.mxu0  ;;  %v5255_v23 = vor.u32 %v6100_v4, %v5252_v39  ;;  %v5247_v4 = vor.u32 %v6098_v18, %v5244_v41  ;;  %v6078_v39 = vld [vmem:[%s9264_s1 + $0x13c] sm:$0xf0] }
 0x401   :  { %4565 = vmatmul.bf16.gmra.mxu2 %v8859_v51  ;;  %2745 = vst [vmem:[#allocation2 + $0x660] sm:$0xff] %v2686_v25  ;;  %v4370_v61 = vadd.f32 %v4369_v7, %v4346_v37  ;;  %v6158_v37 = vld [vmem:[#allocation2 + $0x274] sm:$0xf]  ;;  %v5468_v51 = vld [vmem:[#allocation2 + $0x258] sm:$0xf0] }
 0x402   :  { %2748 = vst [vmem:[#allocation2 + $0x678] sm:$0xff] %v2692_v14  ;;  %v6056_v25 = vld [vmem:[%s9264_s1 + $0x94] sm:$0xf]  ;;  %v5092_v14 = vld [vmem:[%s9264_s1 + $0xc8] sm:$0xf0] }
 0x403   :  { %4675 = vmatpush.bf16.msrb.mxu3 %v5271_v28  ;;  %v8882_v16 = vadd.f32 %v4393_v35, %v4370_v61  ;;  %v5175_v28 = vor.u32 %v6080_v13, %v5172_v38  ;;  %v6096_v13 = vld [vmem:[#allocation2 + $0x84] sm:$0xf]  ;;  %v5236_v38 = vld [vmem:[#allocation2 + $0x88] sm:$0xf0]  ;;  %v5994_v35 = vld [vmem:[#allocation2 + $0x670] sm:$0xf] }
 0x404   :  { %4653 = vmatpush.bf16.msrb.mxu2 %v5191_v60  ;;  %v2571_v1 = vpop.permute.xlu1 %2570  ;;  %v2569_v19 = vpop.permute.xlu0 %2568 }
 0x405   :  { %v2639_v60 = vrot.slane %v2571_v1, 4  ;;  %v2638_v9 = vrot.slane %v2569_v19, 4  ;;  %v8884_v42 = vpop.permute.xlu2 %2542 }
 0x406   :  { %4589 = vmatmul.bf16.gmra.mxu3 %v8878_v40  ;;  %v5548_v40 = vld [vmem:[#allocation2 + $0x2f8] sm:$0xf0] }
 0x407   :  { %4676 = vmatpush.bf16.msrb.mxu3 %v5263_v24  ;;  %v2687_v62 = vsel %vm300_vm0, %v2638_v9, %v2639_v60  ;;  %v5154_v24 = vld [vmem:[%s9264_s1 + $0x108] sm:$0xf]  ;;  %v8903_v9 = vpop.f32.mrf.mxu3 }
 0x408   :  { %4654 = vmatpush.bf16.msrb.mxu2 %v5183_v52  ;;  %v2688_v7 = vsel %vm2661_vm8, %v2569_v19, %v2687_v62  ;;  %v5487_v52 = vor.u32 %v6158_v37, %v5484_v50  ;;  %v8901_v61 = vpop.f32.mrf.mxu2  ;;  %v2635_v19 = vrot.slane %v8827_v29, 4  ;;  %v8908_v50 = vor.u32 %v6078_v39, %v5154_v24  ;;  %v8910_v18 = vpop.f32.mrf.mxu0 }
 0x409   :  { %2746 = vst [vmem:[#allocation2 + $0x668] sm:$0xff] %v2688_v7  ;;  %v6287_v1 = vld [vmem:[#allocation2 + $0x674] sm:$0xf0]  ;;  %v5479_v62 = vor.u32 %v6156_v32, %v5476_v45  ;;  %v6174_v7 = vld [vmem:[#allocation2 + $0x2f4] sm:$0xf] }
 0x40a   :  { %v5995_v60 = vor.u32 %v6287_v1, %v5994_v35  ;;  %9286 = vst [vmem:[#allocation12_spill] sm:$0xff] %v8908_v50  ;;  %v6154_v32 = vld [vmem:[#allocation2 + $0x254] sm:$0xf]  ;;  %v5551_v45 = vor.u32 %v6174_v7, %v5548_v40  ;;  %v5460_v7 = vld [vmem:[#allocation2 + $0x248] sm:$0xf0] }
 0x40b   :  { %4677 = vmatpush.bf16.msrb.mxu3 %v5255_v23  ;;  %v8906_v23 = vor.u32 %v6056_v25, %v5092_v14  ;;  %v4350_v25 = vpop.f32.mrf.mxu1 }
 0x40c   :  { %4655 = vmatpush.bf16.msrb.mxu2 %v5175_v28  ;;  %4600 = vmatpush.bf16.msrb.mxu0 %v5995_v60  ;;  %v2561_v41 = vpop.permute.xlu1 %2560  ;;  %v2559_v37 = vpop.permute.xlu0 %2558  ;;  %v5239_v28 = vor.u32 %v6096_v13, %v5236_v38  ;;  %v4351_v14 = vadd.f32 %v4350_v25, %v4326_v47  ;;  %v5156_v13 = vld [vmem:[%s9264_s1 + $0x140] sm:$0xf0]  ;;  %v5471_v60 = vor.u32 %v6154_v32, %v5468_v51 }
 0x40d   :  { %v2634_v35 = vrot.slane %v2561_v41, 4  ;;  %v2633_v1 = vrot.slane %v2559_v37, 4  ;;  %v8913_v29 = vpop.permute.xlu2 %2604 }
 0x40f   :  { %4678 = vmatpush.bf16.msrb.mxu3 %v5247_v4  ;;  %v2683_v24 = vsel %vm300_vm0, %v2634_v35, %v2635_v19  ;;  %4541 = vmatmul.bf16.gmra.mxu1 %v8906_v23  ;;  %v6071_v4 = vld [vmem:[%s9264_s1 + $0x10c] sm:$0xf]  ;;  %v5986_v19 = vld [vmem:[#allocation2 + $0x660] sm:$0xf]  ;;  %v6172_v35 = vld [vmem:[#allocation2 + $0x2e4] sm:$0xf] }
 0x410   :  { %4744 = vmatpush.bf16.msra.mxu2 %v5487_v52  ;;  %v2632_v52 = vrot.slane %v8791_v63, 4  ;;  %v2684_v47 = vsel %vm2661_vm8, %v2561_v41, %v2683_v24  ;;  %v6285_v37 = vld [vmem:[#allocation2 + $0x664] sm:$0xf0]  ;;  %v4398_v41 = vpop.f32.mrf.mxu3  ;;  %v6152_v24 = vld [vmem:[#allocation2 + $0x244] sm:$0xf] }
 0x411   :  { %4570 = vmatmul.bf16.gmra.mxu2 %v8908_v50  ;;  %2744 = vst [vmem:[#allocation2 + $0x658] sm:$0xff] %v2684_v47  ;;  %v5987_v40 = vor.u32 %v6285_v37, %v5986_v19  ;;  %v5463_v32 = vor.u32 %v6152_v24, %v5460_v7  ;;  %v5532_v50 = vld [vmem:[#allocation2 + $0x2d8] sm:$0xf0]  ;;  %v6168_v37 = vld [vmem:[#allocation2 + $0x2c4] sm:$0xf] }
 0x412   :  { %v2681_v39 = vsel %vm300_vm0, %v2632_v52, %v2633_v1  ;;  %v4374_v52 = vpop.f32.mrf.mxu2  ;;  %v8928_v1 = vor.u32 %v6071_v4, %v5156_v13 }
 0x413   :  { %v2682_v38 = vsel %vm2661_vm8, %v8791_v63, %v2681_v39  ;;  %4679 = vmatpush.bf16.msrb.mxu3 %v5239_v28  ;;  %v4375_v25 = vadd.f32 %v4374_v52, %v4351_v14  ;;  %4601 = vmatpush.bf16.msrb.mxu0 %v5987_v40  ;;  %v4331_v28 = vpop.f32.mrf.mxu0  ;;  %v8932_v19 = vpop.f32.mrf.mxu1  ;;  %v6170_v14 = vld [vmem:[#allocation2 + $0x2d4] sm:$0xf] }
 0x414   :  { %4745 = vmatpush.bf16.msra.mxu2 %v5479_v62  ;;  %v5540_v62 = vld [vmem:[#allocation2 + $0x2e8] sm:$0xf0]  ;;  %2743 = vst [vmem:[#allocation2 + $0x650] sm:$0xff] %v2682_v38  ;;  %v2551_v51 = vpop.permute.xlu1 %2550  ;;  %v2549_v39 = vpop.permute.xlu0 %2548  ;;  %v6150_v38 = vld [vmem:[#allocation2 + $0x234] sm:$0xf]  ;;  %v5535_v13 = vor.u32 %v6170_v14, %v5532_v50 }
 0x415   :  { %9287 = vst [vmem:[#allocation13_spill] sm:$0xff] %v8928_v1  ;;  %v5543_v63 = vor.u32 %v6172_v35, %v5540_v62  ;;  %v8930_v15 = vadd.f32 %v4398_v41, %v4375_v25  ;;  %v2628_v47 = vrot.slane %v2549_v39, 4  ;;  %v5524_v62 = vld [vmem:[#allocation2 + $0x2c8] sm:$0xf0]  ;;  %v8936_v52 = vpop.permute.xlu2 %2610  ;;  %v6070_v25 = vld [vmem:[%s9264_s1 + $0x104] sm:$0xf] }
 0x416   :  { %4594 = vmatmul.bf16.gmra.mxu3 %v8928_v1  ;;  %v5148_v41 = vld [vmem:[%s9264_s1 + $0x138] sm:$0xf0] }
 0x417   :  { %4768 = vmatpush.bf16.msra.mxu3 %v5551_v45  ;;  %v2629_v45 = vrot.slane %v2551_v51, 4 }
 0x418   :  { %4746 = vmatpush.bf16.msra.mxu2 %v5471_v60  ;;  %v5452_v60 = vld [vmem:[#allocation2 + $0x238] sm:$0xf0]  ;;  %v6283_v35 = vld [vmem:[#allocation2 + $0x654] sm:$0xf0] }
 0x419   :  { %v2677_v4 = vsel %vm300_vm0, %v2628_v47, %v2629_v45  ;;  %v5455_v7 = vor.u32 %v6150_v38, %v5452_v60  ;;  %v6148_v45 = vld [vmem:[#allocation2 + $0x224] sm:$0xf]  ;;  %v5527_v47 = vor.u32 %v6168_v37, %v5524_v62  ;;  %v8950_v38 = vor.u32 %v6070_v25, %v5148_v41  ;;  %v6146_v25 = vld [vmem:[#allocation2 + $0x214] sm:$0xf] }
 0x41a   :  { %v2678_v40 = vsel %vm2661_vm8, %v2549_v39, %v2677_v4  ;;  %v8945_v24 = vpop.f32.mrf.mxu2  ;;  %v2625_v39 = vrot.slane %v8884_v42, 4  ;;  %v6166_v42 = vld [vmem:[#allocation2 + $0x2b4] sm:$0xf] }
 0x41b   :  { %4769 = vmatpush.bf16.msra.mxu3 %v5543_v63  ;;  %2741 = vst [vmem:[#allocation2 + $0x640] sm:$0xff] %v2678_v40  ;;  %v5978_v50 = vld [vmem:[#allocation2 + $0x650] sm:$0xf]  ;;  %v5444_v63 = vld [vmem:[#allocation2 + $0x228] sm:$0xf0]  ;;  %v8952_v60 = vpop.f32.mrf.mxu0 }
 0x41c   :  { %4747 = vmatpush.bf16.msra.mxu2 %v5463_v32  ;;  %v5979_v51 = vor.u32 %v6283_v35, %v5978_v50  ;;  %v8947_v32 = vpop.f32.mrf.mxu3  ;;  %v2541_v14 = vpop.permute.xlu1 %2540  ;;  %v5447_v1 = vor.u32 %v6148_v45, %v5444_v63  ;;  %v5516_v40 = vld [vmem:[#allocation2 + $0x2b8] sm:$0xf0] }
 0x41d   :  { %v2555_v4 = vpop.permute.xlu0 %2554  ;;  %v2624_v27 = vrot.slane %v2541_v14, 4  ;;  %v5436_v35 = vld [vmem:[#allocation2 + $0x218] sm:$0xf0]  ;;  %v4355_v50 = vpop.f32.mrf.mxu1  ;;  %v5519_v41 = vor.u32 %v6166_v42, %v5516_v40 }
 0x41e   :  { %4602 = vmatpush.bf16.msrb.mxu0 %v5979_v51  ;;  %v4356_v46 = vadd.f32 %v4355_v50, %v4331_v28  ;;  %v5439_v45 = vor.u32 %v6146_v25, %v5436_v35  ;;  %v6144_v28 = vld [vmem:[#allocation2 + $0x204] sm:$0xf]  ;;  %v6222_v35 = vld [vmem:[#allocation2 + $0x474] sm:$0xf] }
 0x41f   :  { %4770 = vmatpush.bf16.msra.mxu3 %v5535_v13  ;;  %v2630_v13 = vrot.slane %v8863_v12, 4  ;;  %v2673_v37 = vsel %vm300_vm0, %v2624_v27, %v2625_v39  ;;  %4546 = vmatmul.bf16.gmra.mxu1 %v8950_v38  ;;  %v5428_v27 = vld [vmem:[#allocation2 + $0x208] sm:$0xf0]  ;;  %v8962_v39 = vpop.permute.xlu2 %2536 }
 0x420   :  { %4748 = vmatpush.bf16.msra.mxu2 %v5455_v7  ;;  %v2631_v7 = vrot.slane %v2555_v4, 4  ;;  %v2674_v63 = vsel %vm2661_vm8, %v2541_v14, %v2673_v37  ;;  %v6164_v4 = vld [vmem:[#allocation2 + $0x2a4] sm:$0xf]  ;;  %v6162_v37 = vld [vmem:[#allocation2 + $0x294] sm:$0xf] }
 0x421   :  { %4656 = vmatmul.bf16.vlgmr.msrb.gmra.mxu2 %v7990_v36  ;;  %2739 = vst [vmem:[#allocation2 + $0x630] sm:$0xff] %v2674_v63  ;;  %v5740_v36 = vld [vmem:[#allocation2 + $0x478] sm:$0xf0] }
 0x422   :  { %v2679_v62 = vsel %vm300_vm0, %v2630_v13, %v2631_v7  ;;  %v5743_v5 = vor.u32 %v6222_v35, %v5740_v36 }
 0x423   :  { %4771 = vmatpush.bf16.msra.mxu3 %v5527_v47  ;;  %v2680_v51 = vsel %vm2661_vm8, %v8863_v12, %v2679_v62  ;;  %v5508_v47 = vld [vmem:[#allocation2 + $0x2a8] sm:$0xf0]  ;;  %v4417_v14 = vpop.f32.mrf.mxu0  ;;  %v5431_v12 = vor.u32 %v6144_v28, %v5428_v27  ;;  %v5500_v62 = vld [vmem:[#allocation2 + $0x298] sm:$0xf0]  ;;  %v6220_v28 = vld [vmem:[#allocation2 + $0x464] sm:$0xf] }
 0x424   :  { %4749 = vmatpush.bf16.msra.mxu2 %v5447_v1  ;;  %v4379_v1 = vpop.f32.mrf.mxu2  ;;  %2742 = vst [vmem:[#allocation2 + $0x648] sm:$0xff] %v2680_v51  ;;  %v4403_v40 = vpop.f32.mrf.mxu3  ;;  %v5511_v7 = vor.u32 %v6164_v4, %v5508_v47  ;;  %v5503_v47 = vor.u32 %v6162_v37, %v5500_v62  ;;  %v5492_v27 = vld [vmem:[#allocation2 + $0x288] sm:$0xf0]  ;;  %v5804_v4 = vld [vmem:[#allocation2 + $0x4f8] sm:$0xf0] }
 0x425   :  { %v4380_v13 = vadd.f32 %v4379_v1, %v4356_v46  ;;  %v2547_v50 = vpop.permute.xlu1 %2546  ;;  %v2545_v42 = vpop.permute.xlu0 %2544  ;;  %v5732_v46 = vld [vmem:[#allocation2 + $0x468] sm:$0xf0]  ;;  %v5724_v37 = vld [vmem:[#allocation2 + $0x458] sm:$0xf0]  ;;  %v6238_v62 = vld [vmem:[#allocation2 + $0x4f4] sm:$0xf] }
 0x426   :  { %v2626_v63 = vrot.slane %v2545_v42, 4  ;;  %v8966_v51 = vpop.f32.mrf.mxu1  ;;  %4680 = vmatmul.bf16.vlgmr.msrb.gmra.mxu3 %v8063_v43  ;;  %v5735_v36 = vor.u32 %v6220_v28, %v5732_v46 }
 0x427   :  { %4772 = vmatpush.bf16.msra.mxu3 %v5519_v41  ;;  %v8964_v25 = vadd.f32 %v4403_v40, %v4380_v13  ;;  %v2627_v41 = vrot.slane %v2547_v50, 4  ;;  %v5970_v40 = vld [vmem:[#allocation2 + $0x640] sm:$0xf]  ;;  %v4418_v50 = vadd.f32 %v4417_v14, %v8882_v16  ;;  %v5796_v16 = vld [vmem:[#allocation2 + $0x4e8] sm:$0xf0]  ;;  %v2656_v14 = vrot.slane %v8913_v29, 4 }
 0x428   :  { %4750 = vmatpush.bf16.msra.mxu2 %v5439_v45 }
 0x429   :  { %v2675_v45 = vsel %vm300_vm0, %v2626_v63, %v2627_v41  ;;  %v8977_v41 = vpop.permute.xlu2 %2598 }
 0x42a   :  { %v2676_v1 = vsel %vm2661_vm8, %v2545_v42, %v2675_v45 }
 0x42b   :  { %4773 = vmatpush.bf16.msra.mxu3 %v5511_v7  ;;  %2740 = vst [vmem:[#allocation2 + $0x638] sm:$0xff] %v2676_v1  ;;  %v6281_v7 = vld [vmem:[#allocation2 + $0x644] sm:$0xf0]  ;;  %v8979_v63 = vpop.f32.mrf.mxu0  ;;  %v5807_v1 = vor.u32 %v6238_v62, %v5804_v4 }
 0x42c   :  { %4751 = vmatpush.bf16.msra.mxu2 %v5431_v12  ;;  %v8971_v13 = vpop.f32.mrf.mxu2  ;;  %v5971_v43 = vor.u32 %v6281_v7, %v5970_v40  ;;  %v6160_v12 = vld [vmem:[#allocation2 + $0x284] sm:$0xf]  ;;  %v8974_v35 = vpop.f32.mrf.mxu3 }
 0x42d   :  { %v5495_v42 = vor.u32 %v6160_v12, %v5492_v27  ;;  %v2609_v46 = vpop.permute.xlu1 %2608  ;;  %v2607_v45 = vpop.permute.xlu0 %2606 }
 0x42e   :  { %4603 = vmatpush.bf16.msrb.mxu0 %v5971_v43  ;;  %v2658_v28 = vrot.slane %v2609_v46, 4  ;;  %v2657_v40 = vrot.slane %v2607_v45, 4  ;;  %v6216_v43 = vld [vmem:[#allocation2 + $0x444] sm:$0xf]  ;;  %v5962_v45 = vld [vmem:[#allocation2 + $0x630] sm:$0xf] }
 0x42f   :  { %4774 = vmatpush.bf16.msra.mxu3 %v5503_v47  ;;  %v6218_v47 = vld [vmem:[#allocation2 + $0x454] sm:$0xf] }
 0x430   :  { %4840 = vmatpush.bf16.msrb.mxu2 %v5743_v5  ;;  %v2659_v5 = vrot.slane %v8936_v52, 4  ;;  %v4441_v52 = vpop.f32.mrf.mxu1  ;;  %v5727_v27 = vor.u32 %v6218_v47, %v5724_v37  ;;  %v2705_v6 = vsel %vm300_vm0, %v2656_v14, %v2657_v40  ;;  %v6234_v47 = vld [vmem:[#allocation2 + $0x4d4] sm:$0xf] }
 0x431   :  { %v4442_v7 = vadd.f32 %v4441_v52, %v4418_v50  ;;  %4661 = vmatmul.bf16.gmra.mxu2 %v8371_v17  ;;  %v2706_v62 = vsel %vm2661_vm8, %v8913_v29, %v2705_v6  ;;  %v6214_v52 = vld [vmem:[#allocation2 + $0x434] sm:$0xf] }
 0x432   :  { %v2707_v12 = vsel %vm300_vm0, %v2658_v28, %v2659_v5  ;;  %v6279_v11 = vld [vmem:[#allocation2 + $0x634] sm:$0xf0]  ;;  %2755 = vst [vmem:[#allocation2 + $0x6b0] sm:$0xff] %v2706_v62  ;;  %v5719_v5 = vor.u32 %v6216_v43, %v5716_v20  ;;  %v5708_v28 = vld [vmem:[#allocation2 + $0x438] sm:$0xf0] }
 0x433   :  { %4775 = vmatpush.bf16.msra.mxu3 %v5495_v42  ;;  %v2708_v4 = vsel %vm2661_vm8, %v2609_v46, %v2707_v12  ;;  %v5963_v50 = vor.u32 %v6279_v11, %v5962_v45  ;;  %v4422_v46 = vpop.f32.mrf.mxu0  ;;  %v8990_v11 = vpop.permute.xlu2 %2524  ;;  %v6232_v12 = vld [vmem:[#allocation2 + $0x4c4] sm:$0xf]  ;;  %v5780_v43 = vld [vmem:[#allocation2 + $0x4c8] sm:$0xf0] }
 0x434   :  { %4841 = vmatpush.bf16.msrb.mxu2 %v5735_v36  ;;  %v6236_v36 = vld [vmem:[#allocation2 + $0x4e4] sm:$0xf]  ;;  %v4465_v37 = vpop.f32.mrf.mxu2  ;;  %2756 = vst [vmem:[#allocation2 + $0x6b8] sm:$0xff] %v2708_v4  ;;  %v4489_v14 = vpop.f32.mrf.mxu3  ;;  %v5700_v62 = vld [vmem:[#allocation2 + $0x428] sm:$0xf0] }
 0x435   :  { %v5799_v42 = vor.u32 %v6236_v36, %v5796_v16  ;;  %v4466_v17 = vadd.f32 %v4465_v37, %v4442_v7  ;;  %4604 = vmatpush.bf16.msrb.mxu0 %v5963_v50  ;;  %v2535_v40 = vpop.permute.xlu1 %2534  ;;  %v2533_v6 = vpop.permute.xlu0 %2532  ;;  %v5711_v7 = vor.u32 %v6214_v52, %v5708_v28  ;;  %v6212_v50 = vld [vmem:[#allocation2 + $0x424] sm:$0xf]  ;;  %v5772_v28 = vld [vmem:[#allocation2 + $0x4b8] sm:$0xf0] }
 0x436   :  { %v2621_v16 = vrot.slane %v2535_v40, 4  ;;  %v2620_v36 = vrot.slane %v2533_v6, 4  ;;  %4685 = vmatmul.bf16.gmra.mxu3 %v8408_v56  ;;  %v5703_v56 = vor.u32 %v6212_v50, %v5700_v62  ;;  %v6228_v62 = vld [vmem:[#allocation2 + $0x4a4] sm:$0xf] }
 0x437   :  { %4864 = vmatpush.bf16.msrb.mxu3 %v5807_v1  ;;  %v5788_v1 = vld [vmem:[#allocation2 + $0x4d8] sm:$0xf0]  ;;  %v8988_v29 = vadd.f32 %v4489_v14, %v4466_v17  ;;  %v6230_v14 = vld [vmem:[#allocation2 + $0x4b4] sm:$0xf] }
 0x438   :  { %4842 = vmatpush.bf16.msrb.mxu2 %v5727_v27  ;;  %v5791_v27 = vor.u32 %v6234_v47, %v5788_v1  ;;  %v8992_v20 = vpop.f32.mrf.mxu1  ;;  %v2669_v4 = vsel %vm300_vm0, %v2620_v36, %v2621_v16  ;;  %v4423_v1 = vadd.f32 %v4422_v46, %v8930_v15  ;;  %v2653_v16 = vrot.slane %v8977_v41, 4  ;;  %v5692_v36 = vld [vmem:[#allocation2 + $0x418] sm:$0xf0] }
 0x439   :  { %v6026_v47 = vld [vmem:[#allocation2 + $0x6b0] sm:$0xf]  ;;  %v5775_v15 = vor.u32 %v6230_v14, %v5772_v28 }
 0x43b   :  { %4865 = vmatpush.bf16.msrb.mxu3 %v5799_v42  ;;  %v2670_v42 = vsel %vm2661_vm8, %v2533_v6, %v2669_v4  ;;  %v6295_v45 = vld [vmem:[#allocation2 + $0x6b4] sm:$0xf0]  ;;  %v6210_v6 = vld [vmem:[#allocation2 + $0x414] sm:$0xf]  ;;  %v9004_v50 = vpop.f32.mrf.mxu0 }
 0x43c   :  { %4843 = vmatpush.bf16.msrb.mxu2 %v5719_v5  ;;  %v8997_v37 = vpop.f32.mrf.mxu2  ;;  %2737 = vst [vmem:[#allocation2 + $0x620] sm:$0xff] %v2670_v42  ;;  %v5783_v5 = vor.u32 %v6232_v12, %v5780_v43  ;;  %v6027_v17 = vor.u32 %v6295_v45, %v6026_v47  ;;  %v9000_v40 = vpop.f32.mrf.mxu3  ;;  %v5695_v4 = vor.u32 %v6210_v6, %v5692_v36  ;;  %v5764_v42 = vld [vmem:[#allocation2 + $0x4a8] sm:$0xf0] }
 0x43d   :  { %v2597_v52 = vpop.permute.xlu1 %2596  ;;  %v5684_v47 = vld [vmem:[#allocation2 + $0x408] sm:$0xf0]  ;;  %v5767_v6 = vor.u32 %v6228_v62, %v5764_v42  ;;  %v6224_v62 = vld [vmem:[#allocation2 + $0x484] sm:$0xf] }
 0x43e   :  { %4628 = vmatpush.bf16.msrb.mxu1 %v6027_v17  ;;  %v2652_v12 = vrot.slane %v2597_v52, 4  ;;  %v5748_v42 = vld [vmem:[#allocation2 + $0x488] sm:$0xf0] }
 0x43f   :  { %4866 = vmatpush.bf16.msrb.mxu3 %v5791_v27  ;;  %v2539_v27 = vpop.permute.xlu0 %2538 }
 0x440   :  { %4844 = vmatpush.bf16.msrb.mxu2 %v5711_v7  ;;  %v2622_v7 = vrot.slane %v8962_v39, 4  ;;  %v2623_v43 = vrot.slane %v2539_v27, 4  ;;  %v4446_v46 = vpop.f32.mrf.mxu1  ;;  %v2701_v41 = vsel %vm300_vm0, %v2652_v12, %v2653_v16  ;;  %v6226_v16 = vld [vmem:[#allocation2 + $0x494] sm:$0xf]  ;;  %v5756_v27 = vld [vmem:[#allocation2 + $0x498] sm:$0xf0] }
 0x441   :  { %v4447_v45 = vadd.f32 %v4446_v46, %v4423_v1  ;;  %4666 = vmatmul.bf16.gmra.mxu2 %v8437_v21  ;;  %v2702_v17 = vsel %vm2661_vm8, %v2597_v52, %v2701_v41  ;;  %v6208_v1 = vld [vmem:[#allocation2 + $0x404] sm:$0xf] }
 0x442   :  { %2753 = vst [vmem:[#allocation2 + $0x6a0] sm:$0xff] %v2702_v17  ;;  %v5687_v36 = vor.u32 %v6208_v1, %v5684_v47  ;;  %v5751_v17 = vor.u32 %v6224_v62, %v5748_v42 }
 0x443   :  { %4867 = vmatpush.bf16.msrb.mxu3 %v5783_v5  ;;  %v2671_v5 = vsel %vm300_vm0, %v2622_v7, %v2623_v43  ;;  %v4427_v47 = vpop.f32.mrf.mxu0 }
 0x444   :  { %4845 = vmatpush.bf16.msrb.mxu2 %v5703_v56  ;;  %v2531_v56 = vpop.permute.xlu2 %2530  ;;  %v2672_v14 = vsel %vm2661_vm8, %v8962_v39, %v2671_v5  ;;  %v4470_v28 = vpop.f32.mrf.mxu2  ;;  %v5759_v39 = vor.u32 %v6226_v16, %v5756_v27  ;;  %v5996_v27 = vld [vmem:[#allocation2 + $0x678] sm:$0xf0] }
 0x445   :  { %2738 = vst [vmem:[#allocation2 + $0x628] sm:$0xff] %v2672_v14  ;;  %v4471_v7 = vadd.f32 %v4470_v28, %v4447_v45  ;;  %v4494_v12 = vpop.f32.mrf.mxu3  ;;  %v2603_v21 = vpop.permute.xlu1 %2602  ;;  %v5954_v14 = vld [vmem:[#allocation2 + $0x620] sm:$0xf]  ;;  %v2619_v16 = vrot.slane %v2531_v56, 4 }
 0x446   :  { %v2655_v52 = vrot.slane %v2603_v21, 4  ;;  %4690 = vmatmul.bf16.gmra.mxu3 %v8477_v34  ;;  %v2616_v21 = vrot.slane %v8990_v11, 4 }
 0x447   :  { %4868 = vmatpush.bf16.msrb.mxu3 %v5775_v15  ;;  %v2601_v43 = vpop.permute.xlu0 %2600  ;;  %v9012_v15 = vadd.f32 %v4494_v12, %v4471_v7 }
 0x448   :  { %4846 = vmatpush.bf16.msrb.mxu2 %v5695_v4  ;;  %v2654_v46 = vrot.slane %v2601_v43, 4  ;;  %v9014_v4 = vpop.f32.mrf.mxu1 }
 0x44a   :  { %v2703_v41 = vsel %vm300_vm0, %v2654_v46, %v2655_v52  ;;  %v6286_v46 = vld [vmem:[#allocation2 + $0x674] sm:$0xf] }
 0x44b   :  { %4869 = vmatpush.bf16.msrb.mxu3 %v5767_v6  ;;  %v2704_v45 = vsel %vm2661_vm8, %v2601_v43, %v2703_v41  ;;  %v4428_v6 = vadd.f32 %v4427_v47, %v8964_v25  ;;  %v5999_v62 = vor.u32 %v6286_v46, %v5996_v27 }
 0x44c   :  { %4847 = vmatpush.bf16.msrb.mxu2 %v5687_v36  ;;  %v9019_v5 = vpop.f32.mrf.mxu2  ;;  %2754 = vst [vmem:[#allocation2 + $0x6a8] sm:$0xff] %v2704_v45  ;;  %v6277_v28 = vld [vmem:[#allocation2 + $0x624] sm:$0xf0]  ;;  %v9021_v1 = vpop.permute.xlu2 %2592  ;;  %v5988_v45 = vld [vmem:[#allocation2 + $0x668] sm:$0xf0] }
 0x44d   :  { %v5955_v36 = vor.u32 %v6277_v28, %v5954_v14  ;;  %v9024_v34 = vpop.f32.mrf.mxu3  ;;  %v2529_v7 = vpop.permute.xlu1 %2528  ;;  %v6284_v28 = vld [vmem:[#allocation2 + $0x664] sm:$0xf] }
 0x44e   :  { %v2618_v43 = vrot.slane %v2529_v7, 4 }
 0x44f   :  { %4870 = vmatpush.bf16.msrb.mxu3 %v5759_v39  ;;  %4605 = vmatpush.bf16.msrb.mxu0 %v5955_v36  ;;  %v2527_v12 = vpop.permute.xlu0 %2526 }
 0x450   :  { %v2617_v52 = vrot.slane %v2527_v12, 4  ;;  %v4451_v39 = vpop.f32.mrf.mxu1  ;;  %v2667_v41 = vsel %vm300_vm0, %v2618_v43, %v2619_v16  ;;  %v6294_v16 = vld [vmem:[#allocation2 + $0x6b4] sm:$0xf]  ;;  %v6028_v12 = vld [vmem:[#allocation2 + $0x6b8] sm:$0xf0] }
 0x451   :  { %v4452_v42 = vadd.f32 %v4451_v39, %v4428_v6  ;;  %4752 = vmatmul.bf16.vlgmr.msra.gmra.mxu2 %v8509_v57  ;;  %v2668_v56 = vsel %vm2661_vm8, %v2529_v7, %v2667_v41  ;;  %v5991_v6 = vor.u32 %v6284_v28, %v5988_v45  ;;  %v6282_v57 = vld [vmem:[#allocation2 + $0x654] sm:$0xf]  ;;  %v5980_v43 = vld [vmem:[#allocation2 + $0x658] sm:$0xf0] }
 0x452   :  { %v2665_v25 = vsel %vm300_vm0, %v2616_v21, %v2617_v52  ;;  %4936 = vmatpush.bf16.msra.mxu2 %v5999_v62  ;;  %2736 = vst [vmem:[#allocation2 + $0x618] sm:$0xff] %v2668_v56  ;;  %v5983_v56 = vor.u32 %v6282_v57, %v5980_v43  ;;  %v2650_v43 = vrot.slane %v9021_v1, 4 }
 0x453   :  { %4871 = vmatpush.bf16.msrb.mxu3 %v5751_v17  ;;  %v2666_v47 = vsel %vm2661_vm8, %v8990_v11, %v2665_v25  ;;  %v6018_v17 = vld [vmem:[#allocation2 + $0x6a0] sm:$0xf]  ;;  %v6293_v14 = vld [vmem:[#allocation2 + $0x6a4] sm:$0xf0]  ;;  %v6031_v25 = vor.u32 %v6294_v16, %v6028_v12  ;;  %v6020_v45 = vld [vmem:[#allocation2 + $0x6a8] sm:$0xf0] }
 0x454   :  { %v6019_v36 = vor.u32 %v6293_v14, %v6018_v17  ;;  %v4475_v27 = vpop.f32.mrf.mxu2  ;;  %2735 = vst [vmem:[#allocation2 + $0x610] sm:$0xff] %v2666_v47  ;;  %v2519_v52 = vpop.permute.xlu2 %2518  ;;  %v6292_v14 = vld [vmem:[#allocation2 + $0x6a4] sm:$0xf] }
 0x455   :  { %v4476_v21 = vadd.f32 %v4475_v27, %v4452_v42  ;;  %v4499_v7 = vpop.f32.mrf.mxu3  ;;  %v2591_v46 = vpop.permute.xlu1 %2590  ;;  %v5972_v42 = vld [vmem:[#allocation2 + $0x648] sm:$0xf0]  ;;  %v6023_v27 = vor.u32 %v6292_v14, %v6020_v45  ;;  %v2613_v16 = vrot.slane %v2519_v52, 4 }
 0x456   :  { %4629 = vmatpush.bf16.msrb.mxu1 %v6019_v36  ;;  %4937 = vmatpush.bf16.msra.mxu2 %v5991_v6  ;;  %v2649_v62 = vrot.slane %v2591_v46, 4  ;;  %v6280_v36 = vld [vmem:[#allocation2 + $0x644] sm:$0xf] }
 0x457   :  { %v2589_v11 = vpop.permute.xlu0 %2588  ;;  %v9033_v39 = vadd.f32 %v4499_v7, %v4476_v21  ;;  %4776 = vmatmul.bf16.vlgmr.msra.gmra.mxu3 %v8548_v10  ;;  %v5975_v21 = vor.u32 %v6280_v36, %v5972_v42  ;;  %v5964_v10 = vld [vmem:[#allocation2 + $0x638] sm:$0xf0] }
 0x458   :  { %v2648_v41 = vrot.slane %v2589_v11, 4  ;;  %4964 = vmatpush.bf16.msra.mxu3 %v6031_v25 }
 0x459   :  { %v6275_v28 = vld [vmem:[#allocation2 + $0x614] sm:$0xf0]  ;;  %v5948_v36 = vld [vmem:[#allocation2 + $0x618] sm:$0xf0] }
 0x45a   :  { %v2697_v47 = vsel %vm300_vm0, %v2648_v41, %v2649_v62  ;;  %4938 = vmatpush.bf16.msra.mxu2 %v5983_v56  ;;  %v6278_v62 = vld [vmem:[#allocation2 + $0x634] sm:$0xf] }
 0x45b   :  { %v2698_v17 = vsel %vm2661_vm8, %v2589_v11, %v2697_v47  ;;  %v5946_v6 = vld [vmem:[#allocation2 + $0x610] sm:$0xf]  ;;  %v5967_v41 = vor.u32 %v6278_v62, %v5964_v10  ;;  %v5956_v47 = vld [vmem:[#allocation2 + $0x628] sm:$0xf0] }
 0x45c   :  { %2751 = vst [vmem:[#allocation2 + $0x690] sm:$0xff] %v2698_v17  ;;  %v5947_v7 = vor.u32 %v6275_v28, %v5946_v6  ;;  %4965 = vmatpush.bf16.msra.mxu3 %v6023_v27  ;;  %v2581_v25 = vpop.permute.xlu2 %2580  ;;  %v6276_v17 = vld [vmem:[#allocation2 + $0x624] sm:$0xf]  ;;  %v6274_v28 = vld [vmem:[#allocation2 + $0x614] sm:$0xf]  ;;  %v9045_v27 = vpop.f32.mrf.mxu0 }
 0x45d   :  { %v2517_v12 = vpop.permute.xlu1 %2516  ;;  %v5959_v14 = vor.u32 %v6276_v17, %v5956_v47 }
 0x45e   :  { %4939 = vmatpush.bf16.msra.mxu2 %v5975_v21  ;;  %4606 = vmatpush.bf16.msrb.mxu0 %v5947_v7  ;;  %v2612_v46 = vrot.slane %v2517_v12, 4 }
 0x45f   :  { %v2595_v57 = vpop.permute.xlu0 %2594 }
 0x460   :  { %v2651_v11 = vrot.slane %v2595_v57, 4  ;;  %v2660_v56 = vsel %vm300_vm0, %v2612_v46, %v2613_v16 }
 0x461   :  { %4757 = vmatmul.bf16.gmra.mxu2 %v8582_v3  ;;  %v2662_v52 = vsel %vm2661_vm8, %v2517_v12, %v2660_v56  ;;  %v5951_v3 = vor.u32 %v6274_v28, %v5948_v36  ;;  %v5356_v28 = vld [vmem:[#allocation2 + $0x178] sm:$0xf0] }
 0x462   :  { %v2699_v45 = vsel %vm300_vm0, %v2650_v43, %v2651_v11  ;;  %4940 = vmatpush.bf16.msra.mxu2 %v5967_v41  ;;  %2733 = vst [vmem:[#allocation2 + $0x600] sm:$0xff] %v2662_v52  ;;  %v9052_v11 = vpop.f32.mrf.mxu2  ;;  %v2644_v52 = vrot.slane %v2581_v25, 4 }
 0x463   :  { %v2700_v42 = vsel %vm2661_vm8, %v9021_v1, %v2699_v45  ;;  %v4348_v1 = vadd.f32 %v8880_v54, %v8854_v30  ;;  %v6010_v57 = vld [vmem:[#allocation2 + $0x690] sm:$0xf]  ;;  %v6290_v43 = vld [vmem:[#allocation2 + $0x694] sm:$0xf] }
 0x464   :  { %2752 = vst [vmem:[#allocation2 + $0x698] sm:$0xff] %v2700_v42  ;;  %v2587_v46 = vpop.permute.xlu2 %2586  ;;  %v4513_v36 = vpop.f32.mrf.mxu0 }
 0x465   :  { %v2523_v6 = vpop.permute.xlu1 %2522  ;;  %v2647_v47 = vrot.slane %v2587_v46, 4 }
 0x466   :  { %4941 = vmatpush.bf16.msra.mxu2 %v5959_v14  ;;  %v2615_v7 = vrot.slane %v2523_v6, 4  ;;  %v6126_v14 = vld [vmem:[#allocation2 + $0x174] sm:$0xf] }
 0x467   :  { %v2521_v21 = vpop.permute.xlu0 %2520  ;;  %4781 = vmatmul.bf16.gmra.mxu3 %v8621_v33  ;;  %v4372_v33 = vadd.f32 %v8901_v61, %v4348_v1  ;;  %v5050_v61 = vld [vmem:[%s9264_s1 + $0x30] sm:$0xf]  ;;  %v9064_v1 = vpop.f32.mrf.mxu3 }
 0x468   :  { %v2614_v16 = vrot.slane %v2521_v21, 4 }
 0x469   :  { %v4396_v6 = vadd.f32 %v8903_v9, %v4372_v33 }
 0x46a   :  { %v2663_v10 = vsel %vm300_vm0, %v2614_v16, %v2615_v7  ;;  %4942 = vmatpush.bf16.msra.mxu2 %v5951_v3  ;;  %v5938_v16 = vld [vmem:[#allocation2 + $0x600] sm:$0xf]  ;;  %v6051_v3 = vld [vmem:[%s9264_s1 + $0x64] sm:$0xf0] }
 0x46b   :  { %v2664_v12 = vsel %vm2661_vm8, %v2521_v21, %v2663_v10  ;;  %v6291_v62 = vld [vmem:[#allocation2 + $0x694] sm:$0xf0]  ;;  %v6012_v41 = vld [vmem:[#allocation2 + $0x698] sm:$0xf0] }
 0x46c   :  { %2734 = vst [vmem:[#allocation2 + $0x608] sm:$0xff] %v2664_v12  ;;  %v6011_v56 = vor.u32 %v6291_v62, %v6010_v57  ;;  %v6015_v45 = vor.u32 %v6290_v43, %v6012_v41  ;;  %v6272_v57 = vld [vmem:[#allocation2 + $0x604] sm:$0xf]  ;;  %v9069_v41 = vpop.f32.mrf.mxu1 }
 0x46d   :  { %v2585_v30 = vpop.permute.xlu1 %2584 }
 0x46e   :  { %4630 = vmatpush.bf16.msrb.mxu1 %v6011_v56  ;;  %4966 = vmatpush.bf16.msra.mxu3 %v6015_v45  ;;  %v2646_v42 = vrot.slane %v2585_v30, 4  ;;  %v5359_v56 = vor.u32 %v6126_v14, %v5356_v28  ;;  %v9071_v45 = vor.u32 %v6051_v3, %v5050_v61  ;;  %v5420_v14 = vld [vmem:[#allocation2 + $0x1f8] sm:$0xf0] }
 0x46f   :  { %v2583_v54 = vpop.permute.xlu0 %2582 }
 0x470   :  { %v2645_v17 = vrot.slane %v2583_v54, 4  ;;  %v2695_v21 = vsel %vm300_vm0, %v2646_v42, %v2647_v47  ;;  %v4420_v47 = vadd.f32 %v8979_v63, %v4396_v6  ;;  %v4353_v54 = vadd.f32 %v8932_v19, %v8910_v18  ;;  %v6122_v42 = vld [vmem:[#allocation2 + $0x154] sm:$0xf] }
 0x471   :  { %4762 = vmatmul.bf16.gmra.mxu2 %v8655_v53  ;;  %v2696_v10 = vsel %vm2661_vm8, %v2585_v30, %v2695_v21  ;;  %v5348_v53 = vld [vmem:[#allocation2 + $0x168] sm:$0xf0]  ;;  %v6044_v63 = vld [vmem:[%s9264_s1 + $0x34] sm:$0xf] }
 0x472   :  { %v2693_v7 = vsel %vm300_vm0, %v2644_v52, %v2645_v17  ;;  %2750 = vst [vmem:[#allocation2 + $0x688] sm:$0xff] %v2696_v10  ;;  %v4561_v33 = vpop.f32.mrf.mxu2  ;;  %v4444_v52 = vadd.f32 %v8992_v20, %v4420_v47  ;;  %v5340_v17 = vld [vmem:[#allocation2 + $0x158] sm:$0xf0]  ;;  %v5052_v21 = vld [vmem:[%s9264_s1 + $0x68] sm:$0xf0] }
 0x473   :  { %v2694_v9 = vsel %vm2661_vm8, %v2581_v25, %v2693_v7  ;;  %v6273_v12 = vld [vmem:[#allocation2 + $0x604] sm:$0xf0]  ;;  %v5940_v43 = vld [vmem:[#allocation2 + $0x608] sm:$0xf0]  ;;  %v6124_v25 = vld [vmem:[#allocation2 + $0x164] sm:$0xf]  ;;  %v5343_v3 = vor.u32 %v6122_v42, %v5340_v17 }
 0x474   :  { %v5939_v46 = vor.u32 %v6273_v12, %v5938_v16  ;;  %v5943_v62 = vor.u32 %v6272_v57, %v5940_v43  ;;  %2749 = vst [vmem:[#allocation2 + $0x680] sm:$0xff] %v2694_v9  ;;  %v5351_v30 = vor.u32 %v6124_v25, %v5348_v53  ;;  %v6142_v18 = vld [vmem:[#allocation2 + $0x1f4] sm:$0xf]  ;;  %v4377_v9 = vadd.f32 %v8945_v24, %v4353_v54  ;;  %v5106_v54 = vld [vmem:[%s9264_s1 + $0xa0] sm:$0xf] }
 0x475   :  { %v5423_v10 = vor.u32 %v6142_v18, %v5420_v14  ;;  %v4468_v12 = vadd.f32 %v8997_v37, %v4444_v52  ;;  %v4514_v57 = vadd.f32 %v4513_v36, %v8988_v29  ;;  %v9088_v43 = vor.u32 %v6044_v63, %v5052_v21  ;;  %v6065_v52 = vld [vmem:[%s9264_s1 + $0xd4] sm:$0xf0]  ;;  %v5324_v17 = vld [vmem:[#allocation2 + $0x138] sm:$0xf0]  ;;  %v6138_v14 = vld [vmem:[#allocation2 + $0x1d4] sm:$0xf] }
 0x476   :  { %4607 = vmatpush.bf16.msrb.mxu0 %v5939_v46  ;;  %4943 = vmatpush.bf16.msra.mxu2 %v5943_v62  ;;  %v6120_v46 = vld [vmem:[#allocation2 + $0x144] sm:$0xf]  ;;  %v5332_v62 = vld [vmem:[#allocation2 + $0x148] sm:$0xf0]  ;;  %v4401_v37 = vadd.f32 %v8947_v32, %v4377_v9  ;;  %v5404_v63 = vld [vmem:[#allocation2 + $0x1d8] sm:$0xf0] }
 0x477   :  { %4786 = vmatmul.bf16.gmra.mxu3 %v8694_v0  ;;  %v4515_v0 = vpop.f32.mrf.mxu0  ;;  %v5335_v42 = vor.u32 %v6120_v46, %v5332_v62  ;;  %v4492_v29 = vadd.f32 %v9000_v40, %v4468_v12  ;;  %v5407_v18 = vor.u32 %v6138_v14, %v5404_v63  ;;  %v6136_v9 = vld [vmem:[#allocation2 + $0x1c4] sm:$0xf]  ;;  %v6114_v62 = vld [vmem:[#allocation2 + $0x114] sm:$0xf] }
 0x478   :  { %v4425_v21 = vadd.f32 %v9004_v50, %v4401_v37  ;;  %v4358_v50 = vadd.f32 %v8966_v51, %v8952_v60 }
 0x479   :  { %4608 = vmatmul.bf16.vlgmr.msrb.gmra.mxu0 %v9071_v45  ;;  %v6289_v28 = vld [vmem:[#allocation2 + $0x684] sm:$0xf0]  ;;  %v6004_v6 = vld [vmem:[#allocation2 + $0x688] sm:$0xf0]  ;;  %v4585_v19 = vpop.f32.mrf.mxu3 }
 0x47a   :  { %4696 = vmatpush.bf16.msra.mxu0 %v5359_v56  ;;  %v5412_v56 = vld [vmem:[#allocation2 + $0x1e8] sm:$0xf0]  ;;  %v4563_v53 = vpop.f32.mrf.mxu2 }
 0x47b   :  { %v6002_v7 = vld [vmem:[#allocation2 + $0x680] sm:$0xf]  ;;  %v6288_v16 = vld [vmem:[#allocation2 + $0x684] sm:$0xf] }
 0x47c   :  { %v6003_v20 = vor.u32 %v6289_v28, %v6002_v7  ;;  %v6007_v61 = vor.u32 %v6288_v16, %v6004_v6  ;;  %v4537_v47 = vpop.f32.mrf.mxu1  ;;  %v9103_v28 = vor.u32 %v6065_v52, %v5106_v54  ;;  %v4516_v7 = vadd.f32 %v4515_v0, %v4492_v29  ;;  %v6132_v54 = vld [vmem:[#allocation2 + $0x1a4] sm:$0xf]  ;;  %v5380_v52 = vld [vmem:[#allocation2 + $0x1a8] sm:$0xf0] }
 0x47d   :  { %v4538_v25 = vadd.f32 %v4537_v47, %v4514_v57  ;;  %v4449_v0 = vadd.f32 %v9014_v4, %v4425_v21  ;;  %v5388_v47 = vld [vmem:[#allocation2 + $0x1b8] sm:$0xf0] }
 0x47e   :  { %4697 = vmatpush.bf16.msra.mxu0 %v5351_v30  ;;  %4631 = vmatpush.bf16.msrb.mxu1 %v6003_v20  ;;  %v6140_v30 = vld [vmem:[#allocation2 + $0x1e4] sm:$0xf]  ;;  %v5316_v20 = vld [vmem:[#allocation2 + $0x128] sm:$0xf0] }
 0x47f   :  { %4967 = vmatpush.bf16.msra.mxu3 %v6007_v61  ;;  %v5415_v24 = vor.u32 %v6140_v30, %v5412_v56  ;;  %v4562_v36 = vadd.f32 %v4561_v33, %v4538_v25  ;;  %v6118_v33 = vld [vmem:[#allocation2 + $0x134] sm:$0xf]  ;;  %v4518_v6 = vpop.f32.mrf.mxu0  ;;  %v5308_v56 = vld [vmem:[#allocation2 + $0x118] sm:$0xf0]  ;;  %v6058_v25 = vld [vmem:[%s9264_s1 + $0xa4] sm:$0xf] }
 0x480   :  { %v5327_v16 = vor.u32 %v6118_v33, %v5324_v17  ;;  %v5108_v30 = vld [vmem:[%s9264_s1 + $0xd8] sm:$0xf0]  ;;  %v5311_v51 = vor.u32 %v6114_v62, %v5308_v56  ;;  %v4519_v37 = vadd.f32 %v4518_v6, %v9012_v15  ;;  %v6190_v15 = vld [vmem:[#allocation2 + $0x374] sm:$0xf] }
 0x481   :  { %6032 = vmatmul.msk.bf16.vlgmr.msrb.gmra.mxu1 %vm4302_vm9, %v9088_v43  ;;  %4848 = vmatmul.bf16.vlgmr.msrb.gmra.mxu2 %v8719_v59  ;;  %v9101_v32 = vadd.f32 %v4585_v19, %v4562_v36  ;;  %v4587_v40 = vpop.f32.mrf.mxu3  ;;  %v5396_v59 = vld [vmem:[#allocation2 + $0x1c8] sm:$0xf0]  ;;  %v6116_v19 = vld [vmem:[#allocation2 + $0x124] sm:$0xf]  ;;  %v9122_v29 = vor.u32 %v6058_v25, %v5108_v30  ;;  %v5612_v33 = vld [vmem:[#allocation2 + $0x378] sm:$0xf0] }
 0x482   :  { %4698 = vmatpush.bf16.msra.mxu0 %v5343_v3  ;;  %4720 = vmatpush.bf16.msra.mxu1 %v5423_v10  ;;  %v5319_v10 = vor.u32 %v6116_v19, %v5316_v20  ;;  %v5399_v46 = vor.u32 %v6136_v9, %v5396_v59  ;;  %v5300_v36 = vld [vmem:[#allocation2 + $0x108] sm:$0xf0]  ;;  %v5615_v6 = vor.u32 %v6190_v15, %v5612_v33  ;;  %v6186_v56 = vld [vmem:[#allocation2 + $0x354] sm:$0xf]  ;;  %v5676_v25 = vld [vmem:[#allocation2 + $0x3f8] sm:$0xf0] }
 0x483   :  { %v5580_v15 = vld [vmem:[#allocation2 + $0x338] sm:$0xf0] }
 0x484   :  { %v4539_v61 = vpop.f32.mrf.mxu1  ;;  %v4566_v12 = vpop.f32.mrf.mxu2 }
 0x485   :  { %v4540_v3 = vadd.f32 %v4539_v61, %v4516_v7  ;;  %v5383_v7 = vor.u32 %v6132_v54, %v5380_v52  ;;  %v5162_v61 = vld [vmem:[%s9264_s1 + $0x110] sm:$0xf]  ;;  %v5668_v52 = vld [vmem:[#allocation2 + $0x3e8] sm:$0xf0] }
 0x486   :  { %4699 = vmatpush.bf16.msra.mxu0 %v5335_v42  ;;  %4721 = vmatpush.bf16.msra.mxu1 %v5415_v24  ;;  %v4473_v24 = vadd.f32 %v9019_v5, %v4449_v0 }
 0x487   :  { %4872 = vmatmul.bf16.vlgmr.msrb.gmra.mxu3 %v8857_v2  ;;  %v4564_v57 = vadd.f32 %v4563_v53, %v4540_v3  ;;  %v6134_v2 = vld [vmem:[#allocation2 + $0x1b4] sm:$0xf]  ;;  %v4382_v53 = vadd.f32 %v8971_v13, %v4358_v50  ;;  %v4520_v14 = vpop.f32.mrf.mxu0 }
 0x488   :  { %v5391_v4 = vor.u32 %v6134_v2, %v5388_v47  ;;  %v4497_v5 = vadd.f32 %v9024_v34, %v4473_v24  ;;  %v5604_v34 = vld [vmem:[#allocation2 + $0x368] sm:$0xf0]  ;;  %v6130_v3 = vld [vmem:[#allocation2 + $0x194] sm:$0xf]  ;;  %v5596_v47 = vld [vmem:[#allocation2 + $0x358] sm:$0xf0] }
 0x489   :  { %4613 = vmatmul.bf16.gmra.mxu0 %v9103_v28  ;;  %v9117_v42 = vadd.f32 %v4587_v40, %v4564_v57  ;;  %v4590_v60 = vpop.f32.mrf.mxu3  ;;  %v6112_v40 = vld [vmem:[#allocation2 + $0x104] sm:$0xf]  ;;  %v4406_v13 = vadd.f32 %v8974_v35, %v4382_v53  ;;  %v6079_v35 = vld [vmem:[%s9264_s1 + $0x144] sm:$0xf0]  ;;  %v5599_v53 = vor.u32 %v6186_v56, %v5596_v47  ;;  %v5564_v56 = vld [vmem:[#allocation2 + $0x318] sm:$0xf0] }
 0x48a   :  { %4700 = vmatpush.bf16.msra.mxu0 %v5327_v16  ;;  %4722 = vmatpush.bf16.msra.mxu1 %v5407_v18  ;;  %v5303_v21 = vor.u32 %v6112_v40, %v5300_v36  ;;  %v5372_v18 = vld [vmem:[#allocation2 + $0x198] sm:$0xf0]  ;;  %v9138_v50 = vor.u32 %v6079_v35, %v5162_v61  ;;  %v6128_v2 = vld [vmem:[#allocation2 + $0x184] sm:$0xf]  ;;  %v5164_v36 = vld [vmem:[%s9264_s1 + $0x148] sm:$0xf0] }
 0x48b   :  { %v5375_v9 = vor.u32 %v6130_v3, %v5372_v18  ;;  %v6184_v40 = vld [vmem:[#allocation2 + $0x344] sm:$0xf]  ;;  %v6198_v47 = vld [vmem:[#allocation2 + $0x3b4] sm:$0xf] }
 0x48c   :  { %v4542_v17 = vpop.f32.mrf.mxu1  ;;  %v4568_v20 = vpop.f32.mrf.mxu2 }
 0x48d   :  { %v4543_v63 = vadd.f32 %v4542_v17, %v4519_v37  ;;  %v6072_v37 = vld [vmem:[%s9264_s1 + $0x114] sm:$0xf] }
 0x48e   :  { %4701 = vmatpush.bf16.msra.mxu0 %v5319_v10  ;;  %4723 = vmatpush.bf16.msra.mxu1 %v5399_v46  ;;  %v4521_v10 = vadd.f32 %v4520_v14, %v4497_v5  ;;  %v5364_v46 = vld [vmem:[#allocation2 + $0x188] sm:$0xf0]  ;;  %v9153_v33 = vor.u32 %v6072_v37, %v5164_v36  ;;  %v6176_v37 = vld [vmem:[#allocation2 + $0x304] sm:$0xf] }
 0x48f   :  { %v4567_v16 = vadd.f32 %v4566_v12, %v4543_v63  ;;  %v6188_v12 = vld [vmem:[#allocation2 + $0x364] sm:$0xf]  ;;  %v4523_v30 = vpop.f32.mrf.mxu0 }
 0x490   :  { %v5607_v57 = vor.u32 %v6188_v12, %v5604_v34  ;;  %v4524_v63 = vadd.f32 %v4523_v30, %v9033_v39  ;;  %v6202_v39 = vld [vmem:[#allocation2 + $0x3d4] sm:$0xf]  ;;  %v6196_v36 = vld [vmem:[#allocation2 + $0x3a4] sm:$0xf] }
 0x491   :  { %6033 = vmatmul.msk.bf16.gmra.mxu1 %vm4302_vm9, %v9122_v29  ;;  %4853 = vmatmul.bf16.gmra.mxu2 %v8760_v48  ;;  %v9135_v59 = vadd.f32 %v4590_v60, %v4567_v16  ;;  %v4592_v19 = vpop.f32.mrf.mxu3  ;;  %v4430_v48 = vadd.f32 %v9045_v27, %v4406_v13 }
 0x492   :  { %4702 = vmatpush.bf16.msra.mxu0 %v5311_v51  ;;  %4724 = vmatpush.bf16.msra.mxu1 %v5391_v4  ;;  %v5367_v51 = vor.u32 %v6128_v2, %v5364_v46  ;;  %v6206_v4 = vld [vmem:[#allocation2 + $0x3f4] sm:$0xf] }
 0x493   :  { %v4454_v27 = vadd.f32 %v9069_v41, %v4430_v48  ;;  %v5679_v24 = vor.u32 %v6206_v4, %v5676_v25  ;;  %v6204_v41 = vld [vmem:[#allocation2 + $0x3e4] sm:$0xf]  ;;  %v5572_v48 = vld [vmem:[#allocation2 + $0x328] sm:$0xf0]  ;;  %v6178_v2 = vld [vmem:[#allocation2 + $0x314] sm:$0xf] }
 0x494   :  { %v4544_v0 = vpop.f32.mrf.mxu1  ;;  %v4571_v17 = vpop.f32.mrf.mxu2  ;;  %v5671_v13 = vor.u32 %v6204_v41, %v5668_v52  ;;  %v5556_v4 = vld [vmem:[#allocation2 + $0x308] sm:$0xf0]  ;;  %v6254_v52 = vld [vmem:[#allocation2 + $0x574] sm:$0xf] }
 0x495   :  { %v4545_v62 = vadd.f32 %v4544_v0, %v4521_v10  ;;  %v4478_v14 = vadd.f32 %v9052_v11, %v4454_v27  ;;  %v6182_v11 = vld [vmem:[#allocation2 + $0x334] sm:$0xf]  ;;  %v5652_v10 = vld [vmem:[#allocation2 + $0x3c8] sm:$0xf0]  ;;  %v5567_v27 = vor.u32 %v6178_v2, %v5564_v56  ;;  %v5820_v56 = vld [vmem:[#allocation2 + $0x518] sm:$0xf0] }
 0x496   :  { %4703 = vmatpush.bf16.msra.mxu0 %v5303_v21  ;;  %4725 = vmatpush.bf16.msra.mxu1 %v5383_v7  ;;  %v5583_v35 = vor.u32 %v6182_v11, %v5580_v15  ;;  %v5852_v15 = vld [vmem:[#allocation2 + $0x558] sm:$0xf0] }
 0x497   :  { %4877 = vmatmul.bf16.gmra.mxu3 %v8906_v23  ;;  %v4569_v60 = vadd.f32 %v4568_v20, %v4545_v62  ;;  %v5588_v23 = vld [vmem:[#allocation2 + $0x348] sm:$0xf0]  ;;  %v4502_v18 = vadd.f32 %v9064_v1, %v4478_v14  ;;  %v4525_v61 = vpop.f32.mrf.mxu0  ;;  %v6200_v1 = vld [vmem:[#allocation2 + $0x3c4] sm:$0xf]  ;;  %v5628_v14 = vld [vmem:[#allocation2 + $0x398] sm:$0xf0] }
 0x498   :  { %v5591_v7 = vor.u32 %v6184_v40, %v5588_v23  ;;  %v5655_v46 = vor.u32 %v6200_v1, %v5652_v10  ;;  %v5559_v23 = vor.u32 %v6176_v37, %v5556_v4  ;;  %v6252_v40 = vld [vmem:[#allocation2 + $0x564] sm:$0xf]  ;;  %v6246_v10 = vld [vmem:[#allocation2 + $0x534] sm:$0xf] }
 0x499   :  { %4618 = vmatmul.bf16.gmra.mxu0 %v9138_v50  ;;  %v9149_v54 = vadd.f32 %v4592_v19, %v4569_v60  ;;  %v4595_v5 = vpop.f32.mrf.mxu3  ;;  %v6180_v19 = vld [vmem:[#allocation2 + $0x324] sm:$0xf]  ;;  %v6258_v37 = vld [vmem:[#allocation2 + $0x594] sm:$0xf] }
 0x49a   :  { %4792 = vmatpush.bf16.msrb.mxu0 %v5615_v6  ;;  %4726 = vmatpush.bf16.msra.mxu1 %v5375_v9  ;;  %v5660_v6 = vld [vmem:[#allocation2 + $0x3d8] sm:$0xf0]  ;;  %v4526_v9 = vadd.f32 %v4525_v61, %v4502_v18  ;;  %v6250_v18 = vld [vmem:[#allocation2 + $0x554] sm:$0xf]  ;;  %v6248_v61 = vld [vmem:[#allocation2 + $0x544] sm:$0xf] }
 0x49b   :  { %v5663_v34 = vor.u32 %v6202_v39, %v5660_v6  ;;  %v5855_v11 = vor.u32 %v6250_v18, %v5852_v15  ;;  %v5844_v39 = vld [vmem:[#allocation2 + $0x548] sm:$0xf0]  ;;  %v6260_v4 = vld [vmem:[#allocation2 + $0x5a4] sm:$0xf] }
 0x49c   :  { %v4547_v21 = vpop.f32.mrf.mxu1  ;;  %v4573_v0 = vpop.f32.mrf.mxu2 }
 0x49d   :  { %v4548_v16 = vadd.f32 %v4547_v21, %v4524_v63 }
 0x49e   :  { %4793 = vmatpush.bf16.msrb.mxu0 %v5607_v57  ;;  %4727 = vmatpush.bf16.msra.mxu1 %v5367_v51  ;;  %v5575_v57 = vor.u32 %v6180_v19, %v5572_v48  ;;  %v5836_v19 = vld [vmem:[#allocation2 + $0x538] sm:$0xf0] }
 0x49f   :  { %v4572_v20 = vadd.f32 %v4571_v17, %v4548_v16  ;;  %v5932_v16 = vld [vmem:[#allocation2 + $0x5f8] sm:$0xf0]  ;;  %v5839_v1 = vor.u32 %v6246_v10, %v5836_v19 }
 0x4a0   :  { %v5916_v48 = vld [vmem:[#allocation2 + $0x5d8] sm:$0xf0] }
 0x4a1   :  { %6034 = vmatmul.msk.bf16.gmra.mxu1 %vm4302_vm9, %v9153_v33  ;;  %4858 = vmatmul.bf16.gmra.mxu2 %v8825_v26  ;;  %v9159_v3 = vadd.f32 %v4595_v5, %v4572_v20  ;;  %v5644_v26 = vld [vmem:[#allocation2 + $0x3b8] sm:$0xf0]  ;;  %v4597_v25 = vpop.f32.mrf.mxu3  ;;  %v6270_v5 = vld [vmem:[#allocation2 + $0x5f4] sm:$0xf] }
 0x4a2   :  { %4794 = vmatpush.bf16.msrb.mxu0 %v5599_v53  ;;  %4816 = vmatpush.bf16.msrb.mxu1 %v5679_v24  ;;  %v5647_v60 = vor.u32 %v6198_v47, %v5644_v26  ;;  %v5636_v53 = vld [vmem:[#allocation2 + $0x3a8] sm:$0xf0]  ;;  %v5868_v24 = vld [vmem:[#allocation2 + $0x578] sm:$0xf0]  ;;  %v5935_v20 = vor.u32 %v6270_v5, %v5932_v16  ;;  %v6242_v26 = vld [vmem:[#allocation2 + $0x514] sm:$0xf] }
 0x4a3   :  { %v5639_v41 = vor.u32 %v6196_v36, %v5636_v53  ;;  %v5871_v17 = vor.u32 %v6254_v52, %v5868_v24  ;;  %v5900_v47 = vld [vmem:[#allocation2 + $0x5b8] sm:$0xf0] }
 0x4a4   :  { %v4549_v12 = vpop.f32.mrf.mxu1  ;;  %v5884_v24 = vld [vmem:[#allocation2 + $0x598] sm:$0xf0]  ;;  %v4657_v52 = vpop.f32.mrf.mxu2 }
 0x4a5   :  { %v4550_v62 = vadd.f32 %v4549_v12, %v4526_v9  ;;  %v6266_v9 = vld [vmem:[#allocation2 + $0x5d4] sm:$0xf]  ;;  %v5887_v36 = vor.u32 %v6258_v37, %v5884_v24  ;;  %v9291_v16 = vld [vmem:[#allocation6_spill] sm:$0xff] }
 0x4a6   :  { %4795 = vmatpush.bf16.msrb.mxu0 %v5591_v7  ;;  %4817 = vmatpush.bf16.msrb.mxu1 %v5671_v13  ;;  %v6192_v7 = vld [vmem:[#allocation2 + $0x384] sm:$0xf]  ;;  %v5620_v13 = vld [vmem:[#allocation2 + $0x388] sm:$0xf0]  ;;  %v5919_v12 = vor.u32 %v6266_v9, %v5916_v48 }
 0x4a7   :  { %v4574_v30 = vadd.f32 %v4573_v0, %v4550_v62  ;;  %4882 = vmatmul.bf16.gmra.mxu3 %v8950_v38  ;;  %v6194_v38 = vld [vmem:[#allocation2 + $0x394] sm:$0xf]  ;;  %v5623_v6 = vor.u32 %v6192_v7, %v5620_v13  ;;  %v5908_v0 = vld [vmem:[#allocation2 + $0x5c8] sm:$0xf0] }
 0x4a8   :  { %v5631_v63 = vor.u32 %v6194_v38, %v5628_v14  ;;  %v9293_v9 = vld [vmem:[#allocation8_spill] sm:$0xff] }
 0x4a9   :  { %4704 = vmatmul.bf16.vlgmr.msra.gmra.mxu0 %v7957_v55  ;;  %v9163_v51 = vadd.f32 %v4597_v25, %v4574_v30  ;;  %v5860_v55 = vld [vmem:[#allocation2 + $0x568] sm:$0xf0]  ;;  %v6262_v25 = vld [vmem:[#allocation2 + $0x5b4] sm:$0xf]  ;;  %v5823_v30 = vor.u32 %v6242_v26, %v5820_v56 }
 0x4aa   :  { %4796 = vmatpush.bf16.msrb.mxu0 %v5583_v35  ;;  %4818 = vmatpush.bf16.msrb.mxu1 %v5663_v34  ;;  %v5863_v21 = vor.u32 %v6252_v40, %v5860_v55  ;;  %v5847_v34 = vor.u32 %v6248_v61, %v5844_v39  ;;  %v5903_v2 = vor.u32 %v6262_v25, %v5900_v47  ;;  %v9292_v39 = vld [vmem:[#allocation7_spill] sm:$0xff] }
 0x4ac   :  { %v4659_v55 = vpop.f32.mrf.mxu2 }
 0x4ae   :  { %4797 = vmatpush.bf16.msrb.mxu0 %v5575_v57  ;;  %4819 = vmatpush.bf16.msrb.mxu1 %v5655_v46  ;;  %v6244_v57 = vld [vmem:[#allocation2 + $0x524] sm:$0xf] }
 0x4af   :  { %v6264_v46 = vld [vmem:[#allocation2 + $0x5c4] sm:$0xf] }
 0x4b0   :  { %v5911_v62 = vor.u32 %v6264_v46, %v5908_v0 }
 0x4b1   :  { %4728 = vmatmul.bf16.vlgmr.msra.gmra.mxu1 %v8012_v8  ;;  %4944 = vmatmul.bf16.vlgmr.msra.gmra.mxu2 %v9071_v45  ;;  %v5924_v8 = vld [vmem:[#allocation2 + $0x5e8] sm:$0xf0]  ;;  %v6268_v45 = vld [vmem:[#allocation2 + $0x5e4] sm:$0xf] }
 0x4b2   :  { %4798 = vmatpush.bf16.msrb.mxu0 %v5567_v27  ;;  %4820 = vmatpush.bf16.msrb.mxu1 %v5647_v60  ;;  %v5927_v35 = vor.u32 %v6268_v45, %v5924_v8  ;;  %v5892_v27 = vld [vmem:[#allocation2 + $0x5a8] sm:$0xf0]  ;;  %v6240_v60 = vld [vmem:[#allocation2 + $0x504] sm:$0xf] }
 0x4b3   :  { %v5895_v53 = vor.u32 %v6260_v4, %v5892_v27 }
 0x4b4   :  { %v4662_v40 = vpop.f32.mrf.mxu2 }
 0x4b6   :  { %4799 = vmatpush.bf16.msrb.mxu0 %v5559_v23  ;;  %4821 = vmatpush.bf16.msrb.mxu1 %v5639_v41  ;;  %v5876_v23 = vld [vmem:[#allocation2 + $0x588] sm:$0xf0] }
 0x4b7   :  { %6035 = vmatmul.msk.bf16.vlgmr.msra.gmra.mxu3 %vm4302_vm9, %v9088_v43 }
 0x4b9   :  { %4709 = vmatmul.bf16.gmra.mxu0 %v8346_v58  ;;  %v5828_v58 = vld [vmem:[#allocation2 + $0x528] sm:$0xf0] }
 0x4ba   :  { %4888 = vmatpush.bf16.msra.mxu0 %v5871_v17  ;;  %4822 = vmatpush.bf16.msrb.mxu1 %v5631_v63  ;;  %v5831_v43 = vor.u32 %v6244_v57, %v5828_v58  ;;  %v9288_v17 = vld [vmem:[#allocation3_spill] sm:$0xff]  ;;  %v9289_v63 = vld [vmem:[#allocation4_spill] sm:$0xff] }
 0x4be   :  { %4889 = vmatpush.bf16.msra.mxu0 %v5863_v21  ;;  %4823 = vmatpush.bf16.msrb.mxu1 %v5623_v6  ;;  %v9290_v21 = vld [vmem:[#allocation5_spill] sm:$0xff] }
 0x4c1   :  { %4733 = vmatmul.bf16.gmra.mxu1 %v8383_v22  ;;  %4949 = vmatmul.bf16.gmra.mxu2 %v9103_v28  ;;  %v5812_v22 = vld [vmem:[#allocation2 + $0x508] sm:$0xf0] }
 0x4c2   :  { %4912 = vmatpush.bf16.msra.mxu1 %v5935_v20  ;;  %4890 = vmatpush.bf16.msra.mxu0 %v5855_v11  ;;  %v5815_v28 = vor.u32 %v6240_v60, %v5812_v22 }
 0x4c6   :  { %4913 = vmatpush.bf16.msra.mxu1 %v5927_v35  ;;  %4891 = vmatpush.bf16.msra.mxu0 %v5847_v34 }
 0x4c7   :  { %6036 = vmatmul.msk.bf16.gmra.mxu3 %vm4302_vm9, %v9122_v29  ;;  %v4681_v29 = vpop.f32.mrf.mxu3 }
 0x4c8   :  { %v4682_v14 = vadd.f32 %v4681_v29, %v4657_v52 }
 0x4c9   :  { %4714 = vmatmul.bf16.gmra.mxu0 %v8421_v44  ;;  %v6256_v44 = vld [vmem:[#allocation2 + $0x584] sm:$0xf] }
 0x4ca   :  { %4892 = vmatpush.bf16.msra.mxu0 %v5839_v1  ;;  %4914 = vmatpush.bf16.msra.mxu1 %v5919_v12  ;;  %v5879_v41 = vor.u32 %v6256_v44, %v5876_v23 }
 0x4ce   :  { %4893 = vmatpush.bf16.msra.mxu0 %v5831_v43  ;;  %4915 = vmatpush.bf16.msra.mxu1 %v5911_v62 }
 0x4cf   :  { %v4683_v38 = vpop.f32.mrf.mxu3 }
 0x4d1   :  { %4738 = vmatmul.bf16.gmra.mxu1 %v8450_v49  ;;  %4954 = vmatmul.bf16.gmra.mxu2 %v9138_v50  ;;  %v9181_v49 = vadd.f32 %v4683_v38, %v4659_v55  ;;  %v9298_v38 = vld [vmem:[#allocation13_spill] sm:$0xff] }
 0x4d2   :  { %4894 = vmatpush.bf16.msra.mxu0 %v5823_v30  ;;  %4916 = vmatpush.bf16.msra.mxu1 %v5903_v2 }
 0x4d6   :  { %4895 = vmatpush.bf16.msra.mxu0 %v5815_v28  ;;  %4917 = vmatpush.bf16.msra.mxu1 %v5895_v53 }
 0x4d7   :  { %6037 = vmatmul.msk.bf16.gmra.mxu3 %vm4302_vm9, %v9153_v33  ;;  %v4686_v50 = vpop.f32.mrf.mxu3 }
 0x4d8   :  { %v9185_v7 = vadd.f32 %v4686_v50, %v4662_v40 }
 0x4d9   :  { %4800 = vmatmul.bf16.vlgmr.msrb.gmra.mxu0 %v8490_v31  ;;  %v4664_v31 = vpop.f32.mrf.mxu2 }
 0x4da   :  { %4918 = vmatpush.bf16.msra.mxu1 %v5887_v36 }
 0x4de   :  { %4919 = vmatpush.bf16.msra.mxu1 %v5879_v41 }
 0x4df   :  { %v4688_v13 = vpop.f32.mrf.mxu3 }
 0x4e0   :  { %v9187_v5 = vadd.f32 %v4688_v13, %v4664_v31 }
 0x4e1   :  { %4824 = vmatmul.bf16.vlgmr.msrb.gmra.mxu1 %v9288_v17  ;;  %v4667_v15 = vpop.f32.mrf.mxu2 }
 0x4e7   :  { %v4691_v6 = vpop.f32.mrf.mxu3 }
 0x4e8   :  { %v9195_v45 = vadd.f32 %v4691_v6, %v4667_v15 }
 0x4e9   :  { %4805 = vmatmul.bf16.gmra.mxu0 %v9289_v63  ;;  %v4669_v61 = vpop.f32.mrf.mxu2 }
 0x4ef   :  { %v4693_v35 = vpop.f32.mrf.mxu3 }
 0x4f0   :  { %v9197_v34 = vadd.f32 %v4693_v35, %v4669_v61 }
 0x4f1   :  { %4829 = vmatmul.bf16.gmra.mxu1 %v9290_v21  ;;  %v4753_v58 = vpop.f32.mrf.mxu2 }
 0x4f6   :  { %v4609_v33 = vpop.f32.mrf.mxu0 }
 0x4f7   :  { %v4610_v18 = vadd.f32 %v4609_v33, %v9101_v32  ;;  %v4777_v46 = vpop.f32.mrf.mxu3 }
 0x4f9   :  { %4810 = vmatmul.bf16.gmra.mxu0 %v9291_v16  ;;  %v4755_v26 = vpop.f32.mrf.mxu2 }
 0x4fe   :  { %v4611_v20 = vpop.f32.mrf.mxu0  ;;  %v4633_v11 = vpop.f32.mrf.mxu1 }
 0x4ff   :  { %v4634_v8 = vadd.f32 %v4633_v11, %v4610_v18  ;;  %v4612_v19 = vadd.f32 %v4611_v20, %v9117_v42  ;;  %v9294_v42 = vld [vmem:[#allocation9_spill] sm:$0xff]  ;;  %v4779_v25 = vpop.f32.mrf.mxu3 }
 0x501   :  { %4984 = vst [vmem:[%s9265_s2] sm:$0xff] %v4634_v8  ;;  %4834 = vmatmul.bf16.gmra.mxu1 %v9292_v39  ;;  %v4758_v60 = vpop.f32.mrf.mxu2 }
 0x506   :  { %v4614_v48 = vpop.f32.mrf.mxu0  ;;  %v4635_v10 = vpop.f32.mrf.mxu1 }
 0x507   :  { %v4636_v32 = vadd.f32 %v4635_v10, %v4612_v19  ;;  %v4615_v1 = vadd.f32 %v4614_v48, %v9135_v59  ;;  %v9295_v59 = vld [vmem:[#allocation10_spill] sm:$0xff]  ;;  %v4782_v4 = vpop.f32.mrf.mxu3 }
 0x509   :  { %4986 = vst [vmem:[%s9265_s2 + $0x10] sm:$0xff] %v4636_v32  ;;  %4896 = vmatmul.bf16.vlgmr.msra.gmra.mxu0 %v9293_v9  ;;  %v4760_v23 = vpop.f32.mrf.mxu2 }
 0x50e   :  { %v4616_v12 = vpop.f32.mrf.mxu0  ;;  %v4638_v0 = vpop.f32.mrf.mxu1 }
 0x50f   :  { %v4639_v57 = vadd.f32 %v4638_v0, %v4615_v1  ;;  %v4617_v43 = vadd.f32 %v4616_v12, %v9149_v54  ;;  %v9296_v54 = vld [vmem:[#allocation11_spill] sm:$0xff]  ;;  %v4784_v44 = vpop.f32.mrf.mxu3 }
 0x511   :  { %4988 = vst [vmem:[%s9265_s2 + $0x20] sm:$0xff] %v4639_v57  ;;  %4920 = vmatmul.bf16.vlgmr.msra.gmra.mxu1 %v9294_v42  ;;  %v4763_v63 = vpop.f32.mrf.mxu2 }
 0x516   :  { %v4619_v62 = vpop.f32.mrf.mxu0  ;;  %v4640_v56 = vpop.f32.mrf.mxu1 }
 0x517   :  { %v4641_v47 = vadd.f32 %v4640_v56, %v4617_v43  ;;  %v4620_v30 = vadd.f32 %v4619_v62, %v9159_v3  ;;  %v9297_v3 = vld [vmem:[#allocation12_spill] sm:$0xff]  ;;  %v4787_v31 = vpop.f32.mrf.mxu3 }
 0x519   :  { %4990 = vst [vmem:[%s9265_s2 + $0x30] sm:$0xff] %v4641_v47  ;;  %4901 = vmatmul.bf16.gmra.mxu0 %v9295_v59 }
 0x51e   :  { %v4621_v2 = vpop.f32.mrf.mxu0  ;;  %v4643_v22 = vpop.f32.mrf.mxu1 }
 0x51f   :  { %v4644_v27 = vadd.f32 %v4643_v22, %v4620_v30  ;;  %v4622_v28 = vadd.f32 %v4621_v2, %v9163_v51  ;;  %v4789_v11 = vpop.f32.mrf.mxu3 }
 0x521   :  { %4992 = vst [vmem:[%s9265_s2 + $0x40] sm:$0xff] %v4644_v27  ;;  %4925 = vmatmul.bf16.gmra.mxu1 %v9296_v54 }
 0x526   :  { %v4645_v53 = vpop.f32.mrf.mxu1  ;;  %v4705_v24 = vpop.f32.mrf.mxu0 }
 0x527   :  { %v4646_v37 = vadd.f32 %v4645_v53, %v4622_v28  ;;  %v4706_v36 = vadd.f32 %v4705_v24, %v4682_v14  ;;  %v4873_v32 = vpop.f32.mrf.mxu3 }
 0x529   :  { %4994 = vst [vmem:[%s9265_s2 + $0x50] sm:$0xff] %v4646_v37  ;;  %4906 = vmatmul.bf16.gmra.mxu0 %v9297_v3 }
 0x52e   :  { %v4707_v41 = vpop.f32.mrf.mxu0  ;;  %v4729_v52 = vpop.f32.mrf.mxu1 }
 0x52f   :  { %v4708_v29 = vadd.f32 %v4707_v41, %v9181_v49  ;;  %v4730_v17 = vadd.f32 %v4729_v52, %v4706_v36  ;;  %v4765_v49 = vpop.f32.mrf.mxu2 }
 0x531   :  { %v4754_v55 = vadd.f32 %v4753_v58, %v4730_v17  ;;  %4930 = vmatmul.bf16.gmra.mxu1 %v9298_v38 }
 0x533   :  { %v4778_v51 = vadd.f32 %v4777_v46, %v4754_v55  ;;  %v4875_v46 = vpop.f32.mrf.mxu3 }
 0x536   :  { %v4710_v40 = vpop.f32.mrf.mxu0  ;;  %v4731_v14 = vpop.f32.mrf.mxu1 }
 0x537   :  { %v4711_v50 = vadd.f32 %v4710_v40, %v9185_v7  ;;  %v4732_v21 = vadd.f32 %v4731_v14, %v4708_v29  ;;  %v4849_v7 = vpop.f32.mrf.mxu2 }
 0x539   :  { %v4756_v13 = vadd.f32 %v4755_v26, %v4732_v21 }
 0x53b   :  { %v4780_v33 = vadd.f32 %v4779_v25, %v4756_v13  ;;  %v4878_v25 = vpop.f32.mrf.mxu3 }
 0x53e   :  { %v4712_v16 = vpop.f32.mrf.mxu0  ;;  %v4734_v15 = vpop.f32.mrf.mxu1 }
 0x53f   :  { %v4713_v6 = vadd.f32 %v4712_v16, %v9187_v5  ;;  %v4735_v18 = vadd.f32 %v4734_v15, %v4711_v50  ;;  %v4851_v57 = vpop.f32.mrf.mxu2 }
 0x541   :  { %v4759_v20 = vadd.f32 %v4758_v60, %v4735_v18 }
 0x543   :  { %v4783_v8 = vadd.f32 %v4782_v4, %v4759_v20 }
 0x546   :  { %v4715_v39 = vpop.f32.mrf.mxu0  ;;  %v4736_v61 = vpop.f32.mrf.mxu1 }
 0x547   :  { %v4716_v35 = vadd.f32 %v4715_v39, %v9195_v45  ;;  %v4737_v19 = vadd.f32 %v4736_v61, %v4713_v6  ;;  %v4854_v47 = vpop.f32.mrf.mxu2 }
 0x549   :  { %v4761_v48 = vadd.f32 %v4760_v23, %v4737_v19 }
 0x54b   :  { %v4785_v10 = vadd.f32 %v4784_v44, %v4761_v48 }
 0x54e   :  { %v4717_v9 = vpop.f32.mrf.mxu0  ;;  %v4739_v1 = vpop.f32.mrf.mxu1 }
 0x54f   :  { %v4718_v12 = vadd.f32 %v4717_v9, %v9197_v34  ;;  %v4740_v58 = vadd.f32 %v4739_v1, %v4716_v35  ;;  %v4856_v22 = vpop.f32.mrf.mxu2  ;;  %v4880_v34 = vpop.f32.mrf.mxu3 }
 0x551   :  { %v4764_v5 = vadd.f32 %v4763_v63, %v4740_v58 }
 0x553   :  { %v9230_v0 = vadd.f32 %v4787_v31, %v4764_v5 }
 0x556   :  { %v4741_v42 = vpop.f32.mrf.mxu1  ;;  %v4801_v43 = vpop.f32.mrf.mxu0 }
 0x557   :  { %v4742_v62 = vadd.f32 %v4741_v42, %v4718_v12  ;;  %v4859_v60 = vpop.f32.mrf.mxu2  ;;  %v9234_v4 = vpop.f32.mrf.mxu3  ;;  %v4802_v23 = vadd.f32 %v4801_v43, %v4778_v51 }
 0x559   :  { %v4766_v56 = vadd.f32 %v4765_v49, %v4742_v62 }
 0x55b   :  { %v9232_v45 = vadd.f32 %v4789_v11, %v4766_v56 }
 0x55e   :  { %v4803_v26 = vpop.f32.mrf.mxu0  ;;  %v4825_v59 = vpop.f32.mrf.mxu1 }
 0x55f   :  { %v9236_v24 = vpop.f32.mrf.mxu2  ;;  %v9238_v37 = vpop.f32.mrf.mxu3  ;;  %v4826_v44 = vadd.f32 %v4825_v59, %v4802_v23  ;;  %v4804_v38 = vadd.f32 %v4803_v26, %v4780_v33 }
 0x561   :  { %v4850_v17 = vadd.f32 %v4849_v7, %v4826_v44 }
 0x563   :  { %v4874_v63 = vadd.f32 %v4873_v32, %v4850_v17 }
 0x566   :  { %v4806_v30 = vpop.f32.mrf.mxu0  ;;  %v4827_v2 = vpop.f32.mrf.mxu1 }
 0x567   :  { %v4945_v41 = vpop.f32.mrf.mxu2  ;;  %v4969_v55 = vpop.f32.mrf.mxu3  ;;  %v4828_v40 = vadd.f32 %v4827_v2, %v4804_v38  ;;  %v4807_v15 = vadd.f32 %v4806_v30, %v4783_v8 }
 0x569   :  { %v4852_v31 = vadd.f32 %v4851_v57, %v4828_v40 }
 0x56b   :  { %v4876_v49 = vadd.f32 %v4875_v46, %v4852_v31 }
 0x56e   :  { %v4808_v27 = vpop.f32.mrf.mxu0  ;;  %v4830_v54 = vpop.f32.mrf.mxu1 }
 0x56f   :  { %v4947_v16 = vpop.f32.mrf.mxu2  ;;  %v4971_v18 = vpop.f32.mrf.mxu3  ;;  %v4831_v51 = vadd.f32 %v4830_v54, %v4807_v15  ;;  %v4809_v19 = vadd.f32 %v4808_v27, %v4785_v10 }
 0x571   :  { %v4855_v61 = vadd.f32 %v4854_v47, %v4831_v51 }
 0x573   :  { %v4879_v32 = vadd.f32 %v4878_v25, %v4855_v61 }
 0x576   :  { %v4811_v28 = vpop.f32.mrf.mxu0  ;;  %v4832_v53 = vpop.f32.mrf.mxu1 }
 0x577   :  { %v4950_v7 = vpop.f32.mrf.mxu2  ;;  %v4833_v9 = vadd.f32 %v4832_v53, %v4809_v19  ;;  %v4974_v1 = vpop.f32.mrf.mxu3  ;;  %v4812_v42 = vadd.f32 %v4811_v28, %v9230_v0 }
 0x579   :  { %v4857_v57 = vadd.f32 %v4856_v22, %v4833_v9 }
 0x57b   :  { %v4881_v62 = vadd.f32 %v4880_v34, %v4857_v57 }
 0x57e   :  { %v4813_v36 = vpop.f32.mrf.mxu0  ;;  %v4835_v3 = vpop.f32.mrf.mxu1 }
 0x57f   :  { %v4836_v10 = vadd.f32 %v4835_v3, %v4812_v42  ;;  %v4952_v47 = vpop.f32.mrf.mxu2  ;;  %v4976_v25 = vpop.f32.mrf.mxu3  ;;  %v4814_v22 = vadd.f32 %v4813_v36, %v9232_v45 }
 0x581   :  { %v4860_v30 = vadd.f32 %v4859_v60, %v4836_v10 }
 0x583   :  { %v4884_v0 = vadd.f32 %v9234_v4, %v4860_v30 }
 0x586   :  { %v4837_v52 = vpop.f32.mrf.mxu1  ;;  %v4897_v29 = vpop.f32.mrf.mxu0 }
 0x587   :  { %v4898_v14 = vadd.f32 %v4897_v29, %v4874_v63  ;;  %v4838_v28 = vadd.f32 %v4837_v52, %v4814_v22  ;;  %v4955_v23 = vpop.f32.mrf.mxu2  ;;  %v4979_v60 = vpop.f32.mrf.mxu3 }
 0x589   :  { %v4862_v44 = vadd.f32 %v9236_v24, %v4838_v28 }
 0x58b   :  { %v4886_v45 = vadd.f32 %v9238_v37, %v4862_v44 }
 0x58e   :  { %v4899_v50 = vpop.f32.mrf.mxu0  ;;  %v4921_v21 = vpop.f32.mrf.mxu1 }
 0x58f   :  { %v4922_v13 = vadd.f32 %v4921_v21, %v4898_v14  ;;  %v4900_v11 = vadd.f32 %v4899_v50, %v4876_v49  ;;  %v4957_v38 = vpop.f32.mrf.mxu2  ;;  %v4981_v40 = vpop.f32.mrf.mxu3 }
 0x591   :  { %v4946_v6 = vadd.f32 %v4945_v41, %v4922_v13 }
 0x593   :  { %v4970_v20 = vadd.f32 %v4969_v55, %v4946_v6 }
 0x595   :  { %4985 = vst [vmem:[%s9265_s2 + $0x8] sm:$0xff] %v4970_v20 }
 0x596   :  { %v4902_v33 = vpop.f32.mrf.mxu0  ;;  %v4923_v39 = vpop.f32.mrf.mxu1 }
 0x597   :  { %v4924_v35 = vadd.f32 %v4923_v39, %v4900_v11  ;;  %v4903_v12 = vadd.f32 %v4902_v33, %v4879_v32 }
 0x599   :  { %v4948_v48 = vadd.f32 %v4947_v16, %v4924_v35 }
 0x59b   :  { %v4972_v8 = vadd.f32 %v4971_v18, %v4948_v48 }
 0x59d   :  { %4987 = vst [vmem:[%s9265_s2 + $0x18] sm:$0xff] %v4972_v8 }
 0x59e   :  { %v4904_v58 = vpop.f32.mrf.mxu0  ;;  %v4926_v5 = vpop.f32.mrf.mxu1 }
 0x59f   :  { %v4927_v46 = vadd.f32 %v4926_v5, %v4903_v12  ;;  %v4905_v26 = vadd.f32 %v4904_v58, %v4881_v62 }
 0x5a1   :  { %v4951_v43 = vadd.f32 %v4950_v7, %v4927_v46 }
 0x5a3   :  { %v4975_v56 = vadd.f32 %v4974_v1, %v4951_v43 }
 0x5a5   :  { %4989 = vst [vmem:[%s9265_s2 + $0x28] sm:$0xff] %v4975_v56 }
 0x5a6   :  { %v4928_v59 = vpop.f32.mrf.mxu1  ;;  %v4907_v27 = vpop.f32.mrf.mxu0 }
 0x5a7   :  { %v4929_v2 = vadd.f32 %v4928_v59, %v4905_v26  ;;  %v4908_v53 = vadd.f32 %v4907_v27, %v4884_v0 }
 0x5a9   :  { %v4953_v54 = vadd.f32 %v4952_v47, %v4929_v2 }
 0x5ab   :  { %v4977_v34 = vadd.f32 %v4976_v25, %v4953_v54 }
 0x5ad   :  { %4991 = vst [vmem:[%s9265_s2 + $0x38] sm:$0xff] %v4977_v34 }
 0x5ae   :  { %v4931_v3 = vpop.f32.mrf.mxu1  ;;  %v4909_v17 = vpop.f32.mrf.mxu0 }
 0x5af   :  { %v4932_v41 = vadd.f32 %v4931_v3, %v4908_v53  ;;  %v4910_v55 = vadd.f32 %v4909_v17, %v4886_v45 }
 0x5b1   :  { %v4956_v29 = vadd.f32 %v4955_v23, %v4932_v41 }
 0x5b3   :  { %v4980_v36 = vadd.f32 %v4979_v60, %v4956_v29 }
 0x5b5   :  { %4993 = vst [vmem:[%s9265_s2 + $0x48] sm:$0xff] %v4980_v36 }
 0x5b6   :  { %v4933_v4 = vpop.f32.mrf.mxu1 }
 0x5b7   :  { %v4934_v52 = vadd.f32 %v4933_v4, %v4910_v55 }
 0x5b9   :  { %v4958_v63 = vadd.f32 %v4957_v38, %v4934_v52 }
 0x5bb   :  { %v4982_v14 = vadd.f32 %v4981_v40, %v4958_v63 }
 0x5bd   :  { %4995 = vst [vmem:[%s9265_s2 + $0x58] sm:$0xff] %v4982_v14 }

</bundles_post_ra>
